<compile_context>
chip_gen: v6e
topology: v6e:2x2x1
jax: 0.10.0
libtpu: 0.0.40
codegen_flags: <defaults>
</compile_context>

<pallas_src>
import functools

import jax
import jax.numpy as jnp
from jax.experimental import pallas as pl
from jax.experimental.pallas import tpu as pltpu


# ----------------------------- in-kernel helpers ----------------------------

def _conv_accumulate(x_ref, w_ref, xpad_ref, patch_ref, *, K, P):
    """Direct KxK 'same' conv of one NHWC image via a single folded MXU matmul.

    x_ref:     (H, W, Cin)            bf16 input block (unpadded)
    w_ref:     (K*K*Cin, Cout_p)      bf16 weights, contraction idx = (di,dj,ci)
    xpad_ref:  (H+2P, W+2P, Cin) f32  VMEM scratch (halo built here, not in HBM)
    patch_ref: (H*W, K*K*Cin)    bf16 VMEM scratch (folded patch matrix)
    returns:   (H*W, Cout_p) f32 accumulator
    """
    H, W, Cin = x_ref.shape
    HW = H * W

    # Zero halo + interior copy (f32 scratch: cheap, relayout-safe slicing).
    xpad_ref[...] = jnp.zeros(xpad_ref.shape, xpad_ref.dtype)
    xpad_ref[P:P + H, P:P + W, :] = x_ref[...].astype(xpad_ref.dtype)

    # Build the (H*W, K*K*Cin) patch: 9 shifted taps side by side along lanes.
    for di in range(K):
        for dj in range(K):
            t = di * K + dj
            tap = xpad_ref[di:di + H, dj:dj + W, :]          # (H, W, Cin)
            patch_ref[:, t * Cin:(t + 1) * Cin] = (
                tap.reshape(HW, Cin).astype(patch_ref.dtype))

    # One MXU matmul, contraction depth K*K*Cin, f32 accumulation.
    return jnp.dot(patch_ref[...], w_ref[...],
                   preferred_element_type=jnp.float32)


# ------------------------------- Pallas kernels ------------------------------

def conv_stats_kernel(x_ref, w_ref, stats_ref, xpad_ref, patch_ref, *, K, P):
    # Pass 1: conv + per-image per-channel sum / sum-of-squares (BN batch stats).
    acc = _conv_accumulate(x_ref, w_ref, xpad_ref, patch_ref, K=K, P=P)
    stats_ref[0:1, :] = jnp.sum(acc, axis=0, keepdims=True)
    stats_ref[1:2, :] = jnp.sum(acc * acc, axis=0, keepdims=True)


def conv_bn_relu_kernel(x_ref, w_ref, scale_ref, shift_ref, o_ref,
                        xpad_ref, patch_ref, *, K, P):
    # Pass 2: recompute conv, fuse BN affine + ReLU + slice + NCHW transpose.
    Cout = o_ref.shape[0]
    acc = _conv_accumulate(x_ref, w_ref, xpad_ref, patch_ref, K=K, P=P)
    y = jnp.maximum(acc * scale_ref[...] + shift_ref[...], 0.0)   # (HW, Cout_p)
    yt = jnp.transpose(y)                                          # XLU transpose
    o_ref[...] = yt[:Cout, :]                                      # (Cout, HW)


# ---------------------------------- wrapper ----------------------------------

def unet_down_forward(x, params, *, kernel_size=3, stride=1, padding=1, eps=1e-5):
    assert stride == 1 and padding == (kernel_size - 1) // 2, \
        "kernel specialized to the unetDown defaults (stride=1, 'same' padding)"
    N, Cin, H, W = x.shape
    Wt = params["w"]
    Cout = Wt.shape[0]
    K, P = kernel_size, padding
    HW = H * W
    Cout_p = ((Cout + 127) // 128) * 128          # MXU / lane padding (VMEM only)
    KKC = K * K * Cin

    # NCHW -> NHWC bf16 (single small input-sized pass; halo is built in-kernel,
    # so no materialized jnp.pad pass in HBM).
    x_nhwc = jnp.transpose(x, (0, 2, 3, 1)).astype(jnp.bfloat16)

    # (Cout, Cin, K, K) -> (K*K*Cin, Cout_p) bf16; contraction index = (di,dj,ci).
    w2 = jnp.transpose(Wt, (2, 3, 1, 0)).reshape(KKC, Cout)
    w2 = jnp.pad(w2, ((0, 0), (0, Cout_p - Cout))).astype(jnp.bfloat16)

    # NOTE: params["b"] (conv bias) is intentionally not applied: under
    # train-mode BatchNorm it is exactly cancelled by the batch-mean
    # subtraction, so adding it is dead work (see review).

    scratch = [pltpu.VMEM((H + 2 * P, W + 2 * P, Cin), jnp.float32),
               pltpu.VMEM((HW, KKC), jnp.bfloat16)]
    cparams = pltpu.CompilerParams(dimension_semantics=("parallel",),
                                   vmem_limit_bytes=48 * 1024 * 1024)

    # ---- pass 1: conv (single folded matmul) + BN partial statistics --------
    stats = pl.pallas_call(
        functools.partial(conv_stats_kernel, K=K, P=P),
        out_shape=jax.ShapeDtypeStruct((N, 2, Cout_p), jnp.float32),
        grid_spec=pltpu.PrefetchScalarGridSpec(
            num_scalar_prefetch=0,
            grid=(N,),
            in_specs=[
                pl.BlockSpec((None, H, W, Cin), lambda n: (n, 0, 0, 0)),
                pl.BlockSpec((KKC, Cout_p), lambda n: (0, 0)),
            ],
            out_specs=pl.BlockSpec((None, 2, Cout_p), lambda n: (n, 0, 0)),
            scratch_shapes=scratch,
        ),
        compiler_params=cparams,
    )(x_nhwc, w2)

    # ---- BN affine from batch statistics (train-mode, biased variance) ------
    cnt = float(N * HW)
    ssum = jnp.sum(stats[:, 0, :], axis=0)                    # (Cout_p,)
    ssq = jnp.sum(stats[:, 1, :], axis=0)
    mean = ssum / cnt
    var = jnp.maximum(ssq / cnt - mean * mean, 0.0)
    gamma = jnp.pad(params["gamma"].astype(jnp.float32), (0, Cout_p - Cout))
    beta = jnp.pad(params["beta"].astype(jnp.float32), (0, Cout_p - Cout))
    inv = gamma * jax.lax.rsqrt(var + eps)
    scale = inv.reshape(1, Cout_p)
    shift = (beta - mean * inv).reshape(1, Cout_p)

    # ---- pass 2: conv recompute + fused BN + ReLU + slice + NCHW transpose ---
    y = pl.pallas_call(
        functools.partial(conv_bn_relu_kernel, K=K, P=P),
        out_shape=jax.ShapeDtypeStruct((N, Cout, HW), jnp.float32),
        grid_spec=pltpu.PrefetchScalarGridSpec(
            num_scalar_prefetch=0,
            grid=(N,),
            in_specs=[
                pl.BlockSpec((None, H, W, Cin), lambda n: (n, 0, 0, 0)),
                pl.BlockSpec((KKC, Cout_p), lambda n: (0, 0)),
                pl.BlockSpec((1, Cout_p), lambda n: (0, 0)),
                pl.BlockSpec((1, Cout_p), lambda n: (0, 0)),
            ],
            out_specs=pl.BlockSpec((None, Cout, HW), lambda n: (n, 0, 0)),
            scratch_shapes=scratch,
        ),
        compiler_params=cparams,
    )(x_nhwc, w2, scale, shift)

    # Output is already channel-major; contiguous reshape only (no HBM copy).
    return y.reshape(N, Cout, H, W)


# --------------------------- pure-JAX reference ------------------------------

def ref_unet_down(x, params, *, stride=1, padding=1, eps=1e-5,
                  conv_dtype=jnp.float32):
    Wt, b = params["w"], params["b"]
    gamma, beta = params["gamma"], params["beta"]
    dn = ("NCHW", "OIHW", "NCHW")
    pads = ((padding, padding), (padding, padding))
    out = jax.lax.conv_general_dilated(
        x.astype(conv_dtype), Wt.astype(conv_dtype), (stride, stride), pads,
        dimension_numbers=dn, preferred_element_type=jnp.float32)
    out = out + b[None, :, None, None]
    mean = out.mean(axis=(0, 2, 3), keepdims=True)
    var = out.var(axis=(0, 2, 3), keepdims=True)      # biased (train-mode BN)
    y = (out - mean) / jnp.sqrt(var + eps) * gamma[None, :, None, None] \
        + beta[None, :, None, None]
    return jnp.maximum(y, 0.0)


# ------------------------------------ main -----------------------------------

if __name__ == "__main__":
    # unetDown(input_channel=4, output_channel=32, kernel_size=3, stride=1,
    #          padding=1, use_batch_norm=True) at small shapes.
    N, CIN, COUT, K = 2, 4, 32, 3
    H, W_SP = 16, 16

    key = jax.random.PRNGKey(0)
    kx, kw, kb, kg, kbe = jax.random.split(key, 5)

    x = jax.random.normal(kx, (N, CIN, H, W_SP), dtype=jnp.float32)
    params = {
        "w": 0.1 * jax.random.normal(kw, (COUT, CIN, K, K), dtype=jnp.float32),
        "b": 0.1 * jax.random.normal(kb, (COUT,), dtype=jnp.float32),
        "gamma": 1.0 + 0.1 * jax.random.normal(kg, (COUT,), dtype=jnp.float32),
        "beta": 0.1 * jax.random.normal(kbe, (COUT,), dtype=jnp.float32),
    }

    y = jax.jit(functools.partial(unet_down_forward, kernel_size=K,
                                  stride=1, padding=1))(x, params)
    jax.block_until_ready(y)
    assert y.shape == (N, COUT, H, W_SP)

    # Strict check against a reference that uses the same bf16 conv inputs
    # (the kernel quantizes activations/weights to bf16 for the MXU).
    y_ref_bf16 = ref_unet_down(x, params, stride=1, padding=1,
                               conv_dtype=jnp.bfloat16)
    err_bf16 = jnp.max(jnp.abs(y - y_ref_bf16))
    assert jnp.allclose(y, y_ref_bf16, rtol=5e-3, atol=5e-3), \
        f"max err vs bf16-conv ref: {err_bf16}"

    # Loose sanity check against the full-f32 PyTorch-equivalent forward
    # (difference is only the bf16 input quantization of the conv).
    y_ref_f32 = ref_unet_down(x, params, stride=1, padding=1,
                              conv_dtype=jnp.float32)
    err_f32 = jnp.max(jnp.abs(y - y_ref_f32))
    assert jnp.allclose(y, y_ref_f32, rtol=5e-2, atol=5e-2), \
        f"max err vs f32 ref: {err_f32}"

    print("KERNEL_OK")
</pallas_src>

<mosaic_0001>
module attributes {stable_mosaic.version = 11 : i64} {
  func.func @conv_stats_kernel(%arg0: i32, %arg1: memref<1x16x16x4xbf16, #tpu.memory_space<vmem>>, %arg2: memref<36x128xbf16, #tpu.memory_space<vmem>>, %arg3: memref<1x2x128xf32, #tpu.memory_space<vmem>>, %arg4: memref<18x18x4xf32, #tpu.memory_space<vmem>>, %arg5: memref<256x36xbf16, #tpu.memory_space<vmem>>) attributes {dimension_semantics = [#tpu.dimension_semantics<parallel>], iteration_bounds = array<i64: 2>, scalar_prefetch = 0 : i64, scratch_operands = 2 : i64, tpu.core_type = #tpu.core_type<tc>, window_params = [{transform_indices = @transform_0, window_bounds = array<i64: 1, 16, 16, 4>}, {pipeline_mode = #tpu.pipeline_mode<synchronous>, transform_indices = @transform_1, window_bounds = array<i64: 36, 128>}, {transform_indices = @transform_2, window_bounds = array<i64: 1, 2, 128>}]} {
    %cst = arith.constant 0.000000e+00 : f32
    %0 = vector.broadcast %cst : f32 to vector<18x18x4xf32>
    %c0 = arith.constant 0 : index
    %c0_0 = arith.constant 0 : index
    %c0_1 = arith.constant 0 : index
    %1 = vector.load %arg4[%c0, %c0_0, %c0_1] : memref<18x18x4xf32, #tpu.memory_space<vmem>>, vector<18x18x4xf32>
    tpu.vector_store %arg4[%c0, %c0_0, %c0_1], %0 {strides = array<i32>} : memref<18x18x4xf32, #tpu.memory_space<vmem>>, vector<18x18x4xf32>,
    %c0_2 = arith.constant 0 : index
    %c0_3 = arith.constant 0 : index
    %c0_4 = arith.constant 0 : index
    %c0_5 = arith.constant 0 : index
    %2 = vector.load %arg1[%c0_2, %c0_3, %c0_4, %c0_5] : memref<1x16x16x4xbf16, #tpu.memory_space<vmem>>, vector<1x16x16x4xbf16>
    %3 = vector.shape_cast %2 : vector<1x16x16x4xbf16> to vector<16x16x4xbf16>
    %4 = arith.extf %3 : vector<16x16x4xbf16> to vector<16x16x4xf32>
    %c1 = arith.constant 1 : index
    %c1_6 = arith.constant 1 : index
    %c0_7 = arith.constant 0 : index
    %5 = vector.load %arg4[%c1, %c1_6, %c0_7] : memref<18x18x4xf32, #tpu.memory_space<vmem>>, vector<16x16x4xf32>
    tpu.vector_store %arg4[%c1, %c1_6, %c0_7], %4 {strides = array<i32>} : memref<18x18x4xf32, #tpu.memory_space<vmem>>, vector<16x16x4xf32>,
    %c0_8 = arith.constant 0 : index
    %c0_9 = arith.constant 0 : index
    %c0_10 = arith.constant 0 : index
    %6 = vector.load %arg4[%c0_8, %c0_9, %c0_10] : memref<18x18x4xf32, #tpu.memory_space<vmem>>, vector<16x16x4xf32>
    %7 = vector.shape_cast %6 : vector<16x16x4xf32> to vector<256x4xf32>
    %8 = arith.truncf %7 : vector<256x4xf32> to vector<256x4xbf16>
    %c0_11 = arith.constant 0 : index
    %c0_12 = arith.constant 0 : index
    %9 = vector.load %arg5[%c0_11, %c0_12] : memref<256x36xbf16, #tpu.memory_space<vmem>>, vector<256x4xbf16>
    tpu.vector_store %arg5[%c0_11, %c0_12], %8 {strides = array<i32>} : memref<256x36xbf16, #tpu.memory_space<vmem>>, vector<256x4xbf16>,
    %c0_13 = arith.constant 0 : index
    %c1_14 = arith.constant 1 : index
    %c0_15 = arith.constant 0 : index
    %10 = vector.load %arg4[%c0_13, %c1_14, %c0_15] : memref<18x18x4xf32, #tpu.memory_space<vmem>>, vector<16x16x4xf32>
    %11 = vector.shape_cast %10 : vector<16x16x4xf32> to vector<256x4xf32>
    %12 = arith.truncf %11 : vector<256x4xf32> to vector<256x4xbf16>
    %c0_16 = arith.constant 0 : index
    %c4 = arith.constant 4 : index
    %13 = vector.load %arg5[%c0_16, %c4] : memref<256x36xbf16, #tpu.memory_space<vmem>>, vector<256x4xbf16>
    tpu.vector_store %arg5[%c0_16, %c4], %12 {strides = array<i32>} : memref<256x36xbf16, #tpu.memory_space<vmem>>, vector<256x4xbf16>,
    %c0_17 = arith.constant 0 : index
    %c2 = arith.constant 2 : index
    %c0_18 = arith.constant 0 : index
    %14 = vector.load %arg4[%c0_17, %c2, %c0_18] : memref<18x18x4xf32, #tpu.memory_space<vmem>>, vector<16x16x4xf32>
    %15 = vector.shape_cast %14 : vector<16x16x4xf32> to vector<256x4xf32>
    %16 = arith.truncf %15 : vector<256x4xf32> to vector<256x4xbf16>
    %c0_19 = arith.constant 0 : index
    %c8 = arith.constant 8 : index
    %17 = vector.load %arg5[%c0_19, %c8] : memref<256x36xbf16, #tpu.memory_space<vmem>>, vector<256x4xbf16>
    tpu.vector_store %arg5[%c0_19, %c8], %16 {strides = array<i32>} : memref<256x36xbf16, #tpu.memory_space<vmem>>, vector<256x4xbf16>,
    %c1_20 = arith.constant 1 : index
    %c0_21 = arith.constant 0 : index
    %c0_22 = arith.constant 0 : index
    %18 = vector.load %arg4[%c1_20, %c0_21, %c0_22] : memref<18x18x4xf32, #tpu.memory_space<vmem>>, vector<16x16x4xf32>
    %19 = vector.shape_cast %18 : vector<16x16x4xf32> to vector<256x4xf32>
    %20 = arith.truncf %19 : vector<256x4xf32> to vector<256x4xbf16>
    %c0_23 = arith.constant 0 : index
    %c12 = arith.constant 12 : index
    %21 = vector.load %arg5[%c0_23, %c12] : memref<256x36xbf16, #tpu.memory_space<vmem>>, vector<256x4xbf16>
    tpu.vector_store %arg5[%c0_23, %c12], %20 {strides = array<i32>} : memref<256x36xbf16, #tpu.memory_space<vmem>>, vector<256x4xbf16>,
    %c1_24 = arith.constant 1 : index
    %c1_25 = arith.constant 1 : index
    %c0_26 = arith.constant 0 : index
    %22 = vector.load %arg4[%c1_24, %c1_25, %c0_26] : memref<18x18x4xf32, #tpu.memory_space<vmem>>, vector<16x16x4xf32>
    %23 = vector.shape_cast %22 : vector<16x16x4xf32> to vector<256x4xf32>
    %24 = arith.truncf %23 : vector<256x4xf32> to vector<256x4xbf16>
    %c0_27 = arith.constant 0 : index
    %c16 = arith.constant 16 : index
    %25 = vector.load %arg5[%c0_27, %c16] : memref<256x36xbf16, #tpu.memory_space<vmem>>, vector<256x4xbf16>
    tpu.vector_store %arg5[%c0_27, %c16], %24 {strides = array<i32>} : memref<256x36xbf16, #tpu.memory_space<vmem>>, vector<256x4xbf16>,
    %c1_28 = arith.constant 1 : index
    %c2_29 = arith.constant 2 : index
    %c0_30 = arith.constant 0 : index
    %26 = vector.load %arg4[%c1_28, %c2_29, %c0_30] : memref<18x18x4xf32, #tpu.memory_space<vmem>>, vector<16x16x4xf32>
    %27 = vector.shape_cast %26 : vector<16x16x4xf32> to vector<256x4xf32>
    %28 = arith.truncf %27 : vector<256x4xf32> to vector<256x4xbf16>
    %c0_31 = arith.constant 0 : index
    %c20 = arith.constant 20 : index
    %29 = vector.load %arg5[%c0_31, %c20] : memref<256x36xbf16, #tpu.memory_space<vmem>>, vector<256x4xbf16>
    tpu.vector_store %arg5[%c0_31, %c20], %28 {strides = array<i32>} : memref<256x36xbf16, #tpu.memory_space<vmem>>, vector<256x4xbf16>,
    %c2_32 = arith.constant 2 : index
    %c0_33 = arith.constant 0 : index
    %c0_34 = arith.constant 0 : index
    %30 = vector.load %arg4[%c2_32, %c0_33, %c0_34] : memref<18x18x4xf32, #tpu.memory_space<vmem>>, vector<16x16x4xf32>
    %31 = vector.shape_cast %30 : vector<16x16x4xf32> to vector<256x4xf32>
    %32 = arith.truncf %31 : vector<256x4xf32> to vector<256x4xbf16>
    %c0_35 = arith.constant 0 : index
    %c24 = arith.constant 24 : index
    %33 = vector.load %arg5[%c0_35, %c24] : memref<256x36xbf16, #tpu.memory_space<vmem>>, vector<256x4xbf16>
    tpu.vector_store %arg5[%c0_35, %c24], %32 {strides = array<i32>} : memref<256x36xbf16, #tpu.memory_space<vmem>>, vector<256x4xbf16>,
    %c2_36 = arith.constant 2 : index
    %c1_37 = arith.constant 1 : index
    %c0_38 = arith.constant 0 : index
    %34 = vector.load %arg4[%c2_36, %c1_37, %c0_38] : memref<18x18x4xf32, #tpu.memory_space<vmem>>, vector<16x16x4xf32>
    %35 = vector.shape_cast %34 : vector<16x16x4xf32> to vector<256x4xf32>
    %36 = arith.truncf %35 : vector<256x4xf32> to vector<256x4xbf16>
    %c0_39 = arith.constant 0 : index
    %c28 = arith.constant 28 : index
    %37 = vector.load %arg5[%c0_39, %c28] : memref<256x36xbf16, #tpu.memory_space<vmem>>, vector<256x4xbf16>
    tpu.vector_store %arg5[%c0_39, %c28], %36 {strides = array<i32>} : memref<256x36xbf16, #tpu.memory_space<vmem>>, vector<256x4xbf16>,
    %c2_40 = arith.constant 2 : index
    %c2_41 = arith.constant 2 : index
    %c0_42 = arith.constant 0 : index
    %38 = vector.load %arg4[%c2_40, %c2_41, %c0_42] : memref<18x18x4xf32, #tpu.memory_space<vmem>>, vector<16x16x4xf32>
    %39 = vector.shape_cast %38 : vector<16x16x4xf32> to vector<256x4xf32>
    %40 = arith.truncf %39 : vector<256x4xf32> to vector<256x4xbf16>
    %c0_43 = arith.constant 0 : index
    %c32 = arith.constant 32 : index
    %41 = vector.load %arg5[%c0_43, %c32] : memref<256x36xbf16, #tpu.memory_space<vmem>>, vector<256x4xbf16>
    tpu.vector_store %arg5[%c0_43, %c32], %40 {strides = array<i32>} : memref<256x36xbf16, #tpu.memory_space<vmem>>, vector<256x4xbf16>,
    %c0_44 = arith.constant 0 : index
    %c0_45 = arith.constant 0 : index
    %42 = vector.load %arg5[%c0_44, %c0_45] : memref<256x36xbf16, #tpu.memory_space<vmem>>, vector<256x36xbf16>
    %c0_46 = arith.constant 0 : index
    %c0_47 = arith.constant 0 : index
    %43 = vector.load %arg2[%c0_46, %c0_47] : memref<36x128xbf16, #tpu.memory_space<vmem>>, vector<36x128xbf16>
    %cst_48 = arith.constant dense<0.000000e+00> : vector<256x128xf32>
    %44 = tpu.matmul %42, %43, %cst_48 {dimension_numbers = #tpu.dot_dimension_numbers<[1], [0], [0], [1], [0, 0, 1, 1], [], []>} : vector<256x36xbf16>, vector<36x128xbf16>, vector<256x128xf32> -> vector<256x128xf32>
    %cst_49 = arith.constant dense<0.000000e+00> : vector<128xf32>
    %45 = vector.multi_reduction <add>, %44, %cst_49 [0] : vector<256x128xf32> to vector<128xf32>
    %46 = vector.shape_cast %45 : vector<128xf32> to vector<1x128xf32>
    %c0_50 = arith.constant 0 : index
    %c0_51 = arith.constant 0 : index
    %c0_52 = arith.constant 0 : index
    %47 = vector.load %arg3[%c0_50, %c0_51, %c0_52] : memref<1x2x128xf32, #tpu.memory_space<vmem>>, vector<1x1x128xf32>
    %48 = vector.shape_cast %47 : vector<1x1x128xf32> to vector<1x128xf32>
    %49 = vector.shape_cast %46 : vector<1x128xf32> to vector<1x1x128xf32>
    tpu.vector_store %arg3[%c0_50, %c0_51, %c0_52], %49 {strides = array<i32>} : memref<1x2x128xf32, #tpu.memory_space<vmem>>, vector<1x1x128xf32>,
    %50 = arith.mulf %44, %44 : vector<256x128xf32>
    %cst_53 = arith.constant dense<0.000000e+00> : vector<128xf32>
    %51 = vector.multi_reduction <add>, %50, %cst_53 [0] : vector<256x128xf32> to vector<128xf32>
    %52 = vector.shape_cast %51 : vector<128xf32> to vector<1x128xf32>
    %c0_54 = arith.constant 0 : index
    %c1_55 = arith.constant 1 : index
    %c0_56 = arith.constant 0 : index
    %53 = vector.load %arg3[%c0_54, %c1_55, %c0_56] : memref<1x2x128xf32, #tpu.memory_space<vmem>>, vector<1x1x128xf32>
    %54 = vector.shape_cast %53 : vector<1x1x128xf32> to vector<1x128xf32>
    %55 = vector.shape_cast %52 : vector<1x128xf32> to vector<1x1x128xf32>
    tpu.vector_store %arg3[%c0_54, %c1_55, %c0_56], %55 {strides = array<i32>} : memref<1x2x128xf32, #tpu.memory_space<vmem>>, vector<1x1x128xf32>,
    return
  }
  func.func @transform_0(%arg0: i32) -> (i32, i32, i32, i32) {
    %c0_i32 = arith.constant 0 : i32
    %c0_i32_0 = arith.constant 0 : i32
    %c0_i32_1 = arith.constant 0 : i32
    %c0_i32_2 = arith.constant 0 : i32
    return %arg0, %c0_i32, %c0_i32_0, %c0_i32_1 : i32, i32, i32, i32
  }
  func.func @transform_1(%arg0: i32) -> (i32, i32) {
    %c0_i32 = arith.constant 0 : i32
    %c0_i32_0 = arith.constant 0 : i32
    %c0_i32_1 = arith.constant 0 : i32
    return %c0_i32, %c0_i32_0 : i32, i32
  }
  func.func @transform_2(%arg0: i32) -> (i32, i32, i32) {
    %c0_i32 = arith.constant 0 : i32
    %c0_i32_0 = arith.constant 0 : i32
    %c0_i32_1 = arith.constant 0 : i32
    return %arg0, %c0_i32, %c0_i32_0 : i32, i32, i32
  }
}

module attributes {stable_mosaic.version = 11 : i64} {
  func.func @conv_bn_relu_kernel(%arg0: i32, %arg1: memref<1x16x16x4xbf16, #tpu.memory_space<vmem>>, %arg2: memref<36x128xbf16, #tpu.memory_space<vmem>>, %arg3: memref<1x128xf32, #tpu.memory_space<vmem>>, %arg4: memref<1x128xf32, #tpu.memory_space<vmem>>, %arg5: memref<1x32x256xf32, #tpu.memory_space<vmem>>, %arg6: memref<18x18x4xf32, #tpu.memory_space<vmem>>, %arg7: memref<256x36xbf16, #tpu.memory_space<vmem>>) attributes {dimension_semantics = [#tpu.dimension_semantics<parallel>], iteration_bounds = array<i64: 2>, scalar_prefetch = 0 : i64, scratch_operands = 2 : i64, tpu.core_type = #tpu.core_type<tc>, window_params = [{transform_indices = @transform_0, window_bounds = array<i64: 1, 16, 16, 4>}, {pipeline_mode = #tpu.pipeline_mode<synchronous>, transform_indices = @transform_1, window_bounds = array<i64: 36, 128>}, {pipeline_mode = #tpu.pipeline_mode<synchronous>, transform_indices = @transform_2, window_bounds = array<i64: 1, 128>}, {pipeline_mode = #tpu.pipeline_mode<synchronous>, transform_indices = @transform_3, window_bounds = array<i64: 1, 128>}, {transform_indices = @transform_4, window_bounds = array<i64: 1, 32, 256>}]} {
    %cst = arith.constant 0.000000e+00 : f32
    %0 = vector.broadcast %cst : f32 to vector<18x18x4xf32>
    %c0 = arith.constant 0 : index
    %c0_0 = arith.constant 0 : index
    %c0_1 = arith.constant 0 : index
    %1 = vector.load %arg6[%c0, %c0_0, %c0_1] : memref<18x18x4xf32, #tpu.memory_space<vmem>>, vector<18x18x4xf32>
    tpu.vector_store %arg6[%c0, %c0_0, %c0_1], %0 {strides = array<i32>} : memref<18x18x4xf32, #tpu.memory_space<vmem>>, vector<18x18x4xf32>,
    %c0_2 = arith.constant 0 : index
    %c0_3 = arith.constant 0 : index
    %c0_4 = arith.constant 0 : index
    %c0_5 = arith.constant 0 : index
    %2 = vector.load %arg1[%c0_2, %c0_3, %c0_4, %c0_5] : memref<1x16x16x4xbf16, #tpu.memory_space<vmem>>, vector<1x16x16x4xbf16>
    %3 = vector.shape_cast %2 : vector<1x16x16x4xbf16> to vector<16x16x4xbf16>
    %4 = arith.extf %3 : vector<16x16x4xbf16> to vector<16x16x4xf32>
    %c1 = arith.constant 1 : index
    %c1_6 = arith.constant 1 : index
    %c0_7 = arith.constant 0 : index
    %5 = vector.load %arg6[%c1, %c1_6, %c0_7] : memref<18x18x4xf32, #tpu.memory_space<vmem>>, vector<16x16x4xf32>
    tpu.vector_store %arg6[%c1, %c1_6, %c0_7], %4 {strides = array<i32>} : memref<18x18x4xf32, #tpu.memory_space<vmem>>, vector<16x16x4xf32>,
    %c0_8 = arith.constant 0 : index
    %c0_9 = arith.constant 0 : index
    %c0_10 = arith.constant 0 : index
    %6 = vector.load %arg6[%c0_8, %c0_9, %c0_10] : memref<18x18x4xf32, #tpu.memory_space<vmem>>, vector<16x16x4xf32>
    %7 = vector.shape_cast %6 : vector<16x16x4xf32> to vector<256x4xf32>
    %8 = arith.truncf %7 : vector<256x4xf32> to vector<256x4xbf16>
    %c0_11 = arith.constant 0 : index
    %c0_12 = arith.constant 0 : index
    %9 = vector.load %arg7[%c0_11, %c0_12] : memref<256x36xbf16, #tpu.memory_space<vmem>>, vector<256x4xbf16>
    tpu.vector_store %arg7[%c0_11, %c0_12], %8 {strides = array<i32>} : memref<256x36xbf16, #tpu.memory_space<vmem>>, vector<256x4xbf16>,
    %c0_13 = arith.constant 0 : index
    %c1_14 = arith.constant 1 : index
    %c0_15 = arith.constant 0 : index
    %10 = vector.load %arg6[%c0_13, %c1_14, %c0_15] : memref<18x18x4xf32, #tpu.memory_space<vmem>>, vector<16x16x4xf32>
    %11 = vector.shape_cast %10 : vector<16x16x4xf32> to vector<256x4xf32>
    %12 = arith.truncf %11 : vector<256x4xf32> to vector<256x4xbf16>
    %c0_16 = arith.constant 0 : index
    %c4 = arith.constant 4 : index
    %13 = vector.load %arg7[%c0_16, %c4] : memref<256x36xbf16, #tpu.memory_space<vmem>>, vector<256x4xbf16>
    tpu.vector_store %arg7[%c0_16, %c4], %12 {strides = array<i32>} : memref<256x36xbf16, #tpu.memory_space<vmem>>, vector<256x4xbf16>,
    %c0_17 = arith.constant 0 : index
    %c2 = arith.constant 2 : index
    %c0_18 = arith.constant 0 : index
    %14 = vector.load %arg6[%c0_17, %c2, %c0_18] : memref<18x18x4xf32, #tpu.memory_space<vmem>>, vector<16x16x4xf32>
    %15 = vector.shape_cast %14 : vector<16x16x4xf32> to vector<256x4xf32>
    %16 = arith.truncf %15 : vector<256x4xf32> to vector<256x4xbf16>
    %c0_19 = arith.constant 0 : index
    %c8 = arith.constant 8 : index
    %17 = vector.load %arg7[%c0_19, %c8] : memref<256x36xbf16, #tpu.memory_space<vmem>>, vector<256x4xbf16>
    tpu.vector_store %arg7[%c0_19, %c8], %16 {strides = array<i32>} : memref<256x36xbf16, #tpu.memory_space<vmem>>, vector<256x4xbf16>,
    %c1_20 = arith.constant 1 : index
    %c0_21 = arith.constant 0 : index
    %c0_22 = arith.constant 0 : index
    %18 = vector.load %arg6[%c1_20, %c0_21, %c0_22] : memref<18x18x4xf32, #tpu.memory_space<vmem>>, vector<16x16x4xf32>
    %19 = vector.shape_cast %18 : vector<16x16x4xf32> to vector<256x4xf32>
    %20 = arith.truncf %19 : vector<256x4xf32> to vector<256x4xbf16>
    %c0_23 = arith.constant 0 : index
    %c12 = arith.constant 12 : index
    %21 = vector.load %arg7[%c0_23, %c12] : memref<256x36xbf16, #tpu.memory_space<vmem>>, vector<256x4xbf16>
    tpu.vector_store %arg7[%c0_23, %c12], %20 {strides = array<i32>} : memref<256x36xbf16, #tpu.memory_space<vmem>>, vector<256x4xbf16>,
    %c1_24 = arith.constant 1 : index
    %c1_25 = arith.constant 1 : index
    %c0_26 = arith.constant 0 : index
    %22 = vector.load %arg6[%c1_24, %c1_25, %c0_26] : memref<18x18x4xf32, #tpu.memory_space<vmem>>, vector<16x16x4xf32>
    %23 = vector.shape_cast %22 : vector<16x16x4xf32> to vector<256x4xf32>
    %24 = arith.truncf %23 : vector<256x4xf32> to vector<256x4xbf16>
    %c0_27 = arith.constant 0 : index
    %c16 = arith.constant 16 : index
    %25 = vector.load %arg7[%c0_27, %c16] : memref<256x36xbf16, #tpu.memory_space<vmem>>, vector<256x4xbf16>
    tpu.vector_store %arg7[%c0_27, %c16], %24 {strides = array<i32>} : memref<256x36xbf16, #tpu.memory_space<vmem>>, vector<256x4xbf16>,
    %c1_28 = arith.constant 1 : index
    %c2_29 = arith.constant 2 : index
    %c0_30 = arith.constant 0 : index
    %26 = vector.load %arg6[%c1_28, %c2_29, %c0_30] : memref<18x18x4xf32, #tpu.memory_space<vmem>>, vector<16x16x4xf32>
    %27 = vector.shape_cast %26 : vector<16x16x4xf32> to vector<256x4xf32>
    %28 = arith.truncf %27 : vector<256x4xf32> to vector<256x4xbf16>
    %c0_31 = arith.constant 0 : index
    %c20 = arith.constant 20 : index
    %29 = vector.load %arg7[%c0_31, %c20] : memref<256x36xbf16, #tpu.memory_space<vmem>>, vector<256x4xbf16>
    tpu.vector_store %arg7[%c0_31, %c20], %28 {strides = array<i32>} : memref<256x36xbf16, #tpu.memory_space<vmem>>, vector<256x4xbf16>,
    %c2_32 = arith.constant 2 : index
    %c0_33 = arith.constant 0 : index
    %c0_34 = arith.constant 0 : index
    %30 = vector.load %arg6[%c2_32, %c0_33, %c0_34] : memref<18x18x4xf32, #tpu.memory_space<vmem>>, vector<16x16x4xf32>
    %31 = vector.shape_cast %30 : vector<16x16x4xf32> to vector<256x4xf32>
    %32 = arith.truncf %31 : vector<256x4xf32> to vector<256x4xbf16>
    %c0_35 = arith.constant 0 : index
    %c24 = arith.constant 24 : index
    %33 = vector.load %arg7[%c0_35, %c24] : memref<256x36xbf16, #tpu.memory_space<vmem>>, vector<256x4xbf16>
    tpu.vector_store %arg7[%c0_35, %c24], %32 {strides = array<i32>} : memref<256x36xbf16, #tpu.memory_space<vmem>>, vector<256x4xbf16>,
    %c2_36 = arith.constant 2 : index
    %c1_37 = arith.constant 1 : index
    %c0_38 = arith.constant 0 : index
    %34 = vector.load %arg6[%c2_36, %c1_37, %c0_38] : memref<18x18x4xf32, #tpu.memory_space<vmem>>, vector<16x16x4xf32>
    %35 = vector.shape_cast %34 : vector<16x16x4xf32> to vector<256x4xf32>
    %36 = arith.truncf %35 : vector<256x4xf32> to vector<256x4xbf16>
    %c0_39 = arith.constant 0 : index
    %c28 = arith.constant 28 : index
    %37 = vector.load %arg7[%c0_39, %c28] : memref<256x36xbf16, #tpu.memory_space<vmem>>, vector<256x4xbf16>
    tpu.vector_store %arg7[%c0_39, %c28], %36 {strides = array<i32>} : memref<256x36xbf16, #tpu.memory_space<vmem>>, vector<256x4xbf16>,
    %c2_40 = arith.constant 2 : index
    %c2_41 = arith.constant 2 : index
    %c0_42 = arith.constant 0 : index
    %38 = vector.load %arg6[%c2_40, %c2_41, %c0_42] : memref<18x18x4xf32, #tpu.memory_space<vmem>>, vector<16x16x4xf32>
    %39 = vector.shape_cast %38 : vector<16x16x4xf32> to vector<256x4xf32>
    %40 = arith.truncf %39 : vector<256x4xf32> to vector<256x4xbf16>
    %c0_43 = arith.constant 0 : index
    %c32 = arith.constant 32 : index
    %41 = vector.load %arg7[%c0_43, %c32] : memref<256x36xbf16, #tpu.memory_space<vmem>>, vector<256x4xbf16>
    tpu.vector_store %arg7[%c0_43, %c32], %40 {strides = array<i32>} : memref<256x36xbf16, #tpu.memory_space<vmem>>, vector<256x4xbf16>,
    %c0_44 = arith.constant 0 : index
    %c0_45 = arith.constant 0 : index
    %42 = vector.load %arg7[%c0_44, %c0_45] : memref<256x36xbf16, #tpu.memory_space<vmem>>, vector<256x36xbf16>
    %c0_46 = arith.constant 0 : index
    %c0_47 = arith.constant 0 : index
    %43 = vector.load %arg2[%c0_46, %c0_47] : memref<36x128xbf16, #tpu.memory_space<vmem>>, vector<36x128xbf16>
    %cst_48 = arith.constant dense<0.000000e+00> : vector<256x128xf32>
    %44 = tpu.matmul %42, %43, %cst_48 {dimension_numbers = #tpu.dot_dimension_numbers<[1], [0], [0], [1], [0, 0, 1, 1], [], []>} : vector<256x36xbf16>, vector<36x128xbf16>, vector<256x128xf32> -> vector<256x128xf32>
    %c0_49 = arith.constant 0 : index
    %c0_50 = arith.constant 0 : index
    %45 = vector.load %arg3[%c0_49, %c0_50] : memref<1x128xf32, #tpu.memory_space<vmem>>, vector<1x128xf32>
    %46 = vector.broadcast %45 : vector<1x128xf32> to vector<256x128xf32>
    %47 = arith.mulf %44, %46 : vector<256x128xf32>
    %c0_51 = arith.constant 0 : index
    %c0_52 = arith.constant 0 : index
    %48 = vector.load %arg4[%c0_51, %c0_52] : memref<1x128xf32, #tpu.memory_space<vmem>>, vector<1x128xf32>
    %49 = vector.broadcast %48 : vector<1x128xf32> to vector<256x128xf32>
    %50 = arith.addf %47, %49 : vector<256x128xf32>
    %cst_53 = arith.constant 0.000000e+00 : f32
    %51 = vector.broadcast %cst_53 : f32 to vector<256x128xf32>
    %52 = arith.maximumf %50, %51 : vector<256x128xf32>
    %53 = tpu.transpose %52, [1, 0] : vector<256x128xf32> -> vector<128x256xf32>
    %54 = vector.extract_strided_slice %53 {offsets = [0, 0], sizes = [32, 256], strides = [1, 1]} : vector<128x256xf32> to vector<32x256xf32>
    %c0_54 = arith.constant 0 : index
    %c0_55 = arith.constant 0 : index
    %c0_56 = arith.constant 0 : index
    %55 = vector.load %arg5[%c0_54, %c0_55, %c0_56] : memref<1x32x256xf32, #tpu.memory_space<vmem>>, vector<1x32x256xf32>
    %56 = vector.shape_cast %55 : vector<1x32x256xf32> to vector<32x256xf32>
    %57 = vector.shape_cast %54 : vector<32x256xf32> to vector<1x32x256xf32>
    tpu.vector_store %arg5[%c0_54, %c0_55, %c0_56], %57 {strides = array<i32>} : memref<1x32x256xf32, #tpu.memory_space<vmem>>, vector<1x32x256xf32>,
    return
  }
  func.func @transform_0(%arg0: i32) -> (i32, i32, i32, i32) {
    %c0_i32 = arith.constant 0 : i32
    %c0_i32_0 = arith.constant 0 : i32
    %c0_i32_1 = arith.constant 0 : i32
    %c0_i32_2 = arith.constant 0 : i32
    return %arg0, %c0_i32, %c0_i32_0, %c0_i32_1 : i32, i32, i32, i32
  }
  func.func @transform_1(%arg0: i32) -> (i32, i32) {
    %c0_i32 = arith.constant 0 : i32
    %c0_i32_0 = arith.constant 0 : i32
    %c0_i32_1 = arith.constant 0 : i32
    return %c0_i32, %c0_i32_0 : i32, i32
  }
  func.func @transform_2(%arg0: i32) -> (i32, i32) {
    %c0_i32 = arith.constant 0 : i32
    %c0_i32_0 = arith.constant 0 : i32
    %c0_i32_1 = arith.constant 0 : i32
    return %c0_i32, %c0_i32_0 : i32, i32
  }
  func.func @transform_3(%arg0: i32) -> (i32, i32) {
    %c0_i32 = arith.constant 0 : i32
    %c0_i32_0 = arith.constant 0 : i32
    %c0_i32_1 = arith.constant 0 : i32
    return %c0_i32, %c0_i32_0 : i32, i32
  }
  func.func @transform_4(%arg0: i32) -> (i32, i32, i32) {
    %c0_i32 = arith.constant 0 : i32
    %c0_i32_0 = arith.constant 0 : i32
    %c0_i32_1 = arith.constant 0 : i32
    return %arg0, %c0_i32, %c0_i32_0 : i32, i32, i32
  }
}

</mosaic_0001>

<bundles_post_ra>
// kernel: unet_down_forward.2
= control target key start
LH: loop header
LB: loop body
LE: loop exit
PB: predicated region body
PF: predicated region fallthrough
CT: control target
= control target key end

     0   :  { %s3887_s9 = smov 0   ;;  %s4767_s0 = inlined_call_operand.vmem [shape: bf16[2,16,16,4], index: 0, kind: input, shape index: {}]   ;;  %s4768_s1 = inlined_call_operand.vmem [shape: bf16[36,128], index: 1, kind: input, shape index: {}]   ;;  %s4769_s2 = inlined_call_operand.vmem [shape: f32[2,2,128], index: 2, kind: output, shape index: {}]  }
   0x1 LB: > { %s3053_s10 = sadd.s32 4294967295, %s3861_s9   ;;  %p3057_p0 = scmp.ge.s32.totalorder %s3861_s9, 1  ;;  %s3861_s9 = sphi %s3887_s9, %s12_s9  }
   0x2   : > { %p112_p1 = scmp.lt.s32.totalorder %s3861_s9, 3 }
   0x4   : > { %p113_p2 = pnand %p3057_p0, %p112_p1 }
   0x5   : > { %p3897_p3 = scmp.lt.s32.totalorder (!%p113_p2), %s3053_s10, 1  ;;  %s3864_s16 = smov (!%p113_p2), 4  }
   0x6   : > { %116 = sbr.rel (%p113_p2) target bundleno = 900 (0x384), region = 28  ;;  %s3865_s17 = smov (!%p113_p2), 8  }
   0x7   : > { %s3866_s18 = smov (!%p113_p2), 12   ;;  %s3867_s19 = smov (!%p113_p2), 16  }
   0x8   : > { %s3868_s20 = smov (!%p113_p2), 20   ;;  %s3869_s21 = smov (!%p113_p2), 24  }
   0x9   : > { %s3870_s22 = smov (!%p113_p2), 28   ;;  %s3871_s27 = smov (!%p113_p2), 32  }
   0xb   : > { %vm143_vm0 = vcmask 31744   ;;  %vm146_vm1 = vcmask 25600   ;;  %v3863_v0 = vmov 0.0   ;;  %s4772_s10 = smov (!%p3897_p3, %s3053_s10), 1  ;;  %vm456_vm2 = vcmask 27648  }
   0xc   : > { %144 = vst.msk [vmem:[#allocation2] sm:$0xff] %vm143_vm0, %v3863_v0  ;;  %145 = vst.msk [vmem:[#allocation2 + $0x8] sm:$0xff] %vm143_vm0, %v3863_v0  ;;  %s3386_s12 = sshll.u32 %s4772_s10, 7  ;;  %vm713_vm3 = vcmask 60448   ;;  %vm970_vm4 = vcmask 93248   ;;  %vm2727_vm5 = vcmask 1041408  }
   0xd   : > { %148 = vst.msk [vmem:[#allocation2 + $0x18] sm:$0xff] %vm143_vm0, %v3863_v0  ;;  %149 = vst.msk [vmem:[#allocation2 + $0x20] sm:$0xff] %vm143_vm0, %v3863_v0  ;;  %s3965_s15 = scalar_lea.vmem %s4767_s0, %s3386_s12  ;;  %vm1227_vm6 = vcmask 126048   ;;  %vm1484_vm7 = vcmask 158848   ;;  %vm1741_vm8 = vcmask 191648   ;;  %vm1999_vm9 = vcmask 224448  }
   0xe   : > { %151 = vst.msk [vmem:[#allocation2 + $0x30] sm:$0xff] %vm143_vm0, %v3863_v0  ;;  %152 = vst.msk [vmem:[#allocation2 + $0x38] sm:$0xff] %vm143_vm0, %v3863_v0  ;;  %v3676_v1 = vld [vmem:[%s3965_s15] sm:$0xff]   ;;  %v3739_v2 = vld [vmem:[%s3965_s15 + $0x8] sm:$0xff]   ;;  %vm2256_vm10 = vcmask 257248   ;;  %vm2513_vm11 = vcmask 290048  }
   0xf   : > { %154 = vst.msk [vmem:[#allocation2 + $0x48] sm:$0xff] %vm143_vm0, %v3863_v0  ;;  %155 = vst.msk [vmem:[#allocation2 + $0x50] sm:$0xff] %vm143_vm0, %v3863_v0  ;;  %v3740_v3 = vld [vmem:[%s3965_s15 + $0x10] sm:$0xff]   ;;  %v3677_v4 = vunpack.c.l.bf16 %v3676_v1  ;;  %v3678_v5 = vunpack.c.h.bf16 %v3676_v1  ;;  %v3681_v6 = vunpack.c.l.bf16 %v3739_v2  ;;  %v3682_v7 = vunpack.c.h.bf16 %v3739_v2  ;;  %v3741_v8 = vld [vmem:[%s3965_s15 + $0x18] sm:$0xff]   ;;  %s3060_s30 = sshll.u32 %s4772_s10, 1 }
  0x10   : > { %157 = vst.msk [vmem:[#allocation2 + $0x60] sm:$0xff] %vm143_vm0, %v3863_v0  ;;  %158 = vst.msk [vmem:[#allocation2 + $0x68] sm:$0xff] %vm143_vm0, %v3863_v0  ;;  %v3742_v9 = vld [vmem:[%s3965_s15 + $0x20] sm:$0xff]   ;;  %v3743_v10 = vld [vmem:[%s3965_s15 + $0x28] sm:$0xff]   ;;  %v3685_v13 = vunpack.c.l.bf16 %v3740_v3  ;;  %v3686_v14 = vunpack.c.h.bf16 %v3740_v3  ;;  %v3689_v15 = vunpack.c.l.bf16 %v3741_v8  ;;  %v3690_v16 = vunpack.c.h.bf16 %v3741_v8  ;;  %s141_s5 = scalar_lea.vmem %s4769_s2, %s3060_s30 }
  0x11   : > { %160 = vst.msk [vmem:[#allocation2 + $0x78] sm:$0xff] %vm143_vm0, %v3863_v0  ;;  %161 = vst.msk [vmem:[#allocation2 + $0x80] sm:$0xff] %vm143_vm0, %v3863_v0  ;;  %v3744_v17 = vld [vmem:[%s3965_s15 + $0x30] sm:$0xff]   ;;  %v3693_v20 = vunpack.c.l.bf16 %v3742_v9  ;;  %v3694_v21 = vunpack.c.h.bf16 %v3742_v9  ;;  %v3745_v22 = vld [vmem:[%s3965_s15 + $0x38] sm:$0xff]   ;;  %v3697_v25 = vunpack.c.l.bf16 %v3743_v10  ;;  %v3698_v26 = vunpack.c.h.bf16 %v3743_v10 }
  0x12   : > { %163 = vst.msk [vmem:[#allocation2 + $0x90] sm:$0xff] %vm143_vm0, %v3863_v0  ;;  %164 = vst.msk [vmem:[#allocation2 + $0x98] sm:$0xff] %vm143_vm0, %v3863_v0  ;;  %v3746_v23 = vld [vmem:[%s3965_s15 + $0x40] sm:$0xff]   ;;  %v3747_v24 = vld [vmem:[%s3965_s15 + $0x48] sm:$0xff]   ;;  %v3701_v27 = vunpack.c.l.bf16 %v3744_v17  ;;  %v3702_v28 = vunpack.c.h.bf16 %v3744_v17  ;;  %v3705_v32 = vunpack.c.l.bf16 %v3745_v22  ;;  %v3706_v33 = vunpack.c.h.bf16 %v3745_v22 }
  0x13   : > { %166 = vst.msk [vmem:[#allocation2 + $0xa8] sm:$0xff] %vm143_vm0, %v3863_v0  ;;  %167 = vst.msk [vmem:[#allocation2 + $0xb0] sm:$0xff] %vm143_vm0, %v3863_v0  ;;  %v489_v11 = vld [vmem:[#allocation2 + $0x1] sm:$0xff]  ;;  %v3748_v29 = vld [vmem:[%s3965_s15 + $0x50] sm:$0xff]   ;;  %v3709_v34 = vunpack.c.l.bf16 %v3746_v23  ;;  %v3710_v35 = vunpack.c.h.bf16 %v3746_v23  ;;  %v3713_v38 = vunpack.c.l.bf16 %v3747_v24  ;;  %v3714_v39 = vunpack.c.h.bf16 %v3747_v24 }
  0x14   : > { %169 = vst.msk [vmem:[#allocation2 + $0xc0] sm:$0xff] %vm143_vm0, %v3863_v0  ;;  %170 = vst.msk [vmem:[#allocation2 + $0xc8] sm:$0xff] %vm143_vm0, %v3863_v0  ;;  %v3419_v18 = vpack.c.bf16 %v489_v11, %v489_v11  ;;  %v3749_v30 = vld [vmem:[%s3965_s15 + $0x58] sm:$0xff]   ;;  %v3750_v31 = vld [vmem:[%s3965_s15 + $0x60] sm:$0xff]   ;;  %v3717_v40 = vunpack.c.l.bf16 %v3748_v29  ;;  %v3718_v41 = vunpack.c.h.bf16 %v3748_v29  ;;  %vm2678_vm12 = vcmask 293888  }
  0x15   : > { %172 = vst.msk [vmem:[#allocation2 + $0xd8] sm:$0xff] %vm143_vm0, %v3863_v0  ;;  %173 = vst.msk [vmem:[#allocation2 + $0xe0] sm:$0xff] %vm143_vm0, %v3863_v0  ;;  %v3751_v36 = vld [vmem:[%s3965_s15 + $0x68] sm:$0xff]   ;;  %v3752_v37 = vld [vmem:[%s3965_s15 + $0x70] sm:$0xff]   ;;  %v3721_v44 = vunpack.c.l.bf16 %v3749_v30  ;;  %v3722_v45 = vunpack.c.h.bf16 %v3749_v30  ;;  %v3725_v46 = vunpack.c.l.bf16 %v3750_v31  ;;  %v3726_v47 = vunpack.c.h.bf16 %v3750_v31 }
  0x16   : > { %175 = vst.msk [vmem:[#allocation2 + $0xf0] sm:$0xff] %vm143_vm0, %v3863_v0  ;;  %176 = vst.msk [vmem:[#allocation2 + $0xf8] sm:$0xff] %vm143_vm0, %v3863_v0  ;;  %617 = vrot.lane.b32.xlu0 %v3419_v18, %s3864_s16  ;;  %v296_v42 = vld [vmem:[#allocation2] sm:$0xff]  ;;  %v297_v43 = vld [vmem:[#allocation2 + $0x8] sm:$0xff]  ;;  %v3729_v48 = vunpack.c.l.bf16 %v3751_v36  ;;  %v3730_v49 = vunpack.c.h.bf16 %v3751_v36  ;;  %v3733_v50 = vunpack.c.l.bf16 %v3752_v37  ;;  %v3734_v51 = vunpack.c.h.bf16 %v3752_v37 }
  0x17   : > { %178 = vst.msk [vmem:[#allocation2 + $0x108] sm:$0xff] %vm143_vm0, %v3863_v0  ;;  %179 = vst.msk [vmem:[#allocation2 + $0x110] sm:$0xff] %vm143_vm0, %v3863_v0  ;;  %v3387_v52 = vpack.c.bf16 %v296_v42, %v296_v42  ;;  %v3388_v53 = vpack.c.bf16 %v297_v43, %v297_v43 }
  0x18   : > { %181 = vst.msk [vmem:[#allocation2 + $0x120] sm:$0xff] %vm143_vm0, %v3863_v0  ;;  %182 = vst.msk [vmem:[#allocation2 + $0x128] sm:$0xff] %vm143_vm0, %v3863_v0 }
  0x19   : > { %184 = vst.msk [vmem:[#allocation2 + $0x138] sm:$0xff] %vm143_vm0, %v3863_v0  ;;  %185 = vst.msk [vmem:[#allocation2 + $0x140] sm:$0xff] %vm143_vm0, %v3863_v0 }
  0x1a   : > { %187 = vst.msk [vmem:[#allocation2 + $0x150] sm:$0xff] %vm143_vm0, %v3863_v0  ;;  %188 = vst.msk [vmem:[#allocation2 + $0x158] sm:$0xff] %vm143_vm0, %v3863_v0 }
  0x1b   : > { %190 = vst.msk [vmem:[#allocation2 + $0x168] sm:$0xff] %vm143_vm0, %v3863_v0  ;;  %191 = vst.msk [vmem:[#allocation2 + $0x170] sm:$0xff] %vm143_vm0, %v3863_v0 }
  0x1c   : > { %193 = vst.msk [vmem:[#allocation2 + $0x180] sm:$0xff] %vm143_vm0, %v3863_v0  ;;  %194 = vst.msk [vmem:[#allocation2 + $0x188] sm:$0xff] %vm143_vm0, %v3863_v0 }
  0x1d   : > { %196 = vst.msk [vmem:[#allocation2 + $0x198] sm:$0xff] %vm143_vm0, %v3863_v0  ;;  %197 = vst.msk [vmem:[#allocation2 + $0x1a0] sm:$0xff] %vm143_vm0, %v3863_v0 }
  0x1e   : > { %147 = vst.msk [vmem:[#allocation2 + $0x10] sm:$0x3] %vm146_vm1, %v3863_v0  ;;  %150 = vst.msk [vmem:[#allocation2 + $0x28] sm:$0x3] %vm146_vm1, %v3863_v0 }
  0x1f   : > { %153 = vst.msk [vmem:[#allocation2 + $0x40] sm:$0x3] %vm146_vm1, %v3863_v0  ;;  %156 = vst.msk [vmem:[#allocation2 + $0x58] sm:$0x3] %vm146_vm1, %v3863_v0 }
  0x20   : > { %159 = vst.msk [vmem:[#allocation2 + $0x70] sm:$0x3] %vm146_vm1, %v3863_v0  ;;  %162 = vst.msk [vmem:[#allocation2 + $0x88] sm:$0x3] %vm146_vm1, %v3863_v0 }
  0x21   : > { %165 = vst.msk [vmem:[#allocation2 + $0xa0] sm:$0x3] %vm146_vm1, %v3863_v0  ;;  %168 = vst.msk [vmem:[#allocation2 + $0xb8] sm:$0x3] %vm146_vm1, %v3863_v0 }
  0x22   : > { %171 = vst.msk [vmem:[#allocation2 + $0xd0] sm:$0x3] %vm146_vm1, %v3863_v0  ;;  %174 = vst.msk [vmem:[#allocation2 + $0xe8] sm:$0x3] %vm146_vm1, %v3863_v0 }
  0x23   : > { %177 = vst.msk [vmem:[#allocation2 + $0x100] sm:$0x3] %vm146_vm1, %v3863_v0  ;;  %180 = vst.msk [vmem:[#allocation2 + $0x118] sm:$0x3] %vm146_vm1, %v3863_v0 }
  0x24   : > { %183 = vst.msk [vmem:[#allocation2 + $0x130] sm:$0x3] %vm146_vm1, %v3863_v0  ;;  %186 = vst.msk [vmem:[#allocation2 + $0x148] sm:$0x3] %vm146_vm1, %v3863_v0 }
  0x25   : > { %189 = vst.msk [vmem:[#allocation2 + $0x160] sm:$0x3] %vm146_vm1, %v3863_v0  ;;  %192 = vst.msk [vmem:[#allocation2 + $0x178] sm:$0x3] %vm146_vm1, %v3863_v0  ;;  %v3973_v12 = vld [vmem:[#allocation2 + $0x9] sm:$0xff] }
  0x26   : > { %195 = vst.msk [vmem:[#allocation2 + $0x190] sm:$0x3] %vm146_vm1, %v3863_v0  ;;  %198 = vst.msk [vmem:[#allocation2 + $0x1a8] sm:$0x3] %vm146_vm1, %v3863_v0  ;;  %v3420_v19 = vpack.c.bf16 %v3973_v12, %v3973_v12 }
  0x27   : > { %264 = vst.msk [vmem:[#allocation2 + $0x19] sm:$0xff] %vm143_vm0, %v3677_v4  ;;  %265 = vst.msk [vmem:[#allocation2 + $0x21] sm:$0xff] %vm143_vm0, %v3678_v5 }
  0x28   : > { %266 = vst.msk [vmem:[#allocation2 + $0x31] sm:$0xff] %vm143_vm0, %v3681_v6  ;;  %267 = vst.msk [vmem:[#allocation2 + $0x39] sm:$0xff] %vm143_vm0, %v3682_v7  ;;  %619 = vrot.lane.b32.xlu0 %v3420_v19, %s3864_s16 }
  0x29   : > { %268 = vst.msk [vmem:[#allocation2 + $0x49] sm:$0xff] %vm143_vm0, %v3685_v13  ;;  %269 = vst.msk [vmem:[#allocation2 + $0x51] sm:$0xff] %vm143_vm0, %v3686_v14 }
  0x2a   : > { %270 = vst.msk [vmem:[#allocation2 + $0x61] sm:$0xff] %vm143_vm0, %v3689_v15  ;;  %271 = vst.msk [vmem:[#allocation2 + $0x69] sm:$0xff] %vm143_vm0, %v3690_v16 }
  0x2b   : > { %272 = vst.msk [vmem:[#allocation2 + $0x79] sm:$0xff] %vm143_vm0, %v3693_v20  ;;  %273 = vst.msk [vmem:[#allocation2 + $0x81] sm:$0xff] %vm143_vm0, %v3694_v21 }
  0x2c   : > { %274 = vst.msk [vmem:[#allocation2 + $0x91] sm:$0xff] %vm143_vm0, %v3697_v25  ;;  %275 = vst.msk [vmem:[#allocation2 + $0x99] sm:$0xff] %vm143_vm0, %v3698_v26 }
  0x2d   : > { %276 = vst.msk [vmem:[#allocation2 + $0xa9] sm:$0xff] %vm143_vm0, %v3701_v27  ;;  %277 = vst.msk [vmem:[#allocation2 + $0xb1] sm:$0xff] %vm143_vm0, %v3702_v28 }
  0x2e   : > { %278 = vst.msk [vmem:[#allocation2 + $0xc1] sm:$0xff] %vm143_vm0, %v3705_v32  ;;  %279 = vst.msk [vmem:[#allocation2 + $0xc9] sm:$0xff] %vm143_vm0, %v3706_v33  ;;  %v491_v54 = vld [vmem:[#allocation2 + $0x19] sm:$0xff]  ;;  %v492_v55 = vld [vmem:[#allocation2 + $0x21] sm:$0xff] }
  0x2f   : > { %280 = vst.msk [vmem:[#allocation2 + $0xd9] sm:$0xff] %vm143_vm0, %v3709_v34  ;;  %281 = vst.msk [vmem:[#allocation2 + $0xe1] sm:$0xff] %vm143_vm0, %v3710_v35  ;;  %v493_v56 = vld [vmem:[#allocation2 + $0x31] sm:$0xff]  ;;  %v4018_v57 = vpack.c.bf16 %v491_v54, %v491_v54  ;;  %v4026_v60 = vpack.c.bf16 %v492_v55, %v492_v55  ;;  %v494_v62 = vld [vmem:[#allocation2 + $0x39] sm:$0xff] }
  0x30   : > { %282 = vst.msk [vmem:[#allocation2 + $0xf1] sm:$0xff] %vm143_vm0, %v3713_v38  ;;  %283 = vst.msk [vmem:[#allocation2 + $0xf9] sm:$0xff] %vm143_vm0, %v3714_v39  ;;  %v4020_v58 = vpack.c.bf16 %v493_v56, %v493_v56  ;;  %v495_v59 = vld [vmem:[#allocation2 + $0x49] sm:$0xff]  ;;  %v4032_v0 = vpack.c.bf16 %v494_v62, %v494_v62  ;;  %v496_v2 = vld [vmem:[#allocation2 + $0x51] sm:$0xff] }
  0x31   : > { %284 = vst.msk [vmem:[#allocation2 + $0x109] sm:$0xff] %vm143_vm0, %v3717_v40  ;;  %285 = vst.msk [vmem:[#allocation2 + $0x111] sm:$0xff] %vm143_vm0, %v3718_v41  ;;  %621 = vrot.lane.b32.xlu1 %v4018_v57, %s3864_s16  ;;  %v3425_v61 = vpack.c.bf16 %v495_v59, %v495_v59  ;;  %v497_v63 = vld [vmem:[#allocation2 + $0x61] sm:$0xff]  ;;  %v3426_v4 = vpack.c.bf16 %v496_v2, %v496_v2  ;;  %v498_v6 = vld [vmem:[#allocation2 + $0x69] sm:$0xff] }
  0x32   : > { %286 = vst.msk [vmem:[#allocation2 + $0x121] sm:$0xff] %vm143_vm0, %v3721_v44  ;;  %287 = vst.msk [vmem:[#allocation2 + $0x129] sm:$0xff] %vm143_vm0, %v3722_v45  ;;  %625 = vrot.lane.b32.xlu0 %v4020_v58, %s3864_s16  ;;  %v3427_v1 = vpack.c.bf16 %v497_v63, %v497_v63  ;;  %v499_v3 = vld [vmem:[#allocation2 + $0x79] sm:$0xff]  ;;  %v3428_v8 = vpack.c.bf16 %v498_v6, %v498_v6  ;;  %v500_v10 = vld [vmem:[#allocation2 + $0x81] sm:$0xff] }
  0x33   : > { %288 = vst.msk [vmem:[#allocation2 + $0x139] sm:$0xff] %vm143_vm0, %v3725_v46  ;;  %289 = vst.msk [vmem:[#allocation2 + $0x141] sm:$0xff] %vm143_vm0, %v3726_v47  ;;  %v3429_v5 = vpack.c.bf16 %v499_v3, %v499_v3  ;;  %v501_v7 = vld [vmem:[#allocation2 + $0x91] sm:$0xff]  ;;  %v3430_v13 = vpack.c.bf16 %v500_v10, %v500_v10  ;;  %v502_v14 = vld [vmem:[#allocation2 + $0x99] sm:$0xff] }
  0x34   : > { %290 = vst.msk [vmem:[#allocation2 + $0x151] sm:$0xff] %vm143_vm0, %v3729_v48  ;;  %291 = vst.msk [vmem:[#allocation2 + $0x159] sm:$0xff] %vm143_vm0, %v3730_v49  ;;  %v3431_v9 = vpack.c.bf16 %v501_v7, %v501_v7  ;;  %v503_v11 = vld [vmem:[#allocation2 + $0xa9] sm:$0xff]  ;;  %v298_v12 = vld [vmem:[#allocation2 + $0x18] sm:$0xff]  ;;  %v3432_v27 = vpack.c.bf16 %v502_v14, %v502_v14 }
  0x35   : > { %292 = vst.msk [vmem:[#allocation2 + $0x169] sm:$0xff] %vm143_vm0, %v3733_v50  ;;  %293 = vst.msk [vmem:[#allocation2 + $0x171] sm:$0xff] %vm143_vm0, %v3734_v51  ;;  %623 = vrot.lane.b32.xlu1 %v4026_v60, %s3864_s16  ;;  %v3433_v15 = vpack.c.bf16 %v503_v11, %v503_v11  ;;  %v505_v16 = vld [vmem:[#allocation2 + $0xc1] sm:$0xff]  ;;  %v4042_v17 = vpack.c.bf16 %v298_v12, %v298_v12  ;;  %v300_v20 = vld [vmem:[#allocation2 + $0x30] sm:$0xff] }
  0x36   : > { %457 = vst.msk [vmem:[#allocation3] sm:$0xf] %vm456_vm2, %v3387_v52  ;;  %458 = vst.msk [vmem:[#allocation3 + $0x4] sm:$0xf] %vm456_vm2, %v3388_v53  ;;  %629 = vrot.lane.b32.xlu0 %v3425_v61, %s3864_s16  ;;  %v299_v18 = vld [vmem:[#allocation2 + $0x20] sm:$0xff]  ;;  %v301_v21 = vld [vmem:[#allocation2 + $0x38] sm:$0xff]  ;;  %v4050_v23 = vpack.c.bf16 %v300_v20, %v300_v20  ;;  %v3435_v28 = vpack.c.bf16 %v505_v16, %v505_v16 }
  0x37   : > { %v4044_v19 = vpack.c.bf16 %v299_v18, %v299_v18  ;;  %v4046_v22 = vld [vmem:[#allocation2 + $0xb1] sm:$0xff]  ;;  %459 = vst.msk [vmem:[#allocation3 + $0x8] sm:$0xf] %vm456_vm2, %v4042_v17  ;;  %v4052_v24 = vpack.c.bf16 %v301_v21, %v301_v21  ;;  %v302_v25 = vld [vmem:[#allocation2 + $0x48] sm:$0xff]  ;;  %v507_v29 = vld [vmem:[#allocation2 + $0xd9] sm:$0xff] }
  0x38   : > { %v303_v26 = vld [vmem:[#allocation2 + $0x50] sm:$0xff]  ;;  %v4056_v30 = vpack.c.bf16 %v302_v25, %v302_v25  ;;  %v304_v32 = vld [vmem:[#allocation2 + $0x60] sm:$0xff]  ;;  %v305_v33 = vld [vmem:[#allocation2 + $0x68] sm:$0xff]  ;;  %461 = vst.msk [vmem:[#allocation3 + $0x10] sm:$0xf] %vm456_vm2, %v4050_v23  ;;  %v3434_v53 = vpack.c.bf16 %v4046_v22, %v4046_v22  ;;  %v3437_v63 = vpack.c.bf16 %v507_v29, %v507_v29 }
  0x39   : > { %627 = vrot.lane.b32.xlu1 %v4032_v0, %s3864_s16  ;;  %460 = vst.msk [vmem:[#allocation3 + $0xc] sm:$0xf] %vm456_vm2, %v4044_v19  ;;  %v4058_v31 = vpack.c.bf16 %v303_v26, %v303_v26  ;;  %v306_v34 = vld [vmem:[#allocation2 + $0x78] sm:$0xff]  ;;  %462 = vst.msk [vmem:[#allocation3 + $0x14] sm:$0xf] %vm456_vm2, %v4052_v24  ;;  %v4066_v35 = vpack.c.bf16 %v304_v32, %v304_v32  ;;  %v4068_v36 = vpack.c.bf16 %v305_v33, %v305_v33  ;;  %v307_v38 = vld [vmem:[#allocation2 + $0x80] sm:$0xff] }
  0x3a   : > { %633 = vrot.lane.b32.xlu0 %v3427_v1, %s3864_s16  ;;  %v4070_v37 = vpack.c.bf16 %v306_v34, %v306_v34  ;;  %v308_v39 = vld [vmem:[#allocation2 + $0x90] sm:$0xff]  ;;  %v309_v40 = vld [vmem:[#allocation2 + $0x98] sm:$0xff]  ;;  %463 = vst.msk [vmem:[#allocation3 + $0x18] sm:$0xf] %vm456_vm2, %v4056_v30  ;;  %v4076_v41 = vpack.c.bf16 %v307_v38, %v307_v38  ;;  %v310_v44 = vld [vmem:[#allocation2 + $0xa8] sm:$0xff] }
  0x3b   : > { %464 = vst.msk [vmem:[#allocation3 + $0x1c] sm:$0xf] %vm456_vm2, %v4058_v31  ;;  %v4078_v42 = vpack.c.bf16 %v308_v39, %v308_v39  ;;  %v4080_v43 = vpack.c.bf16 %v309_v40, %v309_v40  ;;  %v311_v45 = vld [vmem:[#allocation2 + $0xb0] sm:$0xff]  ;;  %v312_v46 = vld [vmem:[#allocation2 + $0xc0] sm:$0xff]  ;;  %465 = vst.msk [vmem:[#allocation3 + $0x20] sm:$0xf] %vm456_vm2, %v4066_v35  ;;  %v4088_v47 = vpack.c.bf16 %v310_v44, %v310_v44 }
  0x3c   : > { %466 = vst.msk [vmem:[#allocation3 + $0x24] sm:$0xf] %vm456_vm2, %v4068_v36  ;;  %467 = vst.msk [vmem:[#allocation3 + $0x28] sm:$0xf] %vm456_vm2, %v4070_v37  ;;  %v4090_v48 = vpack.c.bf16 %v311_v45, %v311_v45  ;;  %v4092_v49 = vpack.c.bf16 %v312_v46, %v312_v46  ;;  %v313_v50 = vld [vmem:[#allocation2 + $0xc8] sm:$0xff]  ;;  %v314_v51 = vld [vmem:[#allocation2 + $0xd8] sm:$0xff] }
  0x3d   : > { %631 = vrot.lane.b32.xlu1 %v3426_v4, %s3864_s16  ;;  %v315_v52 = vld [vmem:[#allocation2 + $0xe0] sm:$0xff]  ;;  %468 = vst.msk [vmem:[#allocation3 + $0x2c] sm:$0xf] %vm456_vm2, %v4076_v41  ;;  %469 = vst.msk [vmem:[#allocation3 + $0x30] sm:$0xf] %vm456_vm2, %v4078_v42  ;;  %v4102_v54 = vpack.c.bf16 %v313_v50, %v313_v50  ;;  %v4104_v55 = vpack.c.bf16 %v314_v51, %v314_v51  ;;  %v316_v59 = vld [vmem:[#allocation2 + $0xf0] sm:$0xff] }
  0x3e   : > { %637 = vrot.lane.b32.xlu0 %v3429_v5, %s3864_s16  ;;  %470 = vst.msk [vmem:[#allocation3 + $0x34] sm:$0xf] %vm456_vm2, %v4080_v43  ;;  %v4106_v56 = vpack.c.bf16 %v315_v52, %v315_v52  ;;  %v317_v61 = vld [vmem:[#allocation2 + $0xf8] sm:$0xff]  ;;  %v506_v62 = vld [vmem:[#allocation2 + $0xc9] sm:$0xff]  ;;  %471 = vst.msk [vmem:[#allocation3 + $0x38] sm:$0xf] %vm456_vm2, %v4088_v47  ;;  %v4116_v1 = vpack.c.bf16 %v316_v59, %v316_v59 }
  0x3f   : > { %472 = vst.msk [vmem:[#allocation3 + $0x3c] sm:$0xf] %vm456_vm2, %v4090_v48  ;;  %473 = vst.msk [vmem:[#allocation3 + $0x40] sm:$0xf] %vm456_vm2, %v4092_v49  ;;  %v4118_v2 = vpack.c.bf16 %v317_v61, %v317_v61  ;;  %v509_v3 = vld [vmem:[#allocation2 + $0xf1] sm:$0xff]  ;;  %v3436_v4 = vpack.c.bf16 %v506_v62, %v506_v62  ;;  %v318_v5 = vld [vmem:[#allocation2 + $0x108] sm:$0xff] }
  0x40   : > { %474 = vst.msk [vmem:[#allocation3 + $0x44] sm:$0xf] %vm456_vm2, %v4102_v54  ;;  %475 = vst.msk [vmem:[#allocation3 + $0x48] sm:$0xf] %vm456_vm2, %v4104_v55  ;;  %v319_v6 = vld [vmem:[#allocation2 + $0x110] sm:$0xff]  ;;  %v508_v7 = vld [vmem:[#allocation2 + $0xe1] sm:$0xff] }
  0x41   : > { %635 = vrot.lane.b32.xlu1 %v3428_v8, %s3864_s16  ;;  %476 = vst.msk [vmem:[#allocation3 + $0x4c] sm:$0xf] %vm456_vm2, %v4106_v56  ;;  %477 = vst.msk [vmem:[#allocation3 + $0x50] sm:$0xf] %vm456_vm2, %v4116_v1  ;;  %v3439_v8 = vpack.c.bf16 %v509_v3, %v509_v3  ;;  %v3410_v10 = vpack.c.bf16 %v319_v6, %v319_v6  ;;  %v511_v11 = vld [vmem:[#allocation2 + $0x109] sm:$0xff]  ;;  %v3438_v12 = vpack.c.bf16 %v508_v7, %v508_v7  ;;  %v513_v21 = vld [vmem:[#allocation2 + $0x121] sm:$0xff] }
  0x42   : > { %641 = vrot.lane.b32.xlu0 %v3431_v9, %s3864_s16  ;;  %478 = vst.msk [vmem:[#allocation3 + $0x54] sm:$0xf] %vm456_vm2, %v4118_v2  ;;  %v3409_v9 = vpack.c.bf16 %v318_v5, %v318_v5  ;;  %v321_v14 = vld [vmem:[#allocation2 + $0x128] sm:$0xff]  ;;  %v3441_v16 = vpack.c.bf16 %v511_v11, %v511_v11  ;;  %v322_v25 = vld [vmem:[#allocation2 + $0x138] sm:$0xff]  ;;  %v323_v26 = vld [vmem:[#allocation2 + $0x140] sm:$0xff] }
  0x43   : > { %480 = vst.msk [vmem:[#allocation3 + $0x5c] sm:$0xf] %vm456_vm2, %v3410_v10  ;;  %v3412_v20 = vpack.c.bf16 %v321_v14, %v321_v14  ;;  %v3413_v29 = vpack.c.bf16 %v322_v25, %v322_v25  ;;  %v3414_v32 = vpack.c.bf16 %v323_v26, %v323_v26  ;;  %v515_v33 = vld [vmem:[#allocation2 + $0x139] sm:$0xff]  ;;  %v324_v38 = vld [vmem:[#allocation2 + $0x150] sm:$0xff]  ;;  %v326_v52 = vld [vmem:[#allocation2 + $0x168] sm:$0xff] }
  0x44   : > { %479 = vst.msk [vmem:[#allocation3 + $0x58] sm:$0xf] %vm456_vm2, %v3409_v9  ;;  %v325_v39 = vld [vmem:[#allocation2 + $0x158] sm:$0xff]  ;;  %v514_v40 = vld [vmem:[#allocation2 + $0x129] sm:$0xff]  ;;  %v3445_v44 = vpack.c.bf16 %v515_v33, %v515_v33  ;;  %v3415_v45 = vpack.c.bf16 %v324_v38, %v324_v38  ;;  %v3417_v61 = vpack.c.bf16 %v326_v52, %v326_v52 }
  0x45   : > { %639 = vrot.lane.b32.xlu1 %v3430_v13, %s3864_s16  ;;  %v320_v13 = vld [vmem:[#allocation2 + $0x120] sm:$0xff]  ;;  %482 = vst.msk [vmem:[#allocation3 + $0x64] sm:$0xf] %vm456_vm2, %v3412_v20  ;;  %483 = vst.msk [vmem:[#allocation3 + $0x68] sm:$0xf] %vm456_vm2, %v3413_v29  ;;  %v3416_v46 = vpack.c.bf16 %v325_v39, %v325_v39  ;;  %v517_v50 = vld [vmem:[#allocation2 + $0x151] sm:$0xff]  ;;  %v3444_v51 = vpack.c.bf16 %v514_v40, %v514_v40 }
  0x46   : > { %645 = vrot.lane.b32.xlu0 %v3433_v15, %s3864_s16  ;;  %v510_v15 = vld [vmem:[#allocation2 + $0xf9] sm:$0xff]  ;;  %v3411_v18 = vpack.c.bf16 %v320_v13, %v320_v13  ;;  %484 = vst.msk [vmem:[#allocation3 + $0x6c] sm:$0xf] %vm456_vm2, %v3414_v32  ;;  %485 = vst.msk [vmem:[#allocation3 + $0x70] sm:$0xf] %vm456_vm2, %v3415_v45  ;;  %v3447_v59 = vpack.c.bf16 %v517_v50, %v517_v50  ;;  %v519_v3 = vld [vmem:[#allocation2 + $0x169] sm:$0xff] }
  0x47   : > { %v3440_v22 = vpack.c.bf16 %v510_v15, %v510_v15  ;;  %486 = vst.msk [vmem:[#allocation3 + $0x74] sm:$0xf] %vm456_vm2, %v3416_v46  ;;  %487 = vst.msk [vmem:[#allocation3 + $0x78] sm:$0xf] %vm456_vm2, %v3417_v61  ;;  %v3449_v5 = vpack.c.bf16 %v519_v3, %v519_v3  ;;  %v518_v6 = vld [vmem:[#allocation2 + $0x159] sm:$0xff]  ;;  %v746_v7 = vld [vmem:[#allocation2 + $0x2] sm:$0xff] }
  0x48   : > { %481 = vst.msk [vmem:[#allocation3 + $0x60] sm:$0xf] %vm456_vm2, %v3411_v18  ;;  %v3451_v9 = vpack.c.bf16 %v746_v7, %v746_v7  ;;  %v520_v10 = vld [vmem:[#allocation2 + $0x171] sm:$0xff]  ;;  %v748_v11 = vld [vmem:[#allocation2 + $0x1a] sm:$0xff]  ;;  %v749_v20 = vld [vmem:[#allocation2 + $0x22] sm:$0xff] }
  0x49   : > { %643 = vrot.lane.b32.xlu1 %v3432_v27, %s3864_s16  ;;  %v512_v27 = vld [vmem:[#allocation2 + $0x111] sm:$0xff]  ;;  %v4156_v13 = vpack.c.bf16 %v748_v11, %v748_v11  ;;  %v751_v26 = vld [vmem:[#allocation2 + $0x3a] sm:$0xff]  ;;  %v757_v46 = vld [vmem:[#allocation2 + $0x82] sm:$0xff] }
  0x4a   : > { %649 = vrot.lane.b32.xlu0 %v3435_v28, %s3864_s16  ;;  %v3443_v28 = vpack.c.bf16 %v513_v21, %v513_v21  ;;  %v3442_v34 = vpack.c.bf16 %v512_v27, %v512_v27  ;;  %v747_v14 = vld [vmem:[#allocation2 + $0xa] sm:$0xff]  ;;  %v750_v15 = vld [vmem:[#allocation2 + $0x32] sm:$0xff]  ;;  %v754_v27 = vld [vmem:[#allocation2 + $0x62] sm:$0xff] }
  0x4b   : > { %v4161_v18 = vpack.c.bf16 %v750_v15, %v750_v15  ;;  %v752_v21 = vld [vmem:[#allocation2 + $0x4a] sm:$0xff]  ;;  %v4176_v29 = vpack.c.bf16 %v754_v27, %v754_v27  ;;  %v753_v32 = vld [vmem:[#allocation2 + $0x52] sm:$0xff]  ;;  %v756_v33 = vld [vmem:[#allocation2 + $0x7a] sm:$0xff] }
  0x4c   : > { %v4168_v25 = vpack.c.bf16 %v752_v21, %v752_v21  ;;  %v4184_v38 = vpack.c.bf16 %v756_v33, %v756_v33  ;;  %v755_v39 = vld [vmem:[#allocation2 + $0x6a] sm:$0xff]  ;;  %v758_v40 = vld [vmem:[#allocation2 + $0x92] sm:$0xff]  ;;  %v764_v3 = vld [vmem:[#allocation2 + $0xda] sm:$0xff] }
  0x4d   : > { %647 = vrot.lane.b32.xlu1 %v3434_v53, %s3864_s16  ;;  %v327_v53 = vld [vmem:[#allocation2 + $0x170] sm:$0xff]  ;;  %v4192_v45 = vpack.c.bf16 %v758_v40, %v758_v40  ;;  %v767_v15 = vld [vmem:[#allocation2 + $0xfa] sm:$0xff] }
  0x4e   : > { %653 = vrot.lane.b32.xlu0 %v3437_v63, %s3864_s16  ;;  %v3418_v62 = vpack.c.bf16 %v327_v53, %v327_v53  ;;  %v516_v63 = vld [vmem:[#allocation2 + $0x141] sm:$0xff]  ;;  %v760_v50 = vld [vmem:[#allocation2 + $0xaa] sm:$0xff]  ;;  %v766_v7 = vld [vmem:[#allocation2 + $0xf2] sm:$0xff] }
  0x4f   : > { %v3465_v52 = vpack.c.bf16 %v760_v50, %v760_v50  ;;  %v759_v53 = vld [vmem:[#allocation2 + $0x9a] sm:$0xff]  ;;  %v768_v11 = vld [vmem:[#allocation2 + $0x10a] sm:$0xff]  ;;  %v774_v40 = vld [vmem:[#allocation2 + $0x152] sm:$0xff] }
  0x50   : > { %488 = vst.msk [vmem:[#allocation3 + $0x7c] sm:$0xf] %vm456_vm2, %v3418_v62  ;;  %v4202_v61 = vpack.c.bf16 %v759_v53, %v759_v53  ;;  %v772_v27 = vld [vmem:[#allocation2 + $0x13a] sm:$0xff]  ;;  %v773_v53 = vld [vmem:[#allocation2 + $0x142] sm:$0xff] }
  0x51   : > { %651 = vrot.lane.b32.xlu1 %v3436_v4, %s3864_s16  ;;  %v3446_v4 = vpack.c.bf16 %v516_v63, %v516_v63  ;;  %v761_v63 = vld [vmem:[#allocation2 + $0xb2] sm:$0xff]  ;;  %v3477_v33 = vpack.c.bf16 %v772_v27, %v772_v27 }
  0x52   : > { %657 = vrot.lane.b32.xlu0 %v3439_v8, %s3864_s16  ;;  %v3448_v8 = vpack.c.bf16 %v518_v6, %v518_v6  ;;  %v763_v6 = vld [vmem:[#allocation2 + $0xca] sm:$0xff] }
  0x55   : > { %655 = vrot.lane.b32.xlu1 %v3438_v12, %s3864_s16  ;;  %v3450_v12 = vpack.c.bf16 %v520_v10, %v520_v10  ;;  %v765_v10 = vld [vmem:[#allocation2 + $0xe2] sm:$0xff] }
  0x56   : > { %661 = vrot.lane.b32.xlu0 %v3441_v16, %s3864_s16  ;;  %v3452_v16 = vpack.c.bf16 %v747_v14, %v747_v14  ;;  %v3473_v14 = vpack.c.bf16 %v768_v11, %v768_v11 }
  0x59   : > { %659 = vrot.lane.b32.xlu1 %v3440_v22, %s3864_s16  ;;  %v4164_v22 = vpack.c.bf16 %v749_v20, %v749_v20  ;;  %v3472_v20 = vpack.c.bf16 %v767_v15, %v767_v15 }
  0x5a   : > { %665 = vrot.lane.b32.xlu0 %v3443_v28, %s3864_s16  ;;  %v4172_v28 = vpack.c.bf16 %v751_v26, %v751_v26  ;;  %v769_v26 = vld [vmem:[#allocation2 + $0x112] sm:$0xff] }
  0x5d   : > { %663 = vrot.lane.b32.xlu1 %v3442_v34, %s3864_s16  ;;  %v4180_v34 = vpack.c.bf16 %v753_v32, %v753_v32  ;;  %v3474_v32 = vpack.c.bf16 %v769_v26, %v769_v26 }
  0x5e   : > { %669 = vrot.lane.b32.xlu0 %v3445_v44, %s3864_s16  ;;  %v4188_v44 = vpack.c.bf16 %v755_v39, %v755_v39  ;;  %v771_v39 = vld [vmem:[#allocation2 + $0x12a] sm:$0xff] }
  0x5f   : > { %v3476_v50 = vpack.c.bf16 %v771_v39, %v771_v39 }
  0x61   : > { %667 = vrot.lane.b32.xlu1 %v3444_v51, %s3864_s16  ;;  %v4196_v51 = vpack.c.bf16 %v757_v46, %v757_v46 }
  0x62   : > { %673 = vrot.lane.b32.xlu0 %v3447_v59, %s3864_s16  ;;  %v762_v59 = vld [vmem:[#allocation2 + $0xc2] sm:$0xff] }
  0x63   : > { %v3467_v62 = vpack.c.bf16 %v762_v59, %v762_v59  ;;  %v776_v59 = vld [vmem:[#allocation2 + $0x16a] sm:$0xff] }
  0x65   : > { %671 = vrot.lane.b32.xlu1 %v3446_v4, %s3864_s16  ;;  %v3466_v4 = vpack.c.bf16 %v761_v63, %v761_v63  ;;  %v3478_v63 = vpack.c.bf16 %v773_v53, %v773_v53 }
  0x66   : > { %677 = vrot.lane.b32.xlu0 %v3449_v5, %s3864_s16  ;;  %v3469_v5 = vpack.c.bf16 %v764_v3, %v764_v3  ;;  %v3481_v3 = vpack.c.bf16 %v776_v59, %v776_v59 }
  0x69   : > { %675 = vrot.lane.b32.xlu1 %v3448_v8, %s3864_s16  ;;  %v3468_v8 = vpack.c.bf16 %v763_v6, %v763_v6 }
  0x6a   : > { %874 = vrot.lane.b32.xlu0 %v3451_v9, %s3865_s17  ;;  %v3471_v9 = vpack.c.bf16 %v766_v7, %v766_v7 }
  0x6d   : > { %679 = vrot.lane.b32.xlu1 %v3450_v12, %s3864_s16  ;;  %v3470_v12 = vpack.c.bf16 %v765_v10, %v765_v10 }
  0x6e   : > { %878 = vrot.lane.b32.xlu0 %v4156_v13, %s3865_s17 }
  0x71   : > { %876 = vrot.lane.b32.xlu1 %v3452_v16, %s3865_s17  ;;  %v770_v16 = vld [vmem:[#allocation2 + $0x122] sm:$0xff] }
  0x72   : > { %882 = vrot.lane.b32.xlu0 %v4161_v18, %s3865_s17  ;;  %v3475_v21 = vpack.c.bf16 %v770_v16, %v770_v16 }
  0x75   : > { %880 = vrot.lane.b32.xlu1 %v4164_v22, %s3865_s17 }
  0x76   : > { %886 = vrot.lane.b32.xlu0 %v4168_v25, %s3865_s17 }
  0x79   : > { %884 = vrot.lane.b32.xlu1 %v4172_v28, %s3865_s17 }
  0x7a   : > { %890 = vrot.lane.b32.xlu0 %v4176_v29, %s3865_s17 }
  0x7d   : > { %888 = vrot.lane.b32.xlu1 %v4180_v34, %s3865_s17 }
  0x7e   : > { %894 = vrot.lane.b32.xlu0 %v4184_v38, %s3865_s17 }
  0x81   : > { %892 = vrot.lane.b32.xlu1 %v4188_v44, %s3865_s17 }
  0x82   : > { %898 = vrot.lane.b32.xlu0 %v4192_v45, %s3865_s17 }
  0x85   : > { %896 = vrot.lane.b32.xlu1 %v4196_v51, %s3865_s17 }
  0x86   : > { %902 = vrot.lane.b32.xlu0 %v3465_v52, %s3865_s17  ;;  %v3479_v52 = vpack.c.bf16 %v774_v40, %v774_v40 }
  0x88   : > { %v618_v46 = vpop.permute.xlu0 %617 }
  0x89   : > { %900 = vrot.lane.b32.xlu1 %v4202_v61, %s3865_s17  ;;  %714 = vst.msk [vmem:[#allocation3] sm:$0xf] %vm713_vm3, %v618_v46 }
  0x8a   : > { %906 = vrot.lane.b32.xlu0 %v3467_v62, %s3865_s17 }
  0x8d   : > { %904 = vrot.lane.b32.xlu1 %v3466_v4, %s3865_s17  ;;  %v775_v4 = vld [vmem:[#allocation2 + $0x15a] sm:$0xff] }
  0x8e   : > { %910 = vrot.lane.b32.xlu0 %v3469_v5, %s3865_s17  ;;  %v3480_v7 = vpack.c.bf16 %v775_v4, %v775_v4 }
  0x91   : > { %908 = vrot.lane.b32.xlu1 %v3468_v8, %s3865_s17  ;;  %v777_v8 = vld [vmem:[#allocation2 + $0x172] sm:$0xff] }
  0x92   : > { %914 = vrot.lane.b32.xlu0 %v3471_v9, %s3865_s17  ;;  %v3482_v11 = vpack.c.bf16 %v777_v8, %v777_v8 }
  0x95   : > { %912 = vrot.lane.b32.xlu1 %v3470_v12, %s3865_s17 }
  0x96   : > { %918 = vrot.lane.b32.xlu0 %v3473_v14, %s3865_s17 }
  0x99   : > { %916 = vrot.lane.b32.xlu1 %v3472_v20, %s3865_s17 }
  0x9a   : > { %922 = vrot.lane.b32.xlu0 %v3475_v21, %s3865_s17  ;;  %v620_v62 = vpop.permute.xlu0 %619 }
  0x9b   : > { %715 = vst.msk [vmem:[#allocation3 + $0x4] sm:$0xf] %vm713_vm3, %v620_v62 }
  0x9d   : > { %920 = vrot.lane.b32.xlu1 %v3474_v32, %s3865_s17 }
  0x9e   : > { %926 = vrot.lane.b32.xlu0 %v3477_v33, %s3865_s17 }
  0xa1   : > { %924 = vrot.lane.b32.xlu1 %v3476_v50, %s3865_s17 }
  0xa2   : > { %930 = vrot.lane.b32.xlu0 %v3479_v52, %s3865_s17 }
  0xa3   : > { %v622_v5 = vpop.permute.xlu1 %621 }
  0xa4   : > { %v626_v6 = vpop.permute.xlu0 %625  ;;  %716 = vst.msk [vmem:[#allocation3 + $0x8] sm:$0xf] %vm713_vm3, %v622_v5 }
  0xa5   : > { %718 = vst.msk [vmem:[#allocation3 + $0x10] sm:$0xf] %vm713_vm3, %v626_v6  ;;  %928 = vrot.lane.b32.xlu1 %v3478_v63, %s3865_s17 }
  0xa6   : > { %934 = vrot.lane.b32.xlu0 %v3481_v3, %s3865_s17 }
  0xa7   : > { %v624_v9 = vpop.permute.xlu1 %623 }
  0xa8   : > { %v630_v10 = vpop.permute.xlu0 %629  ;;  %717 = vst.msk [vmem:[#allocation3 + $0xc] sm:$0xf] %vm713_vm3, %v624_v9  ;;  %v2033_v9 = vld [vmem:[#allocation2 + $0x39] sm:$0xff] }
  0xa9   : > { %720 = vst.msk [vmem:[#allocation3 + $0x18] sm:$0xf] %vm713_vm3, %v630_v10  ;;  %932 = vrot.lane.b32.xlu1 %v3480_v7, %s3865_s17  ;;  %v2034_v7 = vld [vmem:[#allocation2 + $0x49] sm:$0xff] }
  0xaa   : > { %1131 = vrot.lane.b32.xlu0 %v4042_v17, %s3866_s18 }
  0xab   : > { %v628_v12 = vpop.permute.xlu1 %627 }
  0xac   : > { %v634_v14 = vpop.permute.xlu0 %633  ;;  %719 = vst.msk [vmem:[#allocation3 + $0x14] sm:$0xf] %vm713_vm3, %v628_v12 }
  0xad   : > { %722 = vst.msk [vmem:[#allocation3 + $0x20] sm:$0xf] %vm713_vm3, %v634_v14  ;;  %936 = vrot.lane.b32.xlu1 %v3482_v11, %s3865_s17  ;;  %v2035_v14 = vld [vmem:[#allocation2 + $0x51] sm:$0xff] }
  0xae   : > { %1135 = vrot.lane.b32.xlu0 %v4050_v23, %s3866_s18 }
  0xaf   : > { %v632_v15 = vpop.permute.xlu1 %631 }
  0xb0   : > { %v638_v16 = vpop.permute.xlu0 %637  ;;  %721 = vst.msk [vmem:[#allocation3 + $0x1c] sm:$0xf] %vm713_vm3, %v632_v15 }
  0xb1   : > { %724 = vst.msk [vmem:[#allocation3 + $0x28] sm:$0xf] %vm713_vm3, %v638_v16  ;;  %1133 = vrot.lane.b32.xlu1 %v4044_v19, %s3866_s18 }
  0xb2   : > { %1139 = vrot.lane.b32.xlu0 %v4056_v30, %s3866_s18 }
  0xb3   : > { %v636_v17 = vpop.permute.xlu1 %635 }
  0xb4   : > { %v642_v20 = vpop.permute.xlu0 %641  ;;  %723 = vst.msk [vmem:[#allocation3 + $0x24] sm:$0xf] %vm713_vm3, %v636_v17  ;;  %v3837_v17 = vld [vmem:[%s4768_s1 + $0x8] sm:$0xff]  }
  0xb5   : > { %726 = vst.msk [vmem:[#allocation3 + $0x30] sm:$0xf] %vm713_vm3, %v642_v20  ;;  %1137 = vrot.lane.b32.xlu1 %v4052_v24, %s3866_s18 }
  0xb6   : > { %1143 = vrot.lane.b32.xlu0 %v4066_v35, %s3866_s18 }
  0xb7   : > { %v640_v21 = vpop.permute.xlu1 %639 }
  0xb8   : > { %v646_v26 = vpop.permute.xlu0 %645  ;;  %725 = vst.msk [vmem:[#allocation3 + $0x2c] sm:$0xf] %vm713_vm3, %v640_v21 }
  0xb9   : > { %728 = vst.msk [vmem:[#allocation3 + $0x38] sm:$0xf] %vm713_vm3, %v646_v26  ;;  %1141 = vrot.lane.b32.xlu1 %v4058_v31, %s3866_s18  ;;  %v3838_v26 = vld [vmem:[%s4768_s1] sm:$0xff]  }
  0xba   : > { %1147 = vrot.lane.b32.xlu0 %v4070_v37, %s3866_s18 }
  0xbb   : > { %v644_v19 = vpop.permute.xlu1 %643 }
  0xbc   : > { %v650_v27 = vpop.permute.xlu0 %649  ;;  %727 = vst.msk [vmem:[#allocation3 + $0x34] sm:$0xf] %vm713_vm3, %v644_v19 }
  0xbd   : > { %730 = vst.msk [vmem:[#allocation3 + $0x40] sm:$0xf] %vm713_vm3, %v650_v27  ;;  %1145 = vrot.lane.b32.xlu1 %v4068_v36, %s3866_s18 }
  0xbe   : > { %1151 = vrot.lane.b32.xlu0 %v4078_v42, %s3866_s18 }
  0xbf   : > { %v648_v32 = vpop.permute.xlu1 %647 }
  0xc0   : > { %v654_v33 = vpop.permute.xlu0 %653  ;;  %729 = vst.msk [vmem:[#allocation3 + $0x3c] sm:$0xf] %vm713_vm3, %v648_v32 }
  0xc1   : > { %732 = vst.msk [vmem:[#allocation3 + $0x48] sm:$0xf] %vm713_vm3, %v654_v33  ;;  %1149 = vrot.lane.b32.xlu1 %v4076_v41, %s3866_s18 }
  0xc2   : > { %1155 = vrot.lane.b32.xlu0 %v4088_v47, %s3866_s18 }
  0xc3   : > { %v652_v39 = vpop.permute.xlu1 %651 }
  0xc4   : > { %v658_v40 = vpop.permute.xlu0 %657  ;;  %731 = vst.msk [vmem:[#allocation3 + $0x44] sm:$0xf] %vm713_vm3, %v652_v39 }
  0xc5   : > { %734 = vst.msk [vmem:[#allocation3 + $0x50] sm:$0xf] %vm713_vm3, %v658_v40  ;;  %1153 = vrot.lane.b32.xlu1 %v4080_v43, %s3866_s18  ;;  %v1267_v40 = vld [vmem:[#allocation2 + $0x69] sm:$0xff] }
  0xc6   : > { %1159 = vrot.lane.b32.xlu0 %v4092_v49, %s3866_s18 }
  0xc7   : > { %v656_v46 = vpop.permute.xlu1 %655 }
  0xc8   : > { %v662_v50 = vpop.permute.xlu0 %661  ;;  %733 = vst.msk [vmem:[#allocation3 + $0x4c] sm:$0xf] %vm713_vm3, %v656_v46 }
  0xc9   : > { %736 = vst.msk [vmem:[#allocation3 + $0x58] sm:$0xf] %vm713_vm3, %v662_v50  ;;  %1157 = vrot.lane.b32.xlu1 %v4090_v48, %s3866_s18 }
  0xca   : > { %1163 = vrot.lane.b32.xlu0 %v4104_v55, %s3866_s18 }
  0xcb   : > { %v660_v52 = vpop.permute.xlu1 %659 }
  0xcc   : > { %v666_v53 = vpop.permute.xlu0 %665  ;;  %735 = vst.msk [vmem:[#allocation3 + $0x54] sm:$0xf] %vm713_vm3, %v660_v52 }
  0xcd   : > { %738 = vst.msk [vmem:[#allocation3 + $0x60] sm:$0xf] %vm713_vm3, %v666_v53  ;;  %1161 = vrot.lane.b32.xlu1 %v4102_v54, %s3866_s18 }
  0xce   : > { %1388 = vrot.lane.b32.xlu0 %v4018_v57, %s3867_s19 }
  0xcf   : > { %v664_v59 = vpop.permute.xlu1 %663 }
  0xd0   : > { %v670_v62 = vpop.permute.xlu0 %669  ;;  %737 = vst.msk [vmem:[#allocation3 + $0x5c] sm:$0xf] %vm713_vm3, %v664_v59 }
  0xd1   : > { %740 = vst.msk [vmem:[#allocation3 + $0x68] sm:$0xf] %vm713_vm3, %v670_v62  ;;  %1165 = vrot.lane.b32.xlu1 %v4106_v56, %s3866_s18 }
  0xd2   : > { %1392 = vrot.lane.b32.xlu0 %v4020_v58, %s3867_s19 }
  0xd3   : > { %v668_v63 = vpop.permute.xlu1 %667 }
  0xd4   : > { %v674_v3 = vpop.permute.xlu0 %673  ;;  %739 = vst.msk [vmem:[#allocation3 + $0x64] sm:$0xf] %vm713_vm3, %v668_v63 }
  0xd5   : > { %742 = vst.msk [vmem:[#allocation3 + $0x70] sm:$0xf] %vm713_vm3, %v674_v3  ;;  %1390 = vrot.lane.b32.xlu1 %v4026_v60, %s3867_s19  ;;  %v2032_v60 = vld [vmem:[#allocation2 + $0x31] sm:$0xff]  ;;  %v2038_v3 = vld [vmem:[#allocation2 + $0x79] sm:$0xff] }
  0xd6   : > { %1645 = vrot.lane.b32.xlu0 %v4156_v13, %s3868_s20  ;;  %v3611_v6 = vpack.c.bf16 %v2032_v60, %v2032_v60 }
  0xd7   : > { %v672_v57 = vpop.permute.xlu1 %671 }
  0xd8   : > { %v678_v4 = vpop.permute.xlu0 %677  ;;  %741 = vst.msk [vmem:[#allocation3 + $0x6c] sm:$0xf] %vm713_vm3, %v672_v57 }
  0xd9   : > { %744 = vst.msk [vmem:[#allocation3 + $0x78] sm:$0xf] %vm713_vm3, %v678_v4  ;;  %1394 = vrot.lane.b32.xlu1 %v4032_v0, %s3867_s19 }
  0xda   : > { %1649 = vrot.lane.b32.xlu0 %v4161_v18, %s3868_s20 }
  0xdb   : > { %v676_v58 = vpop.permute.xlu1 %675 }
  0xdc   : > { %v875_v5 = vpop.permute.xlu0 %874  ;;  %743 = vst.msk [vmem:[#allocation3 + $0x74] sm:$0xf] %vm713_vm3, %v676_v58 }
  0xdd   : > { %971 = vst.msk [vmem:[#allocation3] sm:$0xf] %vm970_vm4, %v875_v5  ;;  %1647 = vrot.lane.b32.xlu1 %v4164_v22, %s3868_s20 }
  0xde   : > { %1903 = vrot.lane.b32.xlu0 %v4050_v23, %s3869_s21  ;;  %v3613_v23 = vpack.c.bf16 %v2034_v7, %v2034_v7 }
  0xdf   : > { %v680_v13 = vpop.permute.xlu1 %679 }
  0xe0   : > { %v879_v0 = vpop.permute.xlu0 %878  ;;  %745 = vst.msk [vmem:[#allocation3 + $0x7c] sm:$0xf] %vm713_vm3, %v680_v13 }
  0xe1   : > { %973 = vst.msk [vmem:[#allocation3 + $0x8] sm:$0xf] %vm970_vm4, %v879_v0  ;;  %1651 = vrot.lane.b32.xlu1 %v4172_v28, %s3868_s20 }
  0xe2   : > { %1907 = vrot.lane.b32.xlu0 %v4056_v30, %s3869_s21  ;;  %v3836_v30 = vld [vmem:[%s4768_s1 + $0x10] ss:$0 sps:$4 sm:$0x33]  }
  0xe3   : > { %v877_v22 = vpop.permute.xlu1 %876  ;;  %v2729_v12 = vsel %vm2727_vm5, %v3836_v30, 0  ;;  %3817 = vmatprep.subr.msk.bf16.mxu0 %vm2727_vm5, %v3836_v30  ;;  %3818 = vmatprep.subr.msk.bf16.mxu1 %vm2727_vm5, %v3836_v30 }
  0xe4   : > { %v883_v8 = vpop.permute.xlu0 %882  ;;  %972 = vst.msk [vmem:[#allocation3 + $0x4] sm:$0xf] %vm970_vm4, %v877_v22  ;;  %3774 = vmatpush3.bf16.msra.mxu0 %v2729_v12  ;;  %3814 = vmatpush3.bf16.msra.mxu1 %v2729_v12 }
  0xe5   : > { %975 = vst.msk [vmem:[#allocation3 + $0x10] sm:$0xf] %vm970_vm4, %v883_v8  ;;  %1905 = vrot.lane.b32.xlu1 %v4052_v24, %s3869_s21  ;;  %v3612_v24 = vpack.c.bf16 %v2033_v9, %v2033_v9  ;;  %3775 = vmatprep.subr.bf16.mxu0 %v3837_v17 }
  0xe6   : > { %2160 = vrot.lane.b32.xlu0 %v3611_v6, %s3870_s22  ;;  %3812 = vmatprep.subr.bf16.mxu1 %v3837_v17 }
  0xe7   : > { %v881_v10 = vpop.permute.xlu1 %880 }
  0xe8   : > { %v887_v11 = vpop.permute.xlu0 %886  ;;  %974 = vst.msk [vmem:[#allocation3 + $0xc] sm:$0xf] %vm970_vm4, %v881_v10  ;;  %3776 = vmatpush3.bf16.msra.mxu0 %v3837_v17  ;;  %3815 = vmatpush3.bf16.msra.mxu1 %v3837_v17 }
  0xe9   : > { %977 = vst.msk [vmem:[#allocation3 + $0x18] sm:$0xf] %vm970_vm4, %v887_v11  ;;  %1909 = vrot.lane.b32.xlu1 %v4058_v31, %s3869_s21  ;;  %v3614_v31 = vpack.c.bf16 %v2035_v14, %v2035_v14  ;;  %3777 = vmatprep.subr.bf16.mxu0 %v3838_v26 }
  0xea   : > { %2164 = vrot.lane.b32.xlu0 %v3613_v23, %s3870_s22  ;;  %3813 = vmatprep.subr.bf16.mxu1 %v3838_v26 }
  0xeb   : > { %v885_v15 = vpop.permute.xlu1 %884 }
  0xec   : > { %v891_v16 = vpop.permute.xlu0 %890  ;;  %976 = vst.msk [vmem:[#allocation3 + $0x14] sm:$0xf] %vm970_vm4, %v885_v15  ;;  %3778 = vmatpush3.bf16.msra.mxu0 %v3838_v26  ;;  %3816 = vmatpush3.bf16.msra.mxu1 %v3838_v26 }
  0xed   : > { %979 = vst.msk [vmem:[#allocation3 + $0x20] sm:$0xf] %vm970_vm4, %v891_v16  ;;  %2162 = vrot.lane.b32.xlu1 %v3612_v24, %s3870_s22 }
  0xee   : > { %2417 = vrot.lane.b32.xlu0 %v4161_v18, %s3871_s27  ;;  %v1266_v18 = vld [vmem:[#allocation2 + $0x61] sm:$0xff] }
  0xef   : > { %v889_v20 = vpop.permute.xlu1 %888  ;;  %v3521_v32 = vpack.c.bf16 %v1266_v18, %v1266_v18 }
  0xf0   : > { %v895_v21 = vpop.permute.xlu0 %894  ;;  %978 = vst.msk [vmem:[#allocation3 + $0x1c] sm:$0xf] %vm970_vm4, %v889_v20  ;;  %v2299_v20 = vld [vmem:[#allocation2 + $0xaa] sm:$0xff] }
  0xf1   : > { %981 = vst.msk [vmem:[#allocation3 + $0x28] sm:$0xf] %vm970_vm4, %v895_v21  ;;  %2166 = vrot.lane.b32.xlu1 %v3614_v31, %s3870_s22  ;;  %v3653_v18 = vpack.c.bf16 %v2299_v20, %v2299_v20 }
  0xf2   : > { %2421 = vrot.lane.b32.xlu0 %v4168_v25, %s3871_s27 }
  0xf3   : > { %v893_v19 = vpop.permute.xlu1 %892 }
  0xf4   : > { %v899_v27 = vpop.permute.xlu0 %898  ;;  %980 = vst.msk [vmem:[#allocation3 + $0x24] sm:$0xf] %vm970_vm4, %v893_v19  ;;  %v2298_v19 = vld [vmem:[#allocation2 + $0x9a] sm:$0xff] }
  0xf5   : > { %983 = vst.msk [vmem:[#allocation3 + $0x30] sm:$0xf] %vm970_vm4, %v899_v27  ;;  %2419 = vrot.lane.b32.xlu1 %v4172_v28, %s3871_s27  ;;  %v3522_v28 = vpack.c.bf16 %v1267_v40, %v1267_v40 }
  0xf6   : > { %1396 = vrot.lane.b32.xlu0 %v3613_v23, %s3867_s19  ;;  %v1271_v23 = vld [vmem:[#allocation2 + $0x99] sm:$0xff] }
  0xf7   : > { %v897_v33 = vpop.permute.xlu1 %896 }
  0xf8   : > { %v903_v39 = vpop.permute.xlu0 %902  ;;  %982 = vst.msk [vmem:[#allocation3 + $0x2c] sm:$0xf] %vm970_vm4, %v897_v33  ;;  %v2300_v33 = vld [vmem:[#allocation2 + $0xb2] sm:$0xff] }
  0xf9   : > { %985 = vst.msk [vmem:[#allocation3 + $0x38] sm:$0xf] %vm970_vm4, %v903_v39  ;;  %2423 = vrot.lane.b32.xlu1 %v4180_v34, %s3871_s27  ;;  %v1274_v39 = vld [vmem:[#allocation2 + $0xc1] sm:$0xff] }
  0xfa   : > { %1400 = vrot.lane.b32.xlu0 %v3521_v32, %s3867_s19 }
  0xfb   : > { %v901_v46 = vpop.permute.xlu1 %900 }
  0xfc   : > { %v907_v50 = vpop.permute.xlu0 %906  ;;  %984 = vst.msk [vmem:[#allocation3 + $0x34] sm:$0xf] %vm970_vm4, %v901_v46 }
  0xfd   : > { %987 = vst.msk [vmem:[#allocation3 + $0x40] sm:$0xf] %vm970_vm4, %v907_v50  ;;  %1398 = vrot.lane.b32.xlu1 %v3614_v31, %s3867_s19  ;;  %v3654_v50 = vpack.c.bf16 %v2300_v33, %v2300_v33  ;;  %v1793_v33 = vld [vmem:[#allocation2 + $0x108] sm:$0xff] }
  0xfe   : > { %1653 = vrot.lane.b32.xlu0 %v4168_v25, %s3868_s20 }
  0xff   : > { %v905_v52 = vpop.permute.xlu1 %904 }
 0x100   : > { %v911_v53 = vpop.permute.xlu0 %910  ;;  %986 = vst.msk [vmem:[#allocation3 + $0x3c] sm:$0xf] %vm970_vm4, %v905_v52 }
 0x101   : > { %989 = vst.msk [vmem:[#allocation3 + $0x48] sm:$0xf] %vm970_vm4, %v911_v53  ;;  %1402 = vrot.lane.b32.xlu1 %v3522_v28, %s3867_s19 }
 0x102   : > { %1657 = vrot.lane.b32.xlu0 %v4176_v29, %s3868_s20 }
 0x103   : > { %v909_v59 = vpop.permute.xlu1 %908 }
 0x104   : > { %v915_v62 = vpop.permute.xlu0 %914  ;;  %988 = vst.msk [vmem:[#allocation3 + $0x44] sm:$0xf] %vm970_vm4, %v909_v59  ;;  %v1275_v59 = vld [vmem:[#allocation2 + $0xc9] sm:$0xff] }
 0x105   : > { %991 = vst.msk [vmem:[#allocation3 + $0x50] sm:$0xf] %vm970_vm4, %v915_v62  ;;  %1655 = vrot.lane.b32.xlu1 %v4180_v34, %s3868_s20  ;;  %v1531_v62 = vld [vmem:[#allocation2 + $0xc2] sm:$0xff] }
 0x106   : > { %1911 = vrot.lane.b32.xlu0 %v4066_v35, %s3869_s21  ;;  %v3617_v35 = vpack.c.bf16 %v2038_v3, %v2038_v3  ;;  %v3530_v3 = vpack.c.bf16 %v1275_v59, %v1275_v59 }
 0x107   : > { %v913_v25 = vpop.permute.xlu1 %912 }
 0x108   : > { %v919_v63 = vpop.permute.xlu0 %918  ;;  %990 = vst.msk [vmem:[#allocation3 + $0x4c] sm:$0xf] %vm970_vm4, %v913_v25 }
 0x109   : > { %993 = vst.msk [vmem:[#allocation3 + $0x58] sm:$0xf] %vm970_vm4, %v919_v63  ;;  %1659 = vrot.lane.b32.xlu1 %v4188_v44, %s3868_s20 }
 0x10a   : > { %1915 = vrot.lane.b32.xlu0 %v4070_v37, %s3869_s21  ;;  %v2039_v37 = vld [vmem:[#allocation2 + $0x81] sm:$0xff] }
 0x10b   : > { %v917_v57 = vpop.permute.xlu1 %916 }
 0x10c   : > { %v923_v4 = vpop.permute.xlu0 %922  ;;  %992 = vst.msk [vmem:[#allocation3 + $0x54] sm:$0xf] %vm970_vm4, %v917_v57  ;;  %v3561_v57 = vpack.c.bf16 %v1531_v62, %v1531_v62 }
 0x10d   : > { %995 = vst.msk [vmem:[#allocation3 + $0x60] sm:$0xf] %vm970_vm4, %v923_v4  ;;  %1913 = vrot.lane.b32.xlu1 %v4068_v36, %s3869_s21  ;;  %v3618_v36 = vpack.c.bf16 %v2039_v37, %v2039_v37 }
 0x10e   : > { %2168 = vrot.lane.b32.xlu0 %v3521_v32, %s3870_s22  ;;  %v3652_v32 = vpack.c.bf16 %v2298_v19, %v2298_v19  ;;  %v1536_v19 = vld [vmem:[#allocation2 + $0xfa] sm:$0xff] }
 0x10f   : > { %v921_v34 = vpop.permute.xlu1 %920 }
 0x110   : > { %v927_v58 = vpop.permute.xlu0 %926  ;;  %994 = vst.msk [vmem:[#allocation3 + $0x5c] sm:$0xf] %vm970_vm4, %v921_v34  ;;  %v1532_v34 = vld [vmem:[#allocation2 + $0xca] sm:$0xff] }
 0x111   : > { %997 = vst.msk [vmem:[#allocation3 + $0x68] sm:$0xf] %vm970_vm4, %v927_v58  ;;  %1917 = vrot.lane.b32.xlu1 %v4076_v41, %s3869_s21  ;;  %v1270_v41 = vld [vmem:[#allocation2 + $0x91] sm:$0xff] }
 0x112   : > { %2172 = vrot.lane.b32.xlu0 %v3617_v35, %s3870_s22 }
 0x113   : > { %v925_v5 = vpop.permute.xlu1 %924 }
 0x114   : > { %v931_v60 = vpop.permute.xlu0 %930  ;;  %996 = vst.msk [vmem:[#allocation3 + $0x64] sm:$0xf] %vm970_vm4, %v925_v5  ;;  %v3562_v5 = vpack.c.bf16 %v1532_v34, %v1532_v34 }
 0x115   : > { %999 = vst.msk [vmem:[#allocation3 + $0x70] sm:$0xf] %vm970_vm4, %v931_v60  ;;  %2170 = vrot.lane.b32.xlu1 %v3522_v28, %s3870_s22  ;;  %v3529_v28 = vpack.c.bf16 %v1274_v39, %v1274_v39  ;;  %v3566_v39 = vpack.c.bf16 %v1536_v19, %v1536_v19  ;;  %v2054_v19 = vld [vmem:[#allocation2 + $0x139] sm:$0xff] }
 0x116   : > { %2425 = vrot.lane.b32.xlu0 %v4176_v29, %s3871_s27  ;;  %v3525_v29 = vpack.c.bf16 %v1270_v41, %v1270_v41 }
 0x117   : > { %v929_v13 = vpop.permute.xlu1 %928 }
 0x118   : > { %v935_v0 = vpop.permute.xlu0 %934  ;;  %998 = vst.msk [vmem:[#allocation3 + $0x6c] sm:$0xf] %vm970_vm4, %v929_v13  ;;  %v2046_v13 = vld [vmem:[#allocation2 + $0xd9] sm:$0xff] }
 0x119   : > { %1001 = vst.msk [vmem:[#allocation3 + $0x78] sm:$0xf] %vm970_vm4, %v935_v0  ;;  %2174 = vrot.lane.b32.xlu1 %v3618_v36, %s3870_s22 }
 0x11a   : > { %2429 = vrot.lane.b32.xlu0 %v4184_v38, %s3871_s27 }
 0x11b   : > { %v933_v6 = vpop.permute.xlu1 %932 }
 0x11c   : > { %v1132_v7 = vpop.permute.xlu0 %1131  ;;  %1000 = vst.msk [vmem:[#allocation3 + $0x74] sm:$0xf] %vm970_vm4, %v933_v6 }
 0x11d   : > { %1228 = vst.msk [vmem:[#allocation3] sm:$0xf] %vm1227_vm6, %v1132_v7  ;;  %2427 = vrot.lane.b32.xlu1 %v4188_v44, %s3871_s27  ;;  %v3526_v44 = vpack.c.bf16 %v1271_v23, %v1271_v23 }
 0x11e   : > { %1404 = vrot.lane.b32.xlu0 %v3617_v35, %s3867_s19 }
 0x11f   : > { %v937_v22 = vpop.permute.xlu1 %936 }
 0x120   : > { %v1136_v8 = vpop.permute.xlu0 %1135  ;;  %1002 = vst.msk [vmem:[#allocation3 + $0x7c] sm:$0xf] %vm970_vm4, %v937_v22 }
 0x121   : > { %1230 = vst.msk [vmem:[#allocation3 + $0x8] sm:$0xf] %vm1227_vm6, %v1136_v8  ;;  %2431 = vrot.lane.b32.xlu1 %v4196_v51, %s3871_s27 }
 0x122   : > { %1408 = vrot.lane.b32.xlu0 %v3525_v29, %s3867_s19 }
 0x123   : > { %v1134_v9 = vpop.permute.xlu1 %1133 }
 0x124   : > { %v1140_v10 = vpop.permute.xlu0 %1139  ;;  %1229 = vst.msk [vmem:[#allocation3 + $0x4] sm:$0xf] %vm1227_vm6, %v1134_v9 }
 0x125   : > { %1232 = vst.msk [vmem:[#allocation3 + $0x10] sm:$0xf] %vm1227_vm6, %v1140_v10  ;;  %1406 = vrot.lane.b32.xlu1 %v3618_v36, %s3867_s19 }
 0x126   : > { %1661 = vrot.lane.b32.xlu0 %v4184_v38, %s3868_s20 }
 0x127   : > { %v1138_v11 = vpop.permute.xlu1 %1137 }
 0x128   : > { %v1144_v30 = vpop.permute.xlu0 %1143  ;;  %1231 = vst.msk [vmem:[#allocation3 + $0xc] sm:$0xf] %vm1227_vm6, %v1138_v11 }
 0x129   : > { %1234 = vst.msk [vmem:[#allocation3 + $0x18] sm:$0xf] %vm1227_vm6, %v1144_v30  ;;  %1410 = vrot.lane.b32.xlu1 %v3526_v44, %s3867_s19 }
 0x12a   : > { %1665 = vrot.lane.b32.xlu0 %v4192_v45, %s3868_s20  ;;  %v2042_v45 = vld [vmem:[#allocation2 + $0xa9] sm:$0xff] }
 0x12b   : > { %v1142_v24 = vpop.permute.xlu1 %1141 }
 0x12c   : > { %v1148_v12 = vpop.permute.xlu0 %1147  ;;  %1233 = vst.msk [vmem:[#allocation3 + $0x14] sm:$0xf] %vm1227_vm6, %v1142_v24 }
 0x12d   : > { %1236 = vst.msk [vmem:[#allocation3 + $0x20] sm:$0xf] %vm1227_vm6, %v1148_v12  ;;  %1663 = vrot.lane.b32.xlu1 %v4196_v51, %s3868_s20  ;;  %v2297_v51 = vld [vmem:[#allocation2 + $0x92] sm:$0xff] }
 0x12e   : > { %1919 = vrot.lane.b32.xlu0 %v4078_v42, %s3869_s21  ;;  %v3621_v42 = vpack.c.bf16 %v2042_v45, %v2042_v45 }
 0x12f   : > { %v1146_v38 = vpop.permute.xlu1 %1145 }
 0x130   : > { %v1152_v14 = vpop.permute.xlu0 %1151  ;;  %1235 = vst.msk [vmem:[#allocation3 + $0x1c] sm:$0xf] %vm1227_vm6, %v1146_v38 }
 0x131   : > { %1238 = vst.msk [vmem:[#allocation3 + $0x28] sm:$0xf] %vm1227_vm6, %v1152_v14  ;;  %1667 = vrot.lane.b32.xlu1 %v4202_v61, %s3868_s20  ;;  %v2043_v61 = vld [vmem:[#allocation2 + $0xb1] sm:$0xff] }
 0x132   : > { %1923 = vrot.lane.b32.xlu0 %v4088_v47, %s3869_s21  ;;  %v3651_v47 = vpack.c.bf16 %v2297_v51, %v2297_v51  ;;  %v3622_v26 = vpack.c.bf16 %v2043_v61, %v2043_v61  ;;  %v1278_v14 = vld [vmem:[#allocation2 + $0xf1] sm:$0xff] }
 0x133   : > { %v1150_v15 = vpop.permute.xlu1 %1149  ;;  %v3533_v45 = vpack.c.bf16 %v1278_v14, %v1278_v14 }
 0x134   : > { %v1156_v16 = vpop.permute.xlu0 %1155  ;;  %1237 = vst.msk [vmem:[#allocation3 + $0x24] sm:$0xf] %vm1227_vm6, %v1150_v15 }
 0x135   : > { %1240 = vst.msk [vmem:[#allocation3 + $0x30] sm:$0xf] %vm1227_vm6, %v1156_v16  ;;  %1921 = vrot.lane.b32.xlu1 %v4080_v43, %s3869_s21 }
 0x136   : > { %2176 = vrot.lane.b32.xlu0 %v3525_v29, %s3870_s22  ;;  %v2303_v29 = vld [vmem:[#allocation2 + $0xda] sm:$0xff] }
 0x137   : > { %v1154_v17 = vpop.permute.xlu1 %1153  ;;  %v3657_v23 = vpack.c.bf16 %v2303_v29, %v2303_v29 }
 0x138   : > { %v1160_v31 = vpop.permute.xlu0 %1159  ;;  %1239 = vst.msk [vmem:[#allocation3 + $0x2c] sm:$0xf] %vm1227_vm6, %v1154_v17 }
 0x139   : > { %1242 = vst.msk [vmem:[#allocation3 + $0x38] sm:$0xf] %vm1227_vm6, %v1160_v31  ;;  %1925 = vrot.lane.b32.xlu1 %v4090_v48, %s3869_s21  ;;  %v1535_v31 = vld [vmem:[#allocation2 + $0xf2] sm:$0xff] }
 0x13a   : > { %2180 = vrot.lane.b32.xlu0 %v3621_v42, %s3870_s22 }
 0x13b   : > { %v1158_v21 = vpop.permute.xlu1 %1157 }
 0x13c   : > { %v1164_v43 = vpop.permute.xlu0 %1163  ;;  %1241 = vst.msk [vmem:[#allocation3 + $0x34] sm:$0xf] %vm1227_vm6, %v1158_v21 }
 0x13d   : > { %1244 = vst.msk [vmem:[#allocation3 + $0x40] sm:$0xf] %vm1227_vm6, %v1164_v43  ;;  %2178 = vrot.lane.b32.xlu1 %v3526_v44, %s3870_s22 }
 0x13e   : > { %2433 = vrot.lane.b32.xlu0 %v3651_v47, %s3871_s27  ;;  %v3753_v47 = vld [vmem:[%s3965_s15 + $0x78] sm:$0xff]  }
 0x13f   : > { %v1162_v48 = vpop.permute.xlu1 %1161  ;;  %v3737_v20 = vunpack.c.l.bf16 %v3753_v47  ;;  %v3738_v21 = vunpack.c.h.bf16 %v3753_v47  ;;  %v1797_v47 = vld [vmem:[#allocation2 + $0x138] sm:$0xff] }
 0x140   : > { %v1389_v27 = vpop.permute.xlu0 %1388  ;;  %1243 = vst.msk [vmem:[#allocation3 + $0x3c] sm:$0xf] %vm1227_vm6, %v1162_v48 }
 0x141   : > { %1485 = vst.msk [vmem:[#allocation3] sm:$0xf] %vm1484_vm7, %v1389_v27  ;;  %2182 = vrot.lane.b32.xlu1 %v3622_v26, %s3870_s22 }
 0x142   : > { %2437 = vrot.lane.b32.xlu0 %v3653_v18, %s3871_s27  ;;  %294 = vst.msk [vmem:[#allocation2 + $0x181] sm:$0xff] %vm143_vm0, %v3737_v20  ;;  %295 = vst.msk [vmem:[#allocation2 + $0x189] sm:$0xff] %vm143_vm0, %v3738_v21  ;;  %v3601_v20 = vpack.c.bf16 %v1797_v47, %v1797_v47 }
 0x143   : > { %v1166_v40 = vpop.permute.xlu1 %1165 }
 0x144   : > { %v1393_v46 = vpop.permute.xlu0 %1392  ;;  %1245 = vst.msk [vmem:[#allocation3 + $0x44] sm:$0xf] %vm1227_vm6, %v1166_v40  ;;  %v1792_v40 = vld [vmem:[#allocation2 + $0xf8] sm:$0xff] }
 0x145   : > { %1487 = vst.msk [vmem:[#allocation3 + $0x8] sm:$0xf] %vm1484_vm7, %v1393_v46  ;;  %2435 = vrot.lane.b32.xlu1 %v3652_v32, %s3871_s27  ;;  %v3597_v46 = vpack.c.bf16 %v1793_v33, %v1793_v33 }
 0x146   : > { %1412 = vrot.lane.b32.xlu0 %v3621_v42, %s3867_s19  ;;  %v1279_v42 = vld [vmem:[#allocation2 + $0xf9] sm:$0xff] }
 0x147   : > { %v1391_v52 = vpop.permute.xlu1 %1390  ;;  %v3534_v61 = vpack.c.bf16 %v1279_v42, %v1279_v42 }
 0x148   : > { %v1646_v53 = vpop.permute.xlu0 %1645  ;;  %1486 = vst.msk [vmem:[#allocation3 + $0x4] sm:$0xf] %vm1484_vm7, %v1391_v52  ;;  %v3596_v52 = vpack.c.bf16 %v1792_v40, %v1792_v40 }
 0x149   : > { %1742 = vst.msk [vmem:[#allocation3] sm:$0xf] %vm1741_vm8, %v1646_v53  ;;  %2439 = vrot.lane.b32.xlu1 %v3654_v50, %s3871_s27  ;;  %v1794_v53 = vld [vmem:[#allocation2 + $0x110] sm:$0xff] }
 0x14a   : > { %1416 = vrot.lane.b32.xlu0 %v3529_v28, %s3867_s19 }
 0x14b   : > { %v1395_v25 = vpop.permute.xlu1 %1394 }
 0x14c   : > { %v1650_v63 = vpop.permute.xlu0 %1649  ;;  %1488 = vst.msk [vmem:[#allocation3 + $0xc] sm:$0xf] %vm1484_vm7, %v1395_v25  ;;  %v2050_v25 = vld [vmem:[#allocation2 + $0x109] sm:$0xff] }
 0x14d   : > { %1744 = vst.msk [vmem:[#allocation3 + $0x8] sm:$0xf] %vm1741_vm8, %v1650_v63  ;;  %1414 = vrot.lane.b32.xlu1 %v3622_v26, %s3867_s19  ;;  %v3598_v63 = vpack.c.bf16 %v1794_v53, %v1794_v53 }
 0x14e   : > { %1669 = vrot.lane.b32.xlu0 %v3653_v18, %s3868_s20  ;;  %v1791_v18 = vld [vmem:[#allocation2 + $0xf0] sm:$0xff] }
 0x14f   : > { %v1648_v4 = vpop.permute.xlu1 %1647  ;;  %v3595_v48 = vpack.c.bf16 %v1791_v18, %v1791_v18 }
 0x150   : > { %v1904_v35 = vpop.permute.xlu0 %1903  ;;  %1743 = vst.msk [vmem:[#allocation3 + $0x4] sm:$0xf] %vm1741_vm8, %v1648_v4 }
 0x151   : > { %2000 = vst.msk [vmem:[#allocation3] sm:$0xf] %vm1999_vm9, %v1904_v35  ;;  %1418 = vrot.lane.b32.xlu1 %v3530_v3, %s3867_s19  ;;  %v2051_v35 = vld [vmem:[#allocation2 + $0x111] sm:$0xff] }
 0x152   : > { %1673 = vrot.lane.b32.xlu0 %v3561_v57, %s3868_s20 }
 0x153   : > { %v1652_v58 = vpop.permute.xlu1 %1651 }
 0x154   : > { %v1908_v37 = vpop.permute.xlu0 %1907  ;;  %1745 = vst.msk [vmem:[#allocation3 + $0xc] sm:$0xf] %vm1741_vm8, %v1652_v58 }
 0x155   : > { %2002 = vst.msk [vmem:[#allocation3 + $0x8] sm:$0xf] %vm1999_vm9, %v1908_v37  ;;  %1671 = vrot.lane.b32.xlu1 %v3654_v50, %s3868_s20  ;;  %v2307_v37 = vld [vmem:[#allocation2 + $0x10a] sm:$0xff] }
 0x156   : > { %1927 = vrot.lane.b32.xlu0 %v4092_v49, %s3869_s21  ;;  %v3625_v49 = vpack.c.bf16 %v2046_v13, %v2046_v13 }
 0x157   : > { %v1906_v60 = vpop.permute.xlu1 %1905 }
 0x158   : > { %v2161_v36 = vpop.permute.xlu0 %2160  ;;  %2001 = vst.msk [vmem:[#allocation3 + $0x4] sm:$0xf] %vm1999_vm9, %v1906_v60  ;;  %v3661_v60 = vpack.c.bf16 %v2307_v37, %v2307_v37 }
 0x159   : > { %2257 = vst.msk [vmem:[#allocation3] sm:$0xf] %vm2256_vm10, %v2161_v36  ;;  %1675 = vrot.lane.b32.xlu1 %v3562_v5, %s3868_s20 }
 0x15a   : > { %1931 = vrot.lane.b32.xlu0 %v4104_v55, %s3869_s21  ;;  %v2047_v55 = vld [vmem:[#allocation2 + $0xe1] sm:$0xff] }
 0x15b   : > { %v1910_v0 = vpop.permute.xlu1 %1909 }
 0x15c   : > { %v2165_v41 = vpop.permute.xlu0 %2164  ;;  %2003 = vst.msk [vmem:[#allocation3 + $0xc] sm:$0xf] %vm1999_vm9, %v1910_v0  ;;  %v2308_v0 = vld [vmem:[#allocation2 + $0x112] sm:$0xff] }
 0x15d   : > { %2259 = vst.msk [vmem:[#allocation3 + $0x8] sm:$0xf] %vm2256_vm10, %v2165_v41  ;;  %1929 = vrot.lane.b32.xlu1 %v4102_v54, %s3869_s21  ;;  %v3626_v54 = vpack.c.bf16 %v2047_v55, %v2047_v55  ;;  %v3662_v55 = vpack.c.bf16 %v2308_v0, %v2308_v0 }
 0x15e   : > { %2184 = vrot.lane.b32.xlu0 %v3529_v28, %s3870_s22 }
 0x15f   : > { %v2163_v6 = vpop.permute.xlu1 %2162 }
 0x160   : > { %v2418_v7 = vpop.permute.xlu0 %2417  ;;  %2258 = vst.msk [vmem:[#allocation3 + $0x4] sm:$0xf] %vm2256_vm10, %v2163_v6 }
 0x161   : > { %2514 = vst.msk [vmem:[#allocation3] sm:$0xf] %vm2513_vm11, %v2418_v7  ;;  %1933 = vrot.lane.b32.xlu1 %v4106_v56, %s3869_s21  ;;  %v2304_v56 = vld [vmem:[#allocation2 + $0xe2] sm:$0xff] }
 0x162   : > { %2188 = vrot.lane.b32.xlu0 %v3625_v49, %s3870_s22  ;;  %v3658_v30 = vpack.c.bf16 %v2304_v56, %v2304_v56  ;;  %v1025_v7 = vld [vmem:[#allocation2 + $0x120] sm:$0xff] }
 0x163   : > { %v2167_v22 = vpop.permute.xlu1 %2166  ;;  %v3505_v29 = vpack.c.bf16 %v1025_v7, %v1025_v7  ;;  %v1282_v56 = vld [vmem:[#allocation2 + $0x121] sm:$0xff]  ;;  %v1287_v7 = vld [vmem:[#allocation2 + $0x159] sm:$0xff] }
 0x164   : > { %v2422_v8 = vpop.permute.xlu0 %2421  ;;  %2260 = vst.msk [vmem:[#allocation3 + $0xc] sm:$0xf] %vm2256_vm10, %v2167_v22 }
 0x165   : > { %2516 = vst.msk [vmem:[#allocation3 + $0x8] sm:$0xf] %vm2513_vm11, %v2422_v8  ;;  %2186 = vrot.lane.b32.xlu1 %v3530_v3, %s3870_s22  ;;  %v3629_v3 = vpack.c.bf16 %v2050_v25, %v2050_v25 }
 0x166   : > { %2441 = vrot.lane.b32.xlu0 %v3561_v57, %s3871_s27 }
 0x167   : > { %v2420_v9 = vpop.permute.xlu1 %2419 }
 0x168   : > { %v1397_v10 = vpop.permute.xlu0 %1396  ;;  %2515 = vst.msk [vmem:[#allocation3 + $0x4] sm:$0xf] %vm2513_vm11, %v2420_v9 }
 0x169   : > { %1489 = vst.msk [vmem:[#allocation3 + $0x10] sm:$0xf] %vm1484_vm7, %v1397_v10  ;;  %2190 = vrot.lane.b32.xlu1 %v3626_v54, %s3870_s22 }
 0x16a   : > { %2445 = vrot.lane.b32.xlu0 %v3657_v23, %s3871_s27 }
 0x16b   : > { %v2424_v44 = vpop.permute.xlu1 %2423 }
 0x16c   : > { %v1401_v11 = vpop.permute.xlu0 %1400  ;;  %2517 = vst.msk [vmem:[#allocation3 + $0xc] sm:$0xf] %vm2513_vm11, %v2424_v44 }
 0x16d   : > { %1491 = vst.msk [vmem:[#allocation3 + $0x18] sm:$0xf] %vm1484_vm7, %v1401_v11  ;;  %2443 = vrot.lane.b32.xlu1 %v3562_v5, %s3871_s27  ;;  %v3630_v5 = vpack.c.bf16 %v2051_v35, %v2051_v35  ;;  %v3537_v11 = vpack.c.bf16 %v1282_v56, %v1282_v56 }
 0x16e   : > { %1167 = vrot.lane.b32.xlu0 %v4116_v1, %s3866_s18 }
 0x16f   : > { %v1399_v24 = vpop.permute.xlu1 %1398  ;;  %v3839_v12 = vld [vmem:[#allocation3] sm:$0xff]  }
 0x170   : > { %v1654_v38 = vpop.permute.xlu0 %1653  ;;  %1490 = vst.msk [vmem:[#allocation3 + $0x14] sm:$0xf] %vm1484_vm7, %v1399_v24  ;;  %3779 = vmatprep.mubr.msk.bf16.mxu0 %vm2678_vm12, %v3839_v12  ;;  %v1283_v12 = vld [vmem:[#allocation2 + $0x129] sm:$0xff] }
 0x171   : > { %1746 = vst.msk [vmem:[#allocation3 + $0x10] sm:$0xf] %vm1741_vm8, %v1654_v38  ;;  %2447 = vrot.lane.b32.xlu1 %v3658_v30, %s3871_s27 }
 0x172   : > { %1420 = vrot.lane.b32.xlu0 %v3625_v49, %s3867_s19 }
 0x173   : > { %v1403_v15 = vpop.permute.xlu1 %1402  ;;  %v3840_v16 = vld [vmem:[#allocation3 + $0x8] sm:$0xff]  }
 0x174   : > { %v1658_v1 = vpop.permute.xlu0 %1657  ;;  %1492 = vst.msk [vmem:[#allocation3 + $0x1c] sm:$0xf] %vm1484_vm7, %v1403_v15  ;;  %3780 = vmatmul.mubr.msk.bf16.vlgmr.msra.gmra.mxu0 %vm2678_vm12, %v3840_v16  ;;  %v3538_v15 = vpack.c.bf16 %v1283_v12, %v1283_v12 }
 0x175   : > { %1748 = vst.msk [vmem:[#allocation3 + $0x18] sm:$0xf] %vm1741_vm8, %v1658_v1  ;;  %1169 = vrot.lane.b32.xlu1 %v4118_v2, %s3866_s18  ;;  %v3565_v2 = vpack.c.bf16 %v1535_v31, %v1535_v31 }
 0x176   : > { %1424 = vrot.lane.b32.xlu0 %v3533_v45, %s3867_s19 }
 0x177   : > { %v1656_v51 = vpop.permute.xlu1 %1655 }
 0x178   : > { %v1912_v17 = vpop.permute.xlu0 %1911  ;;  %1747 = vst.msk [vmem:[#allocation3 + $0x14] sm:$0xf] %vm1741_vm8, %v1656_v51  ;;  %v1540_v51 = vld [vmem:[#allocation2 + $0x12a] sm:$0xff] }
 0x179   : > { %2004 = vst.msk [vmem:[#allocation3 + $0x10] sm:$0xf] %vm1999_vm9, %v1912_v17  ;;  %1422 = vrot.lane.b32.xlu1 %v3626_v54, %s3867_s19 }
 0x17a   : > { %1677 = vrot.lane.b32.xlu0 %v3657_v23, %s3868_s20  ;;  %v1026_v23 = vld [vmem:[#allocation2 + $0x128] sm:$0xff] }
 0x17b   : > { %v1660_v43 = vpop.permute.xlu1 %1659  ;;  %v3506_v44 = vpack.c.bf16 %v1026_v23, %v1026_v23 }
 0x17c   : > { %v1916_v26 = vpop.permute.xlu0 %1915  ;;  %1749 = vst.msk [vmem:[#allocation3 + $0x1c] sm:$0xf] %vm1741_vm8, %v1660_v43  ;;  %v1798_v43 = vld [vmem:[#allocation2 + $0x140] sm:$0xff] }
 0x17d   : > { %2006 = vst.msk [vmem:[#allocation3 + $0x18] sm:$0xf] %vm1999_vm9, %v1916_v26  ;;  %1426 = vrot.lane.b32.xlu1 %v3534_v61, %s3867_s19 }
 0x17e   : > { %1681 = vrot.lane.b32.xlu0 %v3565_v2, %s3868_s20 }
 0x17f   : > { %v1914_v27 = vpop.permute.xlu1 %1913 }
 0x180   : > { %v2169_v32 = vpop.permute.xlu0 %2168  ;;  %2005 = vst.msk [vmem:[#allocation3 + $0x14] sm:$0xf] %vm1999_vm9, %v1914_v27  ;;  %v3633_v27 = vpack.c.bf16 %v2054_v19, %v2054_v19 }
 0x181   : > { %2261 = vst.msk [vmem:[#allocation3 + $0x10] sm:$0xf] %vm2256_vm10, %v2169_v32  ;;  %1679 = vrot.lane.b32.xlu1 %v3658_v30, %s3868_s20 }
 0x182   : > { %1935 = vrot.lane.b32.xlu0 %v3595_v48, %s3869_s21  ;;  %v3602_v48 = vpack.c.bf16 %v1798_v43, %v1798_v43 }
 0x183   : > { %v1918_v50 = vpop.permute.xlu1 %1917 }
 0x184   : > { %v2173_v28 = vpop.permute.xlu0 %2172  ;;  %2007 = vst.msk [vmem:[#allocation3 + $0x1c] sm:$0xf] %vm1999_vm9, %v1918_v50 }
 0x185   : > { %2263 = vst.msk [vmem:[#allocation3 + $0x18] sm:$0xf] %vm2256_vm10, %v2173_v28  ;;  %1683 = vrot.lane.b32.xlu1 %v3566_v39, %s3868_s20  ;;  %v2311_v28 = vld [vmem:[#allocation2 + $0x13a] sm:$0xff] }
 0x186   : > { %1939 = vrot.lane.b32.xlu0 %v3597_v46, %s3869_s21  ;;  %v3665_v53 = vpack.c.bf16 %v2311_v28, %v2311_v28  ;;  %v1034_v28 = vld [vmem:[#allocation2 + $0x188] sm:$0xff] }
 0x187   : > { %v2171_v59 = vpop.permute.xlu1 %2170 }
 0x188   : > { %v2426_v62 = vpop.permute.xlu0 %2425  ;;  %2262 = vst.msk [vmem:[#allocation3 + $0x14] sm:$0xf] %vm2256_vm10, %v2171_v59 }
 0x189   : > { %2518 = vst.msk [vmem:[#allocation3 + $0x10] sm:$0xf] %vm2513_vm11, %v2426_v62  ;;  %1937 = vrot.lane.b32.xlu1 %v3596_v52, %s3869_s21 }
 0x18a   : > { %2192 = vrot.lane.b32.xlu0 %v3533_v45, %s3870_s22  ;;  %v1539_v45 = vld [vmem:[#allocation2 + $0x122] sm:$0xff] }
 0x18b   : > { %v2175_v57 = vpop.permute.xlu1 %2174  ;;  %v3569_v16 = vpack.c.bf16 %v1539_v45, %v1539_v45 }
 0x18c   : > { %v2430_v4 = vpop.permute.xlu0 %2429  ;;  %2264 = vst.msk [vmem:[#allocation3 + $0x1c] sm:$0xf] %vm2256_vm10, %v2175_v57 }
 0x18d   : > { %2520 = vst.msk [vmem:[#allocation3 + $0x18] sm:$0xf] %vm2513_vm11, %v2430_v4  ;;  %1941 = vrot.lane.b32.xlu1 %v3598_v63, %s3869_s21  ;;  %v1029_v4 = vld [vmem:[#allocation2 + $0x150] sm:$0xff] }
 0x18e   : > { %2196 = vrot.lane.b32.xlu0 %v3629_v3, %s3870_s22 }
 0x18f   : > { %v2428_v34 = vpop.permute.xlu1 %2427 }
 0x190   : > { %v1405_v58 = vpop.permute.xlu0 %1404  ;;  %2519 = vst.msk [vmem:[#allocation3 + $0x14] sm:$0xf] %vm2513_vm11, %v2428_v34  ;;  %v3509_v34 = vpack.c.bf16 %v1029_v4, %v1029_v4 }
 0x191   : > { %1493 = vst.msk [vmem:[#allocation3 + $0x20] sm:$0xf] %vm1484_vm7, %v1405_v58  ;;  %2194 = vrot.lane.b32.xlu1 %v3534_v61, %s3870_s22  ;;  %v3570_v61 = vpack.c.bf16 %v1540_v51, %v1540_v51 }
 0x192   : > { %2449 = vrot.lane.b32.xlu0 %v3565_v2, %s3871_s27 }
 0x193   : > { %v2432_v36 = vpop.permute.xlu1 %2431 }
 0x194   : > { %v1409_v13 = vpop.permute.xlu0 %1408  ;;  %2521 = vst.msk [vmem:[#allocation3 + $0x1c] sm:$0xf] %vm2513_vm11, %v2432_v36 }
 0x195   : > { %1495 = vst.msk [vmem:[#allocation3 + $0x28] sm:$0xf] %vm1484_vm7, %v1409_v13  ;;  %2198 = vrot.lane.b32.xlu1 %v3630_v5, %s3870_s22  ;;  %v1286_v13 = vld [vmem:[#allocation2 + $0x151] sm:$0xff] }
 0x196   : > { %2453 = vrot.lane.b32.xlu0 %v3661_v60, %s3871_s27 }
 0x197   : > { %v1407_v41 = vpop.permute.xlu1 %1406  ;;  %v3841_v49 = vld [vmem:[#allocation3 + $0x10] sm:$0xff]  }
 0x198   : > { %v1662_v6 = vpop.permute.xlu0 %1661  ;;  %1494 = vst.msk [vmem:[#allocation3 + $0x24] sm:$0xf] %vm1484_vm7, %v1407_v41  ;;  %3783 = vmatprep.mubr.msk.bf16.mxu0 %vm2678_vm12, %v3841_v49  ;;  %v3541_v41 = vpack.c.bf16 %v1286_v13, %v1286_v13 }
 0x199   : > { %1750 = vst.msk [vmem:[#allocation3 + $0x20] sm:$0xf] %vm1741_vm8, %v1662_v6  ;;  %2451 = vrot.lane.b32.xlu1 %v3566_v39, %s3871_s27  ;;  %v2055_v39 = vld [vmem:[#allocation2 + $0x141] sm:$0xff] }
 0x19a   : > { %1171 = vrot.lane.b32.xlu0 %v3597_v46, %s3866_s18  ;;  %v3634_v52 = vpack.c.bf16 %v2055_v39, %v2055_v39 }
 0x19b   : > { %v1411_v22 = vpop.permute.xlu1 %1410  ;;  %v3842_v8 = vld [vmem:[#allocation3 + $0x18] sm:$0xff]  }
 0x19c   : > { %v1666_v54 = vpop.permute.xlu0 %1665  ;;  %1496 = vst.msk [vmem:[#allocation3 + $0x2c] sm:$0xf] %vm1484_vm7, %v1411_v22  ;;  %3784 = vmatmul.mubr.msk.bf16.gmra.mxu0 %vm2678_vm12, %v3842_v8  ;;  %v1543_v22 = vld [vmem:[#allocation2 + $0x152] sm:$0xff]  ;;  %v3542_v8 = vpack.c.bf16 %v1287_v7, %v1287_v7 }
 0x19d   : > { %1752 = vst.msk [vmem:[#allocation3 + $0x28] sm:$0xf] %vm1741_vm8, %v1666_v54  ;;  %2455 = vrot.lane.b32.xlu1 %v3662_v55, %s3871_s27  ;;  %v3573_v54 = vpack.c.bf16 %v1543_v22, %v1543_v22  ;;  %v1806_v22 = vld [vmem:[#allocation2 + $0x1a0] sm:$0xff] }
 0x19e   : > { %1175 = vrot.lane.b32.xlu0 %v3505_v29, %s3866_s18 }
 0x19f   : > { %v1664_v9 = vpop.permute.xlu1 %1663 }
 0x1a0   : > { %v1920_v10 = vpop.permute.xlu0 %1919  ;;  %1751 = vst.msk [vmem:[#allocation3 + $0x24] sm:$0xf] %vm1741_vm8, %v1664_v9 }
 0x1a1   : > { %2008 = vst.msk [vmem:[#allocation3 + $0x20] sm:$0xf] %vm1999_vm9, %v1920_v10  ;;  %1173 = vrot.lane.b32.xlu1 %v3598_v63, %s3866_s18  ;;  %v2312_v63 = vld [vmem:[#allocation2 + $0x142] sm:$0xff]  ;;  %v1544_v10 = vld [vmem:[#allocation2 + $0x15a] sm:$0xff] }
 0x1a2   : > { %1428 = vrot.lane.b32.xlu0 %v3629_v3, %s3867_s19  ;;  %v3666_v35 = vpack.c.bf16 %v2312_v63, %v2312_v63 }
 0x1a3   : > { %v1668_v30 = vpop.permute.xlu1 %1667 }
 0x1a4   : > { %v1924_v24 = vpop.permute.xlu0 %1923  ;;  %1753 = vst.msk [vmem:[#allocation3 + $0x2c] sm:$0xf] %vm1741_vm8, %v1668_v30  ;;  %v3574_v30 = vpack.c.bf16 %v1544_v10, %v1544_v10  ;;  %v3610_v10 = vpack.c.bf16 %v1806_v22, %v1806_v22 }
 0x1a5   : > { %2010 = vst.msk [vmem:[#allocation3 + $0x28] sm:$0xf] %vm1999_vm9, %v1924_v24  ;;  %1177 = vrot.lane.b32.xlu1 %v3506_v44, %s3866_s18 }
 0x1a6   : > { %1432 = vrot.lane.b32.xlu0 %v3537_v11, %s3867_s19 }
 0x1a7   : > { %v1922_v38 = vpop.permute.xlu1 %1921 }
 0x1a8   : > { %v2177_v14 = vpop.permute.xlu0 %2176  ;;  %2009 = vst.msk [vmem:[#allocation3 + $0x24] sm:$0xf] %vm1999_vm9, %v1922_v38 }
 0x1a9   : > { %2265 = vst.msk [vmem:[#allocation3 + $0x20] sm:$0xf] %vm2256_vm10, %v2177_v14  ;;  %1430 = vrot.lane.b32.xlu1 %v3630_v5, %s3867_s19  ;;  %v1030_v5 = vld [vmem:[#allocation2 + $0x158] sm:$0xff]  ;;  %v1802_v14 = vld [vmem:[#allocation2 + $0x170] sm:$0xff] }
 0x1aa   : > { %1685 = vrot.lane.b32.xlu0 %v3661_v60, %s3868_s20  ;;  %v3510_v0 = vpack.c.bf16 %v1030_v5, %v1030_v5 }
 0x1ab   : > { %v1926_v1 = vpop.permute.xlu1 %1925 }
 0x1ac   : > { %v2181_v42 = vpop.permute.xlu0 %2180  ;;  %2011 = vst.msk [vmem:[#allocation3 + $0x2c] sm:$0xf] %vm1999_vm9, %v1926_v1 }
 0x1ad   : > { %2267 = vst.msk [vmem:[#allocation3 + $0x28] sm:$0xf] %vm2256_vm10, %v2181_v42  ;;  %1434 = vrot.lane.b32.xlu1 %v3538_v15, %s3867_s19  ;;  %v3606_v42 = vpack.c.bf16 %v1802_v14, %v1802_v14 }
 0x1ae   : > { %1689 = vrot.lane.b32.xlu0 %v3569_v16, %s3868_s20 }
 0x1af   : > { %v2179_v17 = vpop.permute.xlu1 %2178 }
 0x1b0   : > { %v2434_v31 = vpop.permute.xlu0 %2433  ;;  %2266 = vst.msk [vmem:[#allocation3 + $0x24] sm:$0xf] %vm2256_vm10, %v2179_v17 }
 0x1b1   : > { %2522 = vst.msk [vmem:[#allocation3 + $0x20] sm:$0xf] %vm2513_vm11, %v2434_v31  ;;  %1687 = vrot.lane.b32.xlu1 %v3662_v55, %s3868_s20 }
 0x1b2   : > { %1943 = vrot.lane.b32.xlu0 %v3505_v29, %s3869_s21 }
 0x1b3   : > { %v2183_v21 = vpop.permute.xlu1 %2182 }
 0x1b4   : > { %v2438_v2 = vpop.permute.xlu0 %2437  ;;  %2268 = vst.msk [vmem:[#allocation3 + $0x2c] sm:$0xf] %vm2256_vm10, %v2183_v21  ;;  %v2315_v21 = vld [vmem:[#allocation2 + $0x16a] sm:$0xff] }
 0x1b5   : > { %2524 = vst.msk [vmem:[#allocation3 + $0x28] sm:$0xf] %vm2513_vm11, %v2438_v2  ;;  %1691 = vrot.lane.b32.xlu1 %v3570_v61, %s3868_s20 }
 0x1b6   : > { %1947 = vrot.lane.b32.xlu0 %v3601_v20, %s3869_s21 }
 0x1b7   : > { %v2436_v26 = vpop.permute.xlu1 %2435 }
 0x1b8   : > { %v1413_v18 = vpop.permute.xlu0 %1412  ;;  %2523 = vst.msk [vmem:[#allocation3 + $0x24] sm:$0xf] %vm2513_vm11, %v2436_v26  ;;  %v3669_v26 = vpack.c.bf16 %v2315_v21, %v2315_v21 }
 0x1b9   : > { %1497 = vst.msk [vmem:[#allocation3 + $0x30] sm:$0xf] %vm1484_vm7, %v1413_v18  ;;  %1945 = vrot.lane.b32.xlu1 %v3506_v44, %s3869_s21 }
 0x1ba   : > { %2200 = vrot.lane.b32.xlu0 %v3537_v11, %s3870_s22  ;;  %v1801_v11 = vld [vmem:[#allocation2 + $0x168] sm:$0xff] }
 0x1bb   : > { %v2440_v32 = vpop.permute.xlu1 %2439  ;;  %v3605_v24 = vpack.c.bf16 %v1801_v11, %v1801_v11 }
 0x1bc   : > { %v1417_v33 = vpop.permute.xlu0 %1416  ;;  %2525 = vst.msk [vmem:[#allocation3 + $0x2c] sm:$0xf] %vm2513_vm11, %v2440_v32  ;;  %v1033_v32 = vld [vmem:[#allocation2 + $0x180] sm:$0xff] }
 0x1bd   : > { %1499 = vst.msk [vmem:[#allocation3 + $0x38] sm:$0xf] %vm1484_vm7, %v1417_v33  ;;  %1949 = vrot.lane.b32.xlu1 %v3602_v48, %s3869_s21 }
 0x1be   : > { %2204 = vrot.lane.b32.xlu0 %v3633_v27, %s3870_s22 }
 0x1bf   : > { %v1415_v40 = vpop.permute.xlu1 %1414  ;;  %v3843_v46 = vld [vmem:[#allocation3 + $0x20] sm:$0xff]  }
 0x1c0   : > { %v1670_v50 = vpop.permute.xlu0 %1669  ;;  %1498 = vst.msk [vmem:[#allocation3 + $0x34] sm:$0xf] %vm1484_vm7, %v1415_v40  ;;  %3787 = vmatprep.mubr.msk.bf16.mxu0 %vm2678_vm12, %v3843_v46  ;;  %v3513_v40 = vpack.c.bf16 %v1033_v32, %v1033_v32 }
 0x1c1   : > { %1754 = vst.msk [vmem:[#allocation3 + $0x30] sm:$0xf] %vm1741_vm8, %v1670_v50  ;;  %2202 = vrot.lane.b32.xlu1 %v3538_v15, %s3870_s22 }
 0x1c2   : > { %2457 = vrot.lane.b32.xlu0 %v3569_v16, %s3871_s27  ;;  %v2058_v16 = vld [vmem:[#allocation2 + $0x169] sm:$0xff] }
 0x1c3   : > { %v1419_v59 = vpop.permute.xlu1 %1418  ;;  %v3844_v62 = vld [vmem:[#allocation3 + $0x28] sm:$0xff]   ;;  %v3637_v51 = vpack.c.bf16 %v2058_v16, %v2058_v16 }
 0x1c4   : > { %v1674_v25 = vpop.permute.xlu0 %1673  ;;  %1500 = vst.msk [vmem:[#allocation3 + $0x3c] sm:$0xf] %vm1484_vm7, %v1419_v59  ;;  %3788 = vmatmul.mubr.msk.bf16.gmra.mxu0 %vm2678_vm12, %v3844_v62  ;;  %v3514_v62 = vpack.c.bf16 %v1034_v28, %v1034_v28 }
 0x1c5   : > { %1756 = vst.msk [vmem:[#allocation3 + $0x38] sm:$0xf] %vm1741_vm8, %v1674_v25  ;;  %2206 = vrot.lane.b32.xlu1 %v3634_v52, %s3870_s22 }
 0x1c6   : > { %2461 = vrot.lane.b32.xlu0 %v3665_v53, %s3871_s27 }
 0x1c7   : > { %v1672_v3 = vpop.permute.xlu1 %1671 }
 0x1c8   : > { %v1928_v57 = vpop.permute.xlu0 %1927  ;;  %1755 = vst.msk [vmem:[#allocation3 + $0x34] sm:$0xf] %vm1741_vm8, %v1672_v3 }
 0x1c9   : > { %2012 = vst.msk [vmem:[#allocation3 + $0x30] sm:$0xf] %vm1999_vm9, %v1928_v57  ;;  %2459 = vrot.lane.b32.xlu1 %v3570_v61, %s3871_s27  ;;  %v2059_v61 = vld [vmem:[#allocation2 + $0x171] sm:$0xff]  ;;  %v1291_v57 = vld [vmem:[#allocation2 + $0x189] sm:$0xff] }
 0x1ca   : > { %1179 = vrot.lane.b32.xlu0 %v3601_v20, %s3866_s18  ;;  %v3638_v43 = vpack.c.bf16 %v2059_v61, %v2059_v61 }
 0x1cb   : > { %v1676_v58 = vpop.permute.xlu1 %1675 }
 0x1cc   : > { %v1932_v37 = vpop.permute.xlu0 %1931  ;;  %1757 = vst.msk [vmem:[#allocation3 + $0x3c] sm:$0xf] %vm1741_vm8, %v1676_v58  ;;  %v3546_v58 = vpack.c.bf16 %v1291_v57, %v1291_v57 }
 0x1cd   : > { %2014 = vst.msk [vmem:[#allocation3 + $0x38] sm:$0xf] %vm1999_vm9, %v1932_v37  ;;  %2463 = vrot.lane.b32.xlu1 %v3666_v35, %s3871_s27 }
 0x1ce   : > { %1183 = vrot.lane.b32.xlu0 %v3509_v34, %s3866_s18 }
 0x1cf   : > { %v1930_v60 = vpop.permute.xlu1 %1929 }
 0x1d0   : > { %v2185_v36 = vpop.permute.xlu0 %2184  ;;  %2013 = vst.msk [vmem:[#allocation3 + $0x34] sm:$0xf] %vm1999_vm9, %v1930_v60 }
 0x1d1   : > { %2269 = vst.msk [vmem:[#allocation3 + $0x30] sm:$0xf] %vm2256_vm10, %v2185_v36  ;;  %1181 = vrot.lane.b32.xlu1 %v3602_v48, %s3866_s18  ;;  %v2316_v48 = vld [vmem:[#allocation2 + $0x172] sm:$0xff]  ;;  %v1548_v36 = vld [vmem:[#allocation2 + $0x18a] sm:$0xff] }
 0x1d2   : > { %1436 = vrot.lane.b32.xlu0 %v3633_v27, %s3867_s19  ;;  %v3670_v39 = vpack.c.bf16 %v2316_v48, %v2316_v48 }
 0x1d3   : > { %v1934_v49 = vpop.permute.xlu1 %1933 }
 0x1d4   : > { %v2189_v6 = vpop.permute.xlu0 %2188  ;;  %2015 = vst.msk [vmem:[#allocation3 + $0x3c] sm:$0xf] %vm1999_vm9, %v1934_v49  ;;  %v3578_v49 = vpack.c.bf16 %v1548_v36, %v1548_v36 }
 0x1d5   : > { %2271 = vst.msk [vmem:[#allocation3 + $0x38] sm:$0xf] %vm2256_vm10, %v2189_v6  ;;  %1185 = vrot.lane.b32.xlu1 %v3510_v0, %s3866_s18 }
 0x1d6   : > { %1440 = vrot.lane.b32.xlu0 %v3541_v41, %s3867_s19 }
 0x1d7   : > { %v2187_v55 = vpop.permute.xlu1 %2186 }
 0x1d8   : > { %v2442_v29 = vpop.permute.xlu0 %2441  ;;  %2270 = vst.msk [vmem:[#allocation3 + $0x34] sm:$0xf] %vm2256_vm10, %v2187_v55 }
 0x1d9   : > { %2526 = vst.msk [vmem:[#allocation3 + $0x30] sm:$0xf] %vm2513_vm11, %v2442_v29  ;;  %1438 = vrot.lane.b32.xlu1 %v3634_v52, %s3867_s19 }
 0x1da   : > { %1693 = vrot.lane.b32.xlu0 %v3665_v53, %s3868_s20  ;;  %v1290_v53 = vld [vmem:[#allocation2 + $0x181] sm:$0xff] }
 0x1db   : > { %v2191_v23 = vpop.permute.xlu1 %2190  ;;  %v3545_v25 = vpack.c.bf16 %v1290_v53, %v1290_v53 }
 0x1dc   : > { %v2446_v9 = vpop.permute.xlu0 %2445  ;;  %2272 = vst.msk [vmem:[#allocation3 + $0x3c] sm:$0xf] %vm2256_vm10, %v2191_v23  ;;  %v2062_v23 = vld [vmem:[#allocation2 + $0x199] sm:$0xff] }
 0x1dd   : > { %2528 = vst.msk [vmem:[#allocation3 + $0x38] sm:$0xf] %vm2513_vm11, %v2446_v9  ;;  %1442 = vrot.lane.b32.xlu1 %v3542_v8, %s3867_s19 }
 0x1de   : > { %1697 = vrot.lane.b32.xlu0 %v3573_v54, %s3868_s20 }
 0x1df   : > { %v2444_v56 = vpop.permute.xlu1 %2443 }
 0x1e0   : > { %v1168_v44 = vpop.permute.xlu0 %1167  ;;  %2527 = vst.msk [vmem:[#allocation3 + $0x34] sm:$0xf] %vm2513_vm11, %v2444_v56  ;;  %v3641_v56 = vpack.c.bf16 %v2062_v23, %v2062_v23 }
 0x1e1   : > { %1246 = vst.msk [vmem:[#allocation3 + $0x48] sm:$0xf] %vm1227_vm6, %v1168_v44  ;;  %1695 = vrot.lane.b32.xlu1 %v3666_v35, %s3868_s20  ;;  %v1547_v35 = vld [vmem:[#allocation2 + $0x182] sm:$0xff] }
 0x1e2   : > { %1951 = vrot.lane.b32.xlu0 %v3509_v34, %s3869_s21  ;;  %v3577_v37 = vpack.c.bf16 %v1547_v35, %v1547_v35 }
 0x1e3   : > { %v2448_v12 = vpop.permute.xlu1 %2447 }
 0x1e4   : > { %2529 = vst.msk [vmem:[#allocation3 + $0x3c] sm:$0xf] %vm2513_vm11, %v2448_v12  ;;  %v1421_v38 = vpop.permute.xlu0 %1420  ;;  %v2319_v12 = vld [vmem:[#allocation2 + $0x19a] sm:$0xff] }
 0x1e5   : > { %1699 = vrot.lane.b32.xlu1 %v3574_v30, %s3868_s20  ;;  %1501 = vst.msk [vmem:[#allocation3 + $0x40] sm:$0xf] %vm1484_vm7, %v1421_v38 }
 0x1e6   : > { %1955 = vrot.lane.b32.xlu0 %v3605_v24, %s3869_s21 }
 0x1e7   : > { %v1170_v45 = vpop.permute.xlu1 %1169  ;;  %v3845_v15 = vld [vmem:[#allocation3 + $0x30] sm:$0xff]  }
 0x1e8   : > { %1247 = vst.msk [vmem:[#allocation3 + $0x4c] sm:$0xf] %vm1227_vm6, %v1170_v45  ;;  %v1425_v1 = vpop.permute.xlu0 %1424  ;;  %3791 = vmatprep.mubr.msk.bf16.mxu0 %vm2678_vm12, %v3845_v15  ;;  %v3673_v45 = vpack.c.bf16 %v2319_v12, %v2319_v12 }
 0x1e9   : > { %1953 = vrot.lane.b32.xlu1 %v3510_v0, %s3869_s21  ;;  %1503 = vst.msk [vmem:[#allocation3 + $0x48] sm:$0xf] %vm1484_vm7, %v1425_v1  ;;  %v1805_v0 = vld [vmem:[#allocation2 + $0x198] sm:$0xff]  ;;  %v2320_v1 = vld [vmem:[#allocation2 + $0x1a2] sm:$0xff] }
 0x1ea   : > { %2208 = vrot.lane.b32.xlu0 %v3541_v41, %s3870_s22  ;;  %v3609_v6 = vpack.c.bf16 %v1805_v0, %v1805_v0 }
 0x1eb   : > { %v1423_v17 = vpop.permute.xlu1 %1422  ;;  %v3846_v31 = vld [vmem:[#allocation3 + $0x38] sm:$0xff]  }
 0x1ec   : > { %1502 = vst.msk [vmem:[#allocation3 + $0x44] sm:$0xf] %vm1484_vm7, %v1423_v17  ;;  %v1678_v47 = vpop.permute.xlu0 %1677  ;;  %3792 = vmatmul.mubr.msk.bf16.gmra.mxu0 %vm2678_vm12, %v3846_v31  ;;  %v3674_v17 = vpack.c.bf16 %v2320_v1, %v2320_v1 }
 0x1ed   : > { %1957 = vrot.lane.b32.xlu1 %v3606_v42, %s3869_s21  ;;  %1758 = vst.msk [vmem:[#allocation3 + $0x40] sm:$0xf] %vm1741_vm8, %v1678_v47 }
 0x1ee   : > { %2212 = vrot.lane.b32.xlu0 %v3637_v51, %s3870_s22 }
 0x1ef   : > { %v1427_v20 = vpop.permute.xlu1 %1426 }
 0x1f0   : > { %1504 = vst.msk [vmem:[#allocation3 + $0x4c] sm:$0xf] %vm1484_vm7, %v1427_v20  ;;  %v1682_v2 = vpop.permute.xlu0 %1681 }
 0x1f1   : > { %2210 = vrot.lane.b32.xlu1 %v3542_v8, %s3870_s22  ;;  %1760 = vst.msk [vmem:[#allocation3 + $0x48] sm:$0xf] %vm1741_vm8, %v1682_v2 }
 0x1f2   : > { %2465 = vrot.lane.b32.xlu0 %v3573_v54, %s3871_s27 }
 0x1f3   : > { %v1680_v18 = vpop.permute.xlu1 %1679 }
 0x1f4   : > { %1759 = vst.msk [vmem:[#allocation3 + $0x44] sm:$0xf] %vm1741_vm8, %v1680_v18  ;;  %v1936_v19 = vpop.permute.xlu0 %1935 }
 0x1f5   : > { %2214 = vrot.lane.b32.xlu1 %v3638_v43, %s3870_s22  ;;  %2016 = vst.msk [vmem:[#allocation3 + $0x40] sm:$0xf] %vm1999_vm9, %v1936_v19 }
 0x1f6   : > { %2469 = vrot.lane.b32.xlu0 %v3669_v26, %s3871_s27 }
 0x1f7   : > { %v1684_v27 = vpop.permute.xlu1 %1683 }
 0x1f8   : > { %1761 = vst.msk [vmem:[#allocation3 + $0x4c] sm:$0xf] %vm1741_vm8, %v1684_v27  ;;  %v1940_v33 = vpop.permute.xlu0 %1939 }
 0x1f9   : > { %2467 = vrot.lane.b32.xlu1 %v3574_v30, %s3871_s27  ;;  %2018 = vst.msk [vmem:[#allocation3 + $0x48] sm:$0xf] %vm1999_vm9, %v1940_v33  ;;  %v2063_v30 = vld [vmem:[#allocation2 + $0x1a1] sm:$0xff] }
 0x1fa   : > { %1187 = vrot.lane.b32.xlu0 %v3605_v24, %s3866_s18  ;;  %v3642_v14 = vpack.c.bf16 %v2063_v30, %v2063_v30 }
 0x1fb   : > { %v1938_v46 = vpop.permute.xlu1 %1937 }
 0x1fc   : > { %2017 = vst.msk [vmem:[#allocation3 + $0x44] sm:$0xf] %vm1999_vm9, %v1938_v46  ;;  %v2193_v50 = vpop.permute.xlu0 %2192 }
 0x1fd   : > { %2471 = vrot.lane.b32.xlu1 %v3670_v39, %s3871_s27  ;;  %2273 = vst.msk [vmem:[#allocation3 + $0x40] sm:$0xf] %vm2256_vm10, %v2193_v50 }
 0x1fe   : > { %1191 = vrot.lane.b32.xlu0 %v3513_v40, %s3866_s18 }
 0x1ff   : > { %v1942_v52 = vpop.permute.xlu1 %1941 }
 0x200   : > { %2019 = vst.msk [vmem:[#allocation3 + $0x4c] sm:$0xf] %vm1999_vm9, %v1942_v52  ;;  %v2197_v59 = vpop.permute.xlu0 %2196 }
 0x201   : > { %1189 = vrot.lane.b32.xlu1 %v3606_v42, %s3866_s18  ;;  %2275 = vst.msk [vmem:[#allocation3 + $0x48] sm:$0xf] %vm2256_vm10, %v2197_v59 }
 0x202   : > { %1444 = vrot.lane.b32.xlu0 %v3637_v51, %s3867_s19 }
 0x203   : > { %v2195_v63 = vpop.permute.xlu1 %2194 }
 0x204   : > { %2274 = vst.msk [vmem:[#allocation3 + $0x44] sm:$0xf] %vm2256_vm10, %v2195_v63  ;;  %v2450_v3 = vpop.permute.xlu0 %2449 }
 0x205   : > { %1193 = vrot.lane.b32.xlu1 %v3514_v62, %s3866_s18  ;;  %2530 = vst.msk [vmem:[#allocation3 + $0x40] sm:$0xf] %vm2513_vm11, %v2450_v3 }
 0x206   : > { %1448 = vrot.lane.b32.xlu0 %v3545_v25, %s3867_s19 }
 0x207   : > { %v2199_v4 = vpop.permute.xlu1 %2198 }
 0x208   : > { %2276 = vst.msk [vmem:[#allocation3 + $0x4c] sm:$0xf] %vm2256_vm10, %v2199_v4  ;;  %v2454_v34 = vpop.permute.xlu0 %2453 }
 0x209   : > { %1446 = vrot.lane.b32.xlu1 %v3638_v43, %s3867_s19  ;;  %2532 = vst.msk [vmem:[#allocation3 + $0x48] sm:$0xf] %vm2513_vm11, %v2454_v34 }
 0x20a   : > { %1701 = vrot.lane.b32.xlu0 %v3669_v26, %s3868_s20 }
 0x20b   : > { %v2452_v5 = vpop.permute.xlu1 %2451 }
 0x20c   : > { %2531 = vst.msk [vmem:[#allocation3 + $0x44] sm:$0xf] %vm2513_vm11, %v2452_v5  ;;  %v1172_v60 = vpop.permute.xlu0 %1171 }
 0x20d   : > { %1450 = vrot.lane.b32.xlu1 %v3546_v58, %s3867_s19  ;;  %1248 = vst.msk [vmem:[#allocation3 + $0x50] sm:$0xf] %vm1227_vm6, %v1172_v60 }
 0x20e   : > { %1705 = vrot.lane.b32.xlu0 %v3577_v37, %s3868_s20 }
 0x20f   : > { %v2456_v13 = vpop.permute.xlu1 %2455 }
 0x210   : > { %2533 = vst.msk [vmem:[#allocation3 + $0x4c] sm:$0xf] %vm2513_vm11, %v2456_v13  ;;  %v1176_v41 = vpop.permute.xlu0 %1175 }
 0x211   : > { %1703 = vrot.lane.b32.xlu1 %v3670_v39, %s3868_s20  ;;  %1250 = vst.msk [vmem:[#allocation3 + $0x58] sm:$0xf] %vm1227_vm6, %v1176_v41 }
 0x212   : > { %1959 = vrot.lane.b32.xlu0 %v3513_v40, %s3869_s21 }
 0x213   : > { %v1174_v7 = vpop.permute.xlu1 %1173  ;;  %v3847_v55 = vld [vmem:[#allocation3 + $0x40] sm:$0xff]  }
 0x214   : > { %1249 = vst.msk [vmem:[#allocation3 + $0x54] sm:$0xf] %vm1227_vm6, %v1174_v7  ;;  %v1429_v29 = vpop.permute.xlu0 %1428  ;;  %3795 = vmatprep.mubr.msk.bf16.mxu1 %vm2678_vm12, %v3847_v55 }
 0x215   : > { %1707 = vrot.lane.b32.xlu1 %v3578_v49, %s3868_s20  ;;  %1505 = vst.msk [vmem:[#allocation3 + $0x50] sm:$0xf] %vm1484_vm7, %v1429_v29 }
 0x216   : > { %1963 = vrot.lane.b32.xlu0 %v3609_v6, %s3869_s21 }
 0x217   : > { %v1178_v8 = vpop.permute.xlu1 %1177  ;;  %v3848_v54 = vld [vmem:[#allocation3 + $0x48] sm:$0xff]  }
 0x218   : > { %1251 = vst.msk [vmem:[#allocation3 + $0x5c] sm:$0xf] %vm1227_vm6, %v1178_v8  ;;  %v1433_v9 = vpop.permute.xlu0 %1432  ;;  %3796 = vmatmul.mubr.msk.bf16.vlgmr.msra.gmra.mxu1 %vm2678_vm12, %v3848_v54 }
 0x219   : > { %1961 = vrot.lane.b32.xlu1 %v3514_v62, %s3869_s21  ;;  %1507 = vst.msk [vmem:[#allocation3 + $0x58] sm:$0xf] %vm1484_vm7, %v1433_v9 }
 0x21a   : > { %2216 = vrot.lane.b32.xlu0 %v3545_v25, %s3870_s22 }
 0x21b   : > { %v1431_v44 = vpop.permute.xlu1 %1430 }
 0x21c   : > { %1506 = vst.msk [vmem:[#allocation3 + $0x54] sm:$0xf] %vm1484_vm7, %v1431_v44  ;;  %v1686_v11 = vpop.permute.xlu0 %1685 }
 0x21d   : > { %1965 = vrot.lane.b32.xlu1 %v3610_v10, %s3869_s21  ;;  %1762 = vst.msk [vmem:[#allocation3 + $0x50] sm:$0xf] %vm1741_vm8, %v1686_v11 }
 0x21e   : > { %2220 = vrot.lane.b32.xlu0 %v3641_v56, %s3870_s22 }
 0x21f   : > { %v1435_v24 = vpop.permute.xlu1 %1434 }
 0x220   : > { %1508 = vst.msk [vmem:[#allocation3 + $0x5c] sm:$0xf] %vm1484_vm7, %v1435_v24  ;;  %v1690_v38 = vpop.permute.xlu0 %1689 }
 0x221   : > { %2218 = vrot.lane.b32.xlu1 %v3546_v58, %s3870_s22  ;;  %1764 = vst.msk [vmem:[#allocation3 + $0x58] sm:$0xf] %vm1741_vm8, %v1690_v38 }
 0x222   : > { %2473 = vrot.lane.b32.xlu0 %v3577_v37, %s3871_s27 }
 0x223   : > { %v1688_v15 = vpop.permute.xlu1 %1687 }
 0x224   : > { %1763 = vst.msk [vmem:[#allocation3 + $0x54] sm:$0xf] %vm1741_vm8, %v1688_v15  ;;  %v1944_v16 = vpop.permute.xlu0 %1943 }
 0x225   : > { %2222 = vrot.lane.b32.xlu1 %v3642_v14, %s3870_s22  ;;  %2020 = vst.msk [vmem:[#allocation3 + $0x50] sm:$0xf] %vm1999_vm9, %v1944_v16 }
 0x226   : > { %2477 = vrot.lane.b32.xlu0 %v3673_v45, %s3871_s27 }
 0x227   : > { %v1692_v42 = vpop.permute.xlu1 %1691 }
 0x228   : > { %1765 = vst.msk [vmem:[#allocation3 + $0x5c] sm:$0xf] %vm1741_vm8, %v1692_v42  ;;  %v1948_v51 = vpop.permute.xlu0 %1947 }
 0x229   : > { %2475 = vrot.lane.b32.xlu1 %v3578_v49, %s3871_s27  ;;  %2022 = vst.msk [vmem:[#allocation3 + $0x58] sm:$0xf] %vm1999_vm9, %v1948_v51 }
 0x22b   : > { %v1946_v31 = vpop.permute.xlu1 %1945 }
 0x22c   : > { %2021 = vst.msk [vmem:[#allocation3 + $0x54] sm:$0xf] %vm1999_vm9, %v1946_v31  ;;  %v2201_v47 = vpop.permute.xlu0 %2200 }
 0x22d   : > { %2479 = vrot.lane.b32.xlu1 %v3674_v17, %s3871_s27  ;;  %2277 = vst.msk [vmem:[#allocation3 + $0x50] sm:$0xf] %vm2256_vm10, %v2201_v47 }
 0x22f   : > { %v1950_v61 = vpop.permute.xlu1 %1949 }
 0x230   : > { %2023 = vst.msk [vmem:[#allocation3 + $0x5c] sm:$0xf] %vm1999_vm9, %v1950_v61  ;;  %v2205_v20 = vpop.permute.xlu0 %2204 }
 0x231   : > { %2279 = vst.msk [vmem:[#allocation3 + $0x58] sm:$0xf] %vm2256_vm10, %v2205_v20 }
 0x233   : > { %v2203_v21 = vpop.permute.xlu1 %2202 }
 0x234   : > { %2278 = vst.msk [vmem:[#allocation3 + $0x54] sm:$0xf] %vm2256_vm10, %v2203_v21  ;;  %v2458_v2 = vpop.permute.xlu0 %2457  ;;  %v3781_v31 = vpop.f32.mrf.mxu0 }
 0x235   : > { %2534 = vst.msk [vmem:[#allocation3 + $0x50] sm:$0xf] %vm2513_vm11, %v2458_v2 }
 0x236   : > { %v2765_v47 = vpop.f32.mrf.mxu0 }
 0x237   : > { %v2207_v43 = vpop.permute.xlu1 %2206 }
 0x238   : > { %2280 = vst.msk [vmem:[#allocation3 + $0x5c] sm:$0xf] %vm2256_vm10, %v2207_v43  ;;  %v2462_v26 = vpop.permute.xlu0 %2461  ;;  %v3782_v61 = vpop.f32.mrf.mxu0 }
 0x239   : > { %2536 = vst.msk [vmem:[#allocation3 + $0x58] sm:$0xf] %vm2513_vm11, %v2462_v26 }
 0x23a   : > { %v2768_v20 = vpop.f32.mrf.mxu0 }
 0x23b   : > { %v2460_v18 = vpop.permute.xlu1 %2459  ;;  %v2931_v43 = vmul.f32 %v2768_v20, %v2768_v20 }
 0x23c   : > { %2535 = vst.msk [vmem:[#allocation3 + $0x54] sm:$0xf] %vm2513_vm11, %v2460_v18  ;;  %v1180_v19 = vpop.permute.xlu0 %1179  ;;  %v2930_v18 = vmul.f32 %v2765_v47, %v2765_v47 }
 0x23d   : > { %1252 = vst.msk [vmem:[#allocation3 + $0x60] sm:$0xf] %vm1227_vm6, %v1180_v19  ;;  %v2892_v19 = vadd.f32 %v2768_v20, %v2765_v47 }
 0x23f   : > { %v2464_v48 = vpop.permute.xlu1 %2463 }
 0x240   : > { %2537 = vst.msk [vmem:[#allocation3 + $0x5c] sm:$0xf] %vm2513_vm11, %v2464_v48  ;;  %v1184_v27 = vpop.permute.xlu0 %1183  ;;  %v2962_v48 = vadd.f32 %v2931_v43, %v2930_v18 }
 0x241   : > { %1254 = vst.msk [vmem:[#allocation3 + $0x68] sm:$0xf] %vm1227_vm6, %v1184_v27 }
 0x243   : > { %v1182_v32 = vpop.permute.xlu1 %1181  ;;  %v3849_v33 = vld [vmem:[#allocation3 + $0x50] sm:$0xff]  }
 0x244   : > { %1253 = vst.msk [vmem:[#allocation3 + $0x64] sm:$0xf] %vm1227_vm6, %v1182_v32  ;;  %v1437_v39 = vpop.permute.xlu0 %1436  ;;  %3799 = vmatprep.mubr.msk.bf16.mxu1 %vm2678_vm12, %v3849_v33  ;;  %v2932_v32 = vmul.f32 %v3781_v31, %v3781_v31  ;;  %v2893_v33 = vadd.f32 %v3781_v31, %v2892_v19 }
 0x245   : > { %1509 = vst.msk [vmem:[#allocation3 + $0x60] sm:$0xf] %vm1484_vm7, %v1437_v39 }
 0x247   : > { %v1186_v40 = vpop.permute.xlu1 %1185  ;;  %v3850_v46 = vld [vmem:[#allocation3 + $0x58] sm:$0xff]  }
 0x248   : > { %1255 = vst.msk [vmem:[#allocation3 + $0x6c] sm:$0xf] %vm1227_vm6, %v1186_v40  ;;  %v1441_v50 = vpop.permute.xlu0 %1440  ;;  %3800 = vmatmul.mubr.msk.bf16.gmra.mxu1 %vm2678_vm12, %v3850_v46  ;;  %v2963_v40 = vadd.f32 %v2962_v48, %v2932_v32  ;;  %v2933_v46 = vmul.f32 %v3782_v61, %v3782_v61 }
 0x249   : > { %1511 = vst.msk [vmem:[#allocation3 + $0x68] sm:$0xf] %vm1484_vm7, %v1441_v50  ;;  %v2894_v50 = vadd.f32 %v3782_v61, %v2893_v33 }
 0x24b   : > { %v1439_v28 = vpop.permute.xlu1 %1438 }
 0x24c   : > { %1510 = vst.msk [vmem:[#allocation3 + $0x64] sm:$0xf] %vm1484_vm7, %v1439_v28  ;;  %v1694_v52 = vpop.permute.xlu0 %1693 }
 0x24d   : > { %1766 = vst.msk [vmem:[#allocation3 + $0x60] sm:$0xf] %vm1741_vm8, %v1694_v52 }
 0x24f   : > { %v1443_v53 = vpop.permute.xlu1 %1442 }
 0x250   : > { %1512 = vst.msk [vmem:[#allocation3 + $0x6c] sm:$0xf] %vm1484_vm7, %v1443_v53  ;;  %v1698_v59 = vpop.permute.xlu0 %1697 }
 0x251   : > { %1768 = vst.msk [vmem:[#allocation3 + $0x68] sm:$0xf] %vm1741_vm8, %v1698_v59  ;;  %v2964_v59 = vadd.f32 %v2963_v40, %v2933_v46 }
 0x253   : > { %v1696_v62 = vpop.permute.xlu1 %1695 }
 0x254   : > { %1767 = vst.msk [vmem:[#allocation3 + $0x64] sm:$0xf] %vm1741_vm8, %v1696_v62  ;;  %v1952_v25 = vpop.permute.xlu0 %1951 }
 0x255   : > { %2024 = vst.msk [vmem:[#allocation3 + $0x60] sm:$0xf] %vm1999_vm9, %v1952_v25 }
 0x257   : > { %v1700_v63 = vpop.permute.xlu1 %1699 }
 0x258   : > { %1769 = vst.msk [vmem:[#allocation3 + $0x6c] sm:$0xf] %vm1741_vm8, %v1700_v63  ;;  %v1956_v3 = vpop.permute.xlu0 %1955 }
 0x259   : > { %2026 = vst.msk [vmem:[#allocation3 + $0x68] sm:$0xf] %vm1999_vm9, %v1956_v3 }
 0x25b   : > { %v1954_v57 = vpop.permute.xlu1 %1953 }
 0x25c   : > { %2025 = vst.msk [vmem:[#allocation3 + $0x64] sm:$0xf] %vm1999_vm9, %v1954_v57  ;;  %v2209_v4 = vpop.permute.xlu0 %2208  ;;  %v3785_v21 = vpop.f32.mrf.mxu0 }
 0x25d   : > { %2281 = vst.msk [vmem:[#allocation3 + $0x60] sm:$0xf] %vm2256_vm10, %v2209_v4  ;;  %v2936_v4 = vmul.f32 %v3785_v21, %v3785_v21 }
 0x25e   : > { %v2781_v2 = vpop.f32.mrf.mxu0 }
 0x25f   : > { %v1958_v35 = vpop.permute.xlu1 %1957  ;;  %v2934_v28 = vmul.f32 %v2781_v2, %v2781_v2  ;;  %v2895_v53 = vadd.f32 %v2894_v50, %v2781_v2 }
 0x260   : > { %2027 = vst.msk [vmem:[#allocation3 + $0x6c] sm:$0xf] %vm1999_vm9, %v1958_v35  ;;  %v2213_v34 = vpop.permute.xlu0 %2212  ;;  %v3786_v26 = vpop.f32.mrf.mxu0 }
 0x261   : > { %2283 = vst.msk [vmem:[#allocation3 + $0x68] sm:$0xf] %vm2256_vm10, %v2213_v34  ;;  %v2965_v25 = vadd.f32 %v2964_v59, %v2934_v28 }
 0x262   : > { %v2784_v27 = vpop.f32.mrf.mxu0 }
 0x263   : > { %v2211_v58 = vpop.permute.xlu1 %2210  ;;  %v2935_v62 = vmul.f32 %v2784_v27, %v2784_v27  ;;  %v2896_v63 = vadd.f32 %v2895_v53, %v2784_v27 }
 0x264   : > { %2282 = vst.msk [vmem:[#allocation3 + $0x64] sm:$0xf] %vm2256_vm10, %v2211_v58  ;;  %v2466_v37 = vpop.permute.xlu0 %2465 }
 0x265   : > { %2538 = vst.msk [vmem:[#allocation3 + $0x60] sm:$0xf] %vm2513_vm11, %v2466_v37  ;;  %v2966_v57 = vadd.f32 %v2965_v25, %v2935_v62  ;;  %v2897_v35 = vadd.f32 %v3785_v21, %v2896_v63 }
 0x267   : > { %v2215_v5 = vpop.permute.xlu1 %2214  ;;  %v2967_v58 = vadd.f32 %v2966_v57, %v2936_v4 }
 0x268   : > { %2284 = vst.msk [vmem:[#allocation3 + $0x6c] sm:$0xf] %vm2256_vm10, %v2215_v5  ;;  %v2470_v60 = vpop.permute.xlu0 %2469  ;;  %v2937_v5 = vmul.f32 %v3786_v26, %v3786_v26 }
 0x269   : > { %2540 = vst.msk [vmem:[#allocation3 + $0x68] sm:$0xf] %vm2513_vm11, %v2470_v60  ;;  %v2898_v60 = vadd.f32 %v3786_v26, %v2897_v35 }
 0x26b   : > { %v2468_v36 = vpop.permute.xlu1 %2467 }
 0x26c   : > { %2539 = vst.msk [vmem:[#allocation3 + $0x64] sm:$0xf] %vm2513_vm11, %v2468_v36  ;;  %v1188_v13 = vpop.permute.xlu0 %1187 }
 0x26d   : > { %1256 = vst.msk [vmem:[#allocation3 + $0x70] sm:$0xf] %vm1227_vm6, %v1188_v13 }
 0x26f   : > { %v2472_v0 = vpop.permute.xlu1 %2471 }
 0x270   : > { %2541 = vst.msk [vmem:[#allocation3 + $0x6c] sm:$0xf] %vm2513_vm11, %v2472_v0  ;;  %v1192_v41 = vpop.permute.xlu0 %1191  ;;  %v2968_v0 = vadd.f32 %v2967_v58, %v2937_v5 }
 0x271   : > { %1258 = vst.msk [vmem:[#allocation3 + $0x78] sm:$0xf] %vm1227_vm6, %v1192_v41 }
 0x273   : > { %v1190_v49 = vpop.permute.xlu1 %1189  ;;  %v3851_v6 = vld [vmem:[#allocation3 + $0x60] sm:$0xff]  }
 0x274   : > { %1257 = vst.msk [vmem:[#allocation3 + $0x74] sm:$0xf] %vm1227_vm6, %v1190_v49  ;;  %v1445_v7 = vpop.permute.xlu0 %1444  ;;  %3803 = vmatprep.mubr.msk.bf16.mxu1 %vm2678_vm12, %v3851_v6 }
 0x275   : > { %1513 = vst.msk [vmem:[#allocation3 + $0x70] sm:$0xf] %vm1484_vm7, %v1445_v7 }
 0x277   : > { %v1194_v55 = vpop.permute.xlu1 %1193  ;;  %v3852_v29 = vld [vmem:[#allocation3 + $0x68] sm:$0xff]  }
 0x278   : > { %1259 = vst.msk [vmem:[#allocation3 + $0x7c] sm:$0xf] %vm1227_vm6, %v1194_v55  ;;  %v1449_v22 = vpop.permute.xlu0 %1448  ;;  %3804 = vmatmul.mubr.msk.bf16.gmra.mxu1 %vm2678_vm12, %v3852_v29 }
 0x279   : > { %1515 = vst.msk [vmem:[#allocation3 + $0x78] sm:$0xf] %vm1484_vm7, %v1449_v22 }
 0x27b   : > { %v1447_v8 = vpop.permute.xlu1 %1446 }
 0x27c   : > { %1514 = vst.msk [vmem:[#allocation3 + $0x74] sm:$0xf] %vm1484_vm7, %v1447_v8  ;;  %v1702_v54 = vpop.permute.xlu0 %1701 }
 0x27d   : > { %1770 = vst.msk [vmem:[#allocation3 + $0x70] sm:$0xf] %vm1741_vm8, %v1702_v54 }
 0x27f   : > { %v1451_v23 = vpop.permute.xlu1 %1450 }
 0x280   : > { %1516 = vst.msk [vmem:[#allocation3 + $0x7c] sm:$0xf] %vm1484_vm7, %v1451_v23  ;;  %v1706_v9 = vpop.permute.xlu0 %1705 }
 0x281   : > { %1772 = vst.msk [vmem:[#allocation3 + $0x78] sm:$0xf] %vm1741_vm8, %v1706_v9 }
 0x283   : > { %v1704_v10 = vpop.permute.xlu1 %1703 }
 0x284   : > { %1771 = vst.msk [vmem:[#allocation3 + $0x74] sm:$0xf] %vm1741_vm8, %v1704_v10  ;;  %v1960_v56 = vpop.permute.xlu0 %1959  ;;  %v3789_v39 = vpop.f32.mrf.mxu0 }
 0x285   : > { %2028 = vst.msk [vmem:[#allocation3 + $0x70] sm:$0xf] %vm1999_vm9, %v1960_v56  ;;  %v2940_v8 = vmul.f32 %v3789_v39, %v3789_v39 }
 0x286   : > { %v2797_v52 = vpop.f32.mrf.mxu0 }
 0x287   : > { %v1708_v44 = vpop.permute.xlu1 %1707  ;;  %v2938_v36 = vmul.f32 %v2797_v52, %v2797_v52  ;;  %v2899_v13 = vadd.f32 %v2898_v60, %v2797_v52 }
 0x288   : > { %1773 = vst.msk [vmem:[#allocation3 + $0x7c] sm:$0xf] %vm1741_vm8, %v1708_v44  ;;  %v1964_v11 = vpop.permute.xlu0 %1963  ;;  %v3790_v3 = vpop.f32.mrf.mxu0 }
 0x289   : > { %2030 = vst.msk [vmem:[#allocation3 + $0x78] sm:$0xf] %vm1999_vm9, %v1964_v11  ;;  %v2969_v6 = vadd.f32 %v2968_v0, %v2938_v36  ;;  %v2941_v56 = vmul.f32 %v3790_v3, %v3790_v3 }
 0x28a   : > { %v2800_v34 = vpop.f32.mrf.mxu0 }
 0x28b   : > { %v1962_v30 = vpop.permute.xlu1 %1961  ;;  %v2939_v41 = vmul.f32 %v2800_v34, %v2800_v34  ;;  %v2900_v7 = vadd.f32 %v2899_v13, %v2800_v34 }
 0x28c   : > { %2029 = vst.msk [vmem:[#allocation3 + $0x74] sm:$0xf] %vm1999_vm9, %v1962_v30  ;;  %v2217_v24 = vpop.permute.xlu0 %2216 }
 0x28d   : > { %2285 = vst.msk [vmem:[#allocation3 + $0x70] sm:$0xf] %vm2256_vm10, %v2217_v24  ;;  %v2970_v55 = vadd.f32 %v2969_v6, %v2939_v41  ;;  %v2901_v54 = vadd.f32 %v3789_v39, %v2900_v7 }
 0x28f   : > { %v1966_v12 = vpop.permute.xlu1 %1965  ;;  %v2971_v23 = vadd.f32 %v2970_v55, %v2940_v8  ;;  %v2902_v44 = vadd.f32 %v3790_v3, %v2901_v54 }
 0x290   : > { %2031 = vst.msk [vmem:[#allocation3 + $0x7c] sm:$0xf] %vm1999_vm9, %v1966_v12  ;;  %v2221_v38 = vpop.permute.xlu0 %2220 }
 0x291   : > { %2287 = vst.msk [vmem:[#allocation3 + $0x78] sm:$0xf] %vm2256_vm10, %v2221_v38  ;;  %v2972_v24 = vadd.f32 %v2971_v23, %v2941_v56 }
 0x293   : > { %v2219_v14 = vpop.permute.xlu1 %2218 }
 0x294   : > { %2286 = vst.msk [vmem:[#allocation3 + $0x74] sm:$0xf] %vm2256_vm10, %v2219_v14  ;;  %v2474_v45 = vpop.permute.xlu0 %2473 }
 0x295   : > { %2542 = vst.msk [vmem:[#allocation3 + $0x70] sm:$0xf] %vm2513_vm11, %v2474_v45 }
 0x297   : > { %v2223_v15 = vpop.permute.xlu1 %2222 }
 0x298   : > { %2288 = vst.msk [vmem:[#allocation3 + $0x7c] sm:$0xf] %vm2256_vm10, %v2223_v15  ;;  %v2478_v16 = vpop.permute.xlu0 %2477 }
 0x299   : > { %2544 = vst.msk [vmem:[#allocation3 + $0x78] sm:$0xf] %vm2513_vm11, %v2478_v16 }
 0x29b   : > { %v2476_v1 = vpop.permute.xlu1 %2475 }
 0x29c   : > { %2543 = vst.msk [vmem:[#allocation3 + $0x74] sm:$0xf] %vm2513_vm11, %v2476_v1 }
 0x29f   : > { %v2480_v42 = vpop.permute.xlu1 %2479 }
 0x2a0   : > { %2545 = vst.msk [vmem:[#allocation3 + $0x7c] sm:$0xf] %vm2513_vm11, %v2480_v42 }
 0x2a3   : > { %v3853_v51 = vld [vmem:[#allocation3 + $0x70] sm:$0xff]  }
 0x2a4   : > { %3807 = vmatprep.mubr.msk.bf16.mxu1 %vm2678_vm12, %v3853_v51 }
 0x2a7   : > { %v3854_v17 = vld [vmem:[#allocation3 + $0x78] sm:$0xff]  }
 0x2a8   : > { %3808 = vmatmul.mubr.msk.bf16.gmra.mxu1 %vm2678_vm12, %v3854_v17 }
 0x2ac   : > { %v3793_v37 = vpop.f32.mrf.mxu0 }
 0x2ad   : > { %v2944_v1 = vmul.f32 %v3793_v37, %v3793_v37 }
 0x2ae   : > { %v2813_v49 = vpop.f32.mrf.mxu0 }
 0x2af   : > { %v2942_v11 = vmul.f32 %v2813_v49, %v2813_v49  ;;  %v2903_v30 = vadd.f32 %v2902_v44, %v2813_v49 }
 0x2b0   : > { %v3794_v29 = vpop.f32.mrf.mxu0 }
 0x2b1   : > { %v2973_v14 = vadd.f32 %v2972_v24, %v2942_v11  ;;  %v2945_v31 = vmul.f32 %v3794_v29, %v3794_v29 }
 0x2b2   : > { %v2816_v9 = vpop.f32.mrf.mxu0 }
 0x2b3   : > { %v2943_v12 = vmul.f32 %v2816_v9, %v2816_v9  ;;  %v2904_v45 = vadd.f32 %v2903_v30, %v2816_v9 }
 0x2b5   : > { %v2974_v15 = vadd.f32 %v2973_v14, %v2943_v12  ;;  %v2905_v42 = vadd.f32 %v3793_v37, %v2904_v45 }
 0x2b7   : > { %v2975_v17 = vadd.f32 %v2974_v15, %v2944_v1  ;;  %v2906_v47 = vadd.f32 %v3794_v29, %v2905_v42 }
 0x2b9   : > { %v2976_v2 = vadd.f32 %v2975_v17, %v2945_v31 }
 0x2d8   : > { %v3797_v22 = vpop.f32.mrf.mxu1 }
 0x2d9   : > { %v2948_v27 = vmul.f32 %v3797_v22, %v3797_v22 }
 0x2da   : > { %v2829_v10 = vpop.f32.mrf.mxu1 }
 0x2db   : > { %v2946_v61 = vmul.f32 %v2829_v10, %v2829_v10  ;;  %v2907_v21 = vadd.f32 %v2906_v47, %v2829_v10 }
 0x2dc   : > { %v3798_v38 = vpop.f32.mrf.mxu1 }
 0x2dd   : > { %v2977_v26 = vadd.f32 %v2976_v2, %v2946_v61  ;;  %v2949_v46 = vmul.f32 %v3798_v38, %v3798_v38 }
 0x2de   : > { %v2832_v16 = vpop.f32.mrf.mxu1 }
 0x2df   : > { %v2947_v43 = vmul.f32 %v2832_v16, %v2832_v16  ;;  %v2908_v18 = vadd.f32 %v2907_v21, %v2832_v16 }
 0x2e1   : > { %v2978_v48 = vadd.f32 %v2977_v26, %v2947_v43  ;;  %v2909_v32 = vadd.f32 %v3797_v22, %v2908_v18 }
 0x2e3   : > { %v2979_v39 = vadd.f32 %v2978_v48, %v2948_v27  ;;  %v2910_v50 = vadd.f32 %v3798_v38, %v2909_v32 }
 0x2e5   : > { %v2980_v53 = vadd.f32 %v2979_v39, %v2949_v46 }
 0x308   : > { %v3801_v51 = vpop.f32.mrf.mxu1 }
 0x309   : > { %v2952_v4 = vmul.f32 %v3801_v51, %v3801_v51 }
 0x30a   : > { %v2845_v20 = vpop.f32.mrf.mxu1 }
 0x30b   : > { %v2950_v28 = vmul.f32 %v2845_v20, %v2845_v20  ;;  %v2911_v52 = vadd.f32 %v2910_v50, %v2845_v20 }
 0x30c   : > { %v3802_v19 = vpop.f32.mrf.mxu1 }
 0x30d   : > { %v2981_v25 = vadd.f32 %v2980_v53, %v2950_v28  ;;  %v2953_v37 = vmul.f32 %v3802_v19, %v3802_v19 }
 0x30e   : > { %v2848_v33 = vpop.f32.mrf.mxu1 }
 0x30f   : > { %v2951_v59 = vmul.f32 %v2848_v33, %v2848_v33  ;;  %v2912_v63 = vadd.f32 %v2911_v52, %v2848_v33 }
 0x311   : > { %v2982_v3 = vadd.f32 %v2981_v25, %v2951_v59  ;;  %v2913_v35 = vadd.f32 %v3801_v51, %v2912_v63 }
 0x313   : > { %v2983_v34 = vadd.f32 %v2982_v3, %v2952_v4  ;;  %v2914_v5 = vadd.f32 %v3802_v19, %v2913_v35 }
 0x315   : > { %v2984_v13 = vadd.f32 %v2983_v34, %v2953_v37 }
 0x338   : > { %v3805_v40 = vpop.f32.mrf.mxu1 }
 0x339   : > { %v2956_v7 = vmul.f32 %v3805_v40, %v3805_v40 }
 0x33a   : > { %v2861_v62 = vpop.f32.mrf.mxu1 }
 0x33b   : > { %v2954_v60 = vmul.f32 %v2861_v62, %v2861_v62  ;;  %v2915_v36 = vadd.f32 %v2914_v5, %v2861_v62 }
 0x33c   : > { %v3806_v57 = vpop.f32.mrf.mxu1 }
 0x33d   : > { %v2985_v41 = vadd.f32 %v2984_v13, %v2954_v60  ;;  %v2957_v54 = vmul.f32 %v3806_v57, %v3806_v57 }
 0x33e   : > { %v2864_v58 = vpop.f32.mrf.mxu1 }
 0x33f   : > { %v2955_v0 = vmul.f32 %v2864_v58, %v2864_v58  ;;  %v2916_v49 = vadd.f32 %v2915_v36, %v2864_v58 }
 0x341   : > { %v2986_v6 = vadd.f32 %v2985_v41, %v2955_v0  ;;  %v2917_v55 = vadd.f32 %v3805_v40, %v2916_v49 }
 0x343   : > { %v2987_v22 = vadd.f32 %v2986_v6, %v2956_v7  ;;  %v2918_v23 = vadd.f32 %v3806_v57, %v2917_v55 }
 0x345   : > { %v2988_v44 = vadd.f32 %v2987_v22, %v2957_v54 }
 0x368   : > { %v3809_v29 = vpop.f32.mrf.mxu1 }
 0x369   : > { %v2960_v38 = vmul.f32 %v3809_v29, %v3809_v29 }
 0x36a   : > { %v2877_v8 = vpop.f32.mrf.mxu1 }
 0x36b   : > { %v2958_v9 = vmul.f32 %v2877_v8, %v2877_v8  ;;  %v2919_v56 = vadd.f32 %v2918_v23, %v2877_v8 }
 0x36c   : > { %v3810_v10 = vpop.f32.mrf.mxu1 }
 0x36d   : > { %v2989_v30 = vadd.f32 %v2988_v44, %v2958_v9  ;;  %v2961_v15 = vmul.f32 %v3810_v10, %v3810_v10 }
 0x36e   : > { %v2880_v11 = vpop.f32.mrf.mxu1 }
 0x36f   : > { %v2920_v24 = vadd.f32 %v2919_v56, %v2880_v11  ;;  %v2959_v12 = vmul.f32 %v2880_v11, %v2880_v11 }
 0x371   : > { %v2921_v14 = vadd.f32 %v3809_v29, %v2920_v24  ;;  %v2990_v45 = vadd.f32 %v2989_v30, %v2959_v12 }
 0x373   : > { %v2922_v16 = vadd.f32 %v3810_v10, %v2921_v14  ;;  %v2991_v1 = vadd.f32 %v2990_v45, %v2960_v38 }
 0x375   : > { %v2923_v42 = vrot.slane %v2922_v16, 4  ;;  %v2992_v51 = vadd.f32 %v2991_v1, %v2961_v15 }
 0x377   : > { %v2924_v17 = vadd.f32 %v2923_v42, %v2922_v16  ;;  %v2993_v31 = vrot.slane %v2992_v51, 4 }
 0x379   : > { %v2925_v47 = vrot.slane %v2924_v17, 2  ;;  %v2994_v61 = vadd.f32 %v2993_v31, %v2992_v51 }
 0x37b   : > { %v2926_v20 = vadd.f32 %v2925_v47, %v2924_v17  ;;  %v2995_v21 = vrot.slane %v2994_v61, 2 }
 0x37d   : > { %v2927_v2 = vrot.slane %v2926_v20, 1  ;;  %v2996_v43 = vadd.f32 %v2995_v21, %v2994_v61 }
 0x37f   : > { %v2928_v26 = vadd.f32 %v2927_v2, %v2926_v20  ;;  %v2997_v18 = vrot.slane %v2996_v43, 1 }
 0x381   : > { %2929 = vst [vmem:[%s141_s5] sm:$0x1] %v2928_v26  ;;  %v2998_v19 = vadd.f32 %v2997_v18, %v2996_v43 }
 0x383   : > { %2999 = vst [vmem:[%s141_s5 + $0x1] sm:$0x1] %v2998_v19 }
 0x384 PF: > { %s12_s9 = sadd.s32 1, %s3861_s9  }
 0x385   : > { %p9_p4 = scmp.ge.s32.totalorder %s12_s9, 4  }
 0x387   :  { %11 = sbr.rel (!%p9_p4) target bundleno = 1 (0x1), region = 60 }

// kernel: unet_down_forward.3
= control target key start
LH: loop header
LB: loop body
LE: loop exit
PB: predicated region body
PF: predicated region fallthrough
CT: control target
= control target key end

     0   :  { %s4033_s15 = smov 0   ;;  %s5123_s0 = inlined_call_operand.vmem [shape: bf16[2,16,16,4], index: 0, kind: input, shape index: {}]   ;;  %s5124_s1 = inlined_call_operand.vmem [shape: bf16[36,128], index: 1, kind: input, shape index: {}]   ;;  %s5125_s2 = inlined_call_operand.vmem [shape: f32[1,128], index: 2, kind: input, shape index: {}]   ;;  %s5126_s3 = inlined_call_operand.vmem [shape: f32[1,128], index: 3, kind: input, shape index: {}]   ;;  %s5127_s4 = inlined_call_operand.vmem [shape: f32[2,32,256], index: 4, kind: output, shape index: {}]  }
   0x1 LB: > { %s3185_s16 = sadd.s32 4294967295, %s3997_s15   ;;  %p3189_p0 = scmp.ge.s32.totalorder %s3997_s15, 1  ;;  %s3997_s15 = sphi %s4033_s15, %s14_s15  }
   0x2   : > { %p162_p1 = scmp.lt.s32.totalorder %s3997_s15, 3 }
   0x4   : > { %p163_p2 = pnand %p3189_p0, %p162_p1 }
   0x5   : > { %p4043_p3 = scmp.lt.s32.totalorder (!%p163_p2), %s3185_s16, 1  ;;  %s4000_s22 = smov (!%p163_p2), 4  }
   0x6   : > { %166 = sbr.rel (%p163_p2) target bundleno = 971 (0x3cb), region = 36  ;;  %s4001_s23 = smov (!%p163_p2), 8  }
   0x7   : > { %s4002_s24 = smov (!%p163_p2), 12   ;;  %s4003_s25 = smov (!%p163_p2), 16  }
   0x8   : > { %s4004_s26 = smov (!%p163_p2), 20   ;;  %s4005_s27 = smov (!%p163_p2), 24  }
   0x9   : > { %s4006_s28 = smov (!%p163_p2), 28   ;;  %s4007_s7 = smov (!%p163_p2), 32  }
   0xb   : > { %vm199_vm0 = vcmask 31744   ;;  %vm202_vm1 = vcmask 25600   ;;  %v3999_v0 = vmov 0.0   ;;  %s5130_s16 = smov (!%p4043_p3, %s3185_s16), 1  ;;  %vm512_vm2 = vcmask 27648  }
   0xc   : > { %200 = vst.msk [vmem:[#allocation2] sm:$0xff] %vm199_vm0, %v3999_v0  ;;  %201 = vst.msk [vmem:[#allocation2 + $0x8] sm:$0xff] %vm199_vm0, %v3999_v0  ;;  %s3521_s18 = sshll.u32 %s5130_s16, 7  ;;  %vm769_vm3 = vcmask 60448   ;;  %vm1026_vm4 = vcmask 93248   ;;  %vm1283_vm5 = vcmask 126048  }
   0xd   : > { %204 = vst.msk [vmem:[#allocation2 + $0x18] sm:$0xff] %vm199_vm0, %v3999_v0  ;;  %205 = vst.msk [vmem:[#allocation2 + $0x20] sm:$0xff] %vm199_vm0, %v3999_v0  ;;  %s4111_s21 = scalar_lea.vmem %s5123_s0, %s3521_s18  ;;  %vm2783_vm6 = vcmask 1041408   ;;  %vm1540_vm7 = vcmask 158848   ;;  %vm1797_vm8 = vcmask 191648   ;;  %vm2055_vm9 = vcmask 224448  }
   0xe   : > { %207 = vst.msk [vmem:[#allocation2 + $0x30] sm:$0xff] %vm199_vm0, %v3999_v0  ;;  %208 = vst.msk [vmem:[#allocation2 + $0x38] sm:$0xff] %vm199_vm0, %v3999_v0  ;;  %v3812_v1 = vld [vmem:[%s4111_s21] sm:$0xff]   ;;  %v3875_v2 = vld [vmem:[%s4111_s21 + $0x8] sm:$0xff]   ;;  %vm2312_vm10 = vcmask 257248   ;;  %vm2569_vm11 = vcmask 290048  }
   0xf   : > { %210 = vst.msk [vmem:[#allocation2 + $0x48] sm:$0xff] %vm199_vm0, %v3999_v0  ;;  %211 = vst.msk [vmem:[#allocation2 + $0x50] sm:$0xff] %vm199_vm0, %v3999_v0  ;;  %v3876_v3 = vld [vmem:[%s4111_s21 + $0x10] sm:$0xff]   ;;  %v3813_v4 = vunpack.c.l.bf16 %v3812_v1  ;;  %v3814_v5 = vunpack.c.h.bf16 %v3812_v1  ;;  %v3817_v6 = vunpack.c.l.bf16 %v3875_v2  ;;  %v3877_v8 = vld [vmem:[%s4111_s21 + $0x18] sm:$0xff]   ;;  %v3818_v13 = vunpack.c.h.bf16 %v3875_v2  ;;  %s3522_s14 = sshll.u32 %s5130_s16, 6 }
  0x10   : > { %213 = vst.msk [vmem:[#allocation2 + $0x60] sm:$0xff] %vm199_vm0, %v3999_v0  ;;  %214 = vst.msk [vmem:[#allocation2 + $0x68] sm:$0xff] %vm199_vm0, %v3999_v0  ;;  %v3821_v7 = vunpack.c.l.bf16 %v3876_v3  ;;  %v3878_v9 = vld [vmem:[%s4111_s21 + $0x20] sm:$0xff]   ;;  %v3879_v10 = vld [vmem:[%s4111_s21 + $0x28] sm:$0xff]   ;;  %v3825_v14 = vunpack.c.l.bf16 %v3877_v8  ;;  %v3822_v15 = vunpack.c.h.bf16 %v3876_v3  ;;  %v3826_v20 = vunpack.c.h.bf16 %v3877_v8  ;;  %s197_s19 = scalar_lea.vmem %s5127_s4, %s3522_s14 }
  0x11   : > { %216 = vst.msk [vmem:[#allocation2 + $0x78] sm:$0xff] %vm199_vm0, %v3999_v0  ;;  %217 = vst.msk [vmem:[#allocation2 + $0x80] sm:$0xff] %vm199_vm0, %v3999_v0  ;;  %v3829_v16 = vunpack.c.l.bf16 %v3878_v9  ;;  %v3880_v17 = vld [vmem:[%s4111_s21 + $0x30] sm:$0xff]   ;;  %v3833_v21 = vunpack.c.l.bf16 %v3879_v10  ;;  %v3881_v22 = vld [vmem:[%s4111_s21 + $0x38] sm:$0xff]   ;;  %v3830_v25 = vunpack.c.h.bf16 %v3878_v9  ;;  %v3834_v27 = vunpack.c.h.bf16 %v3879_v10 }
  0x12   : > { %219 = vst.msk [vmem:[#allocation2 + $0x90] sm:$0xff] %vm199_vm0, %v3999_v0  ;;  %220 = vst.msk [vmem:[#allocation2 + $0x98] sm:$0xff] %vm199_vm0, %v3999_v0  ;;  %v3882_v23 = vld [vmem:[%s4111_s21 + $0x40] sm:$0xff]   ;;  %v3883_v24 = vld [vmem:[%s4111_s21 + $0x48] sm:$0xff]   ;;  %v3837_v26 = vunpack.c.l.bf16 %v3880_v17  ;;  %v3841_v28 = vunpack.c.l.bf16 %v3881_v22  ;;  %v3838_v32 = vunpack.c.h.bf16 %v3880_v17  ;;  %v3842_v34 = vunpack.c.h.bf16 %v3881_v22 }
  0x13   : > { %222 = vst.msk [vmem:[#allocation2 + $0xa8] sm:$0xff] %vm199_vm0, %v3999_v0  ;;  %223 = vst.msk [vmem:[#allocation2 + $0xb0] sm:$0xff] %vm199_vm0, %v3999_v0  ;;  %v545_v11 = vld [vmem:[#allocation2 + $0x1] sm:$0xff]  ;;  %v3884_v29 = vld [vmem:[%s4111_s21 + $0x50] sm:$0xff]   ;;  %v3845_v33 = vunpack.c.l.bf16 %v3882_v23  ;;  %v3849_v35 = vunpack.c.l.bf16 %v3883_v24  ;;  %v3846_v38 = vunpack.c.h.bf16 %v3882_v23  ;;  %v3850_v40 = vunpack.c.h.bf16 %v3883_v24 }
  0x14   : > { %225 = vst.msk [vmem:[#allocation2 + $0xc0] sm:$0xff] %vm199_vm0, %v3999_v0  ;;  %226 = vst.msk [vmem:[#allocation2 + $0xc8] sm:$0xff] %vm199_vm0, %v3999_v0  ;;  %v3555_v18 = vpack.c.bf16 %v545_v11, %v545_v11  ;;  %v3885_v30 = vld [vmem:[%s4111_s21 + $0x58] sm:$0xff]   ;;  %v3886_v31 = vld [vmem:[%s4111_s21 + $0x60] sm:$0xff]   ;;  %v3853_v39 = vunpack.c.l.bf16 %v3884_v29  ;;  %v3854_v44 = vunpack.c.h.bf16 %v3884_v29  ;;  %vm2734_vm12 = vcmask 293888  }
  0x15   : > { %228 = vst.msk [vmem:[#allocation2 + $0xd8] sm:$0xff] %vm199_vm0, %v3999_v0  ;;  %229 = vst.msk [vmem:[#allocation2 + $0xe0] sm:$0xff] %vm199_vm0, %v3999_v0  ;;  %v3887_v36 = vld [vmem:[%s4111_s21 + $0x68] sm:$0xff]   ;;  %v3888_v37 = vld [vmem:[%s4111_s21 + $0x70] sm:$0xff]   ;;  %v3857_v41 = vunpack.c.l.bf16 %v3885_v30  ;;  %v3861_v45 = vunpack.c.l.bf16 %v3886_v31  ;;  %v3858_v46 = vunpack.c.h.bf16 %v3885_v30  ;;  %v3862_v48 = vunpack.c.h.bf16 %v3886_v31 }
  0x16   : > { %231 = vst.msk [vmem:[#allocation2 + $0xf0] sm:$0xff] %vm199_vm0, %v3999_v0  ;;  %232 = vst.msk [vmem:[#allocation2 + $0xf8] sm:$0xff] %vm199_vm0, %v3999_v0  ;;  %673 = vrot.lane.b32.xlu0 %v3555_v18, %s4000_s22  ;;  %v352_v42 = vld [vmem:[#allocation2] sm:$0xff]  ;;  %v353_v43 = vld [vmem:[#allocation2 + $0x8] sm:$0xff]  ;;  %v3865_v47 = vunpack.c.l.bf16 %v3887_v36  ;;  %v3869_v49 = vunpack.c.l.bf16 %v3888_v37  ;;  %v3866_v50 = vunpack.c.h.bf16 %v3887_v36  ;;  %v3870_v51 = vunpack.c.h.bf16 %v3888_v37 }
  0x17   : > { %234 = vst.msk [vmem:[#allocation2 + $0x108] sm:$0xff] %vm199_vm0, %v3999_v0  ;;  %235 = vst.msk [vmem:[#allocation2 + $0x110] sm:$0xff] %vm199_vm0, %v3999_v0  ;;  %v3523_v52 = vpack.c.bf16 %v352_v42, %v352_v42  ;;  %v3524_v53 = vpack.c.bf16 %v353_v43, %v353_v43 }
  0x18   : > { %237 = vst.msk [vmem:[#allocation2 + $0x120] sm:$0xff] %vm199_vm0, %v3999_v0  ;;  %238 = vst.msk [vmem:[#allocation2 + $0x128] sm:$0xff] %vm199_vm0, %v3999_v0 }
  0x19   : > { %240 = vst.msk [vmem:[#allocation2 + $0x138] sm:$0xff] %vm199_vm0, %v3999_v0  ;;  %241 = vst.msk [vmem:[#allocation2 + $0x140] sm:$0xff] %vm199_vm0, %v3999_v0 }
  0x1a   : > { %243 = vst.msk [vmem:[#allocation2 + $0x150] sm:$0xff] %vm199_vm0, %v3999_v0  ;;  %244 = vst.msk [vmem:[#allocation2 + $0x158] sm:$0xff] %vm199_vm0, %v3999_v0 }
  0x1b   : > { %246 = vst.msk [vmem:[#allocation2 + $0x168] sm:$0xff] %vm199_vm0, %v3999_v0  ;;  %247 = vst.msk [vmem:[#allocation2 + $0x170] sm:$0xff] %vm199_vm0, %v3999_v0 }
  0x1c   : > { %249 = vst.msk [vmem:[#allocation2 + $0x180] sm:$0xff] %vm199_vm0, %v3999_v0  ;;  %250 = vst.msk [vmem:[#allocation2 + $0x188] sm:$0xff] %vm199_vm0, %v3999_v0 }
  0x1d   : > { %252 = vst.msk [vmem:[#allocation2 + $0x198] sm:$0xff] %vm199_vm0, %v3999_v0  ;;  %253 = vst.msk [vmem:[#allocation2 + $0x1a0] sm:$0xff] %vm199_vm0, %v3999_v0 }
  0x1e   : > { %203 = vst.msk [vmem:[#allocation2 + $0x10] sm:$0x3] %vm202_vm1, %v3999_v0  ;;  %206 = vst.msk [vmem:[#allocation2 + $0x28] sm:$0x3] %vm202_vm1, %v3999_v0 }
  0x1f   : > { %209 = vst.msk [vmem:[#allocation2 + $0x40] sm:$0x3] %vm202_vm1, %v3999_v0  ;;  %212 = vst.msk [vmem:[#allocation2 + $0x58] sm:$0x3] %vm202_vm1, %v3999_v0 }
  0x20   : > { %215 = vst.msk [vmem:[#allocation2 + $0x70] sm:$0x3] %vm202_vm1, %v3999_v0  ;;  %218 = vst.msk [vmem:[#allocation2 + $0x88] sm:$0x3] %vm202_vm1, %v3999_v0 }
  0x21   : > { %221 = vst.msk [vmem:[#allocation2 + $0xa0] sm:$0x3] %vm202_vm1, %v3999_v0  ;;  %224 = vst.msk [vmem:[#allocation2 + $0xb8] sm:$0x3] %vm202_vm1, %v3999_v0 }
  0x22   : > { %227 = vst.msk [vmem:[#allocation2 + $0xd0] sm:$0x3] %vm202_vm1, %v3999_v0  ;;  %230 = vst.msk [vmem:[#allocation2 + $0xe8] sm:$0x3] %vm202_vm1, %v3999_v0 }
  0x23   : > { %233 = vst.msk [vmem:[#allocation2 + $0x100] sm:$0x3] %vm202_vm1, %v3999_v0  ;;  %236 = vst.msk [vmem:[#allocation2 + $0x118] sm:$0x3] %vm202_vm1, %v3999_v0 }
  0x24   : > { %239 = vst.msk [vmem:[#allocation2 + $0x130] sm:$0x3] %vm202_vm1, %v3999_v0  ;;  %242 = vst.msk [vmem:[#allocation2 + $0x148] sm:$0x3] %vm202_vm1, %v3999_v0 }
  0x25   : > { %245 = vst.msk [vmem:[#allocation2 + $0x160] sm:$0x3] %vm202_vm1, %v3999_v0  ;;  %248 = vst.msk [vmem:[#allocation2 + $0x178] sm:$0x3] %vm202_vm1, %v3999_v0  ;;  %v4119_v12 = vld [vmem:[#allocation2 + $0x9] sm:$0xff] }
  0x26   : > { %251 = vst.msk [vmem:[#allocation2 + $0x190] sm:$0x3] %vm202_vm1, %v3999_v0  ;;  %254 = vst.msk [vmem:[#allocation2 + $0x1a8] sm:$0x3] %vm202_vm1, %v3999_v0  ;;  %v3556_v19 = vpack.c.bf16 %v4119_v12, %v4119_v12 }
  0x27   : > { %320 = vst.msk [vmem:[#allocation2 + $0x19] sm:$0xff] %vm199_vm0, %v3813_v4  ;;  %321 = vst.msk [vmem:[#allocation2 + $0x21] sm:$0xff] %vm199_vm0, %v3814_v5 }
  0x28   : > { %322 = vst.msk [vmem:[#allocation2 + $0x31] sm:$0xff] %vm199_vm0, %v3817_v6  ;;  %324 = vst.msk [vmem:[#allocation2 + $0x49] sm:$0xff] %vm199_vm0, %v3821_v7  ;;  %675 = vrot.lane.b32.xlu0 %v3556_v19, %s4000_s22 }
  0x29   : > { %323 = vst.msk [vmem:[#allocation2 + $0x39] sm:$0xff] %vm199_vm0, %v3818_v13  ;;  %326 = vst.msk [vmem:[#allocation2 + $0x61] sm:$0xff] %vm199_vm0, %v3825_v14 }
  0x2a   : > { %325 = vst.msk [vmem:[#allocation2 + $0x51] sm:$0xff] %vm199_vm0, %v3822_v15  ;;  %328 = vst.msk [vmem:[#allocation2 + $0x79] sm:$0xff] %vm199_vm0, %v3829_v16 }
  0x2b   : > { %327 = vst.msk [vmem:[#allocation2 + $0x69] sm:$0xff] %vm199_vm0, %v3826_v20  ;;  %330 = vst.msk [vmem:[#allocation2 + $0x91] sm:$0xff] %vm199_vm0, %v3833_v21 }
  0x2c   : > { %329 = vst.msk [vmem:[#allocation2 + $0x81] sm:$0xff] %vm199_vm0, %v3830_v25  ;;  %332 = vst.msk [vmem:[#allocation2 + $0xa9] sm:$0xff] %vm199_vm0, %v3837_v26 }
  0x2d   : > { %331 = vst.msk [vmem:[#allocation2 + $0x99] sm:$0xff] %vm199_vm0, %v3834_v27  ;;  %334 = vst.msk [vmem:[#allocation2 + $0xc1] sm:$0xff] %vm199_vm0, %v3841_v28 }
  0x2e   : > { %333 = vst.msk [vmem:[#allocation2 + $0xb1] sm:$0xff] %vm199_vm0, %v3838_v32  ;;  %336 = vst.msk [vmem:[#allocation2 + $0xd9] sm:$0xff] %vm199_vm0, %v3845_v33  ;;  %v547_v54 = vld [vmem:[#allocation2 + $0x19] sm:$0xff]  ;;  %v548_v56 = vld [vmem:[#allocation2 + $0x21] sm:$0xff] }
  0x2f   : > { %335 = vst.msk [vmem:[#allocation2 + $0xc9] sm:$0xff] %vm199_vm0, %v3842_v34  ;;  %338 = vst.msk [vmem:[#allocation2 + $0xf1] sm:$0xff] %vm199_vm0, %v3849_v35  ;;  %v549_v55 = vld [vmem:[#allocation2 + $0x31] sm:$0xff]  ;;  %v3557_v57 = vpack.c.bf16 %v547_v54, %v547_v54  ;;  %v551_v59 = vld [vmem:[#allocation2 + $0x49] sm:$0xff]  ;;  %v3558_v60 = vpack.c.bf16 %v548_v56, %v548_v56 }
  0x30   : > { %337 = vst.msk [vmem:[#allocation2 + $0xe1] sm:$0xff] %vm199_vm0, %v3846_v38  ;;  %340 = vst.msk [vmem:[#allocation2 + $0x109] sm:$0xff] %vm199_vm0, %v3853_v39  ;;  %v3559_v58 = vpack.c.bf16 %v549_v55, %v549_v55  ;;  %v3561_v61 = vpack.c.bf16 %v551_v59, %v551_v59  ;;  %v550_v62 = vld [vmem:[#allocation2 + $0x39] sm:$0xff]  ;;  %v553_v63 = vld [vmem:[#allocation2 + $0x61] sm:$0xff] }
  0x31   : > { %339 = vst.msk [vmem:[#allocation2 + $0xf9] sm:$0xff] %vm199_vm0, %v3850_v40  ;;  %342 = vst.msk [vmem:[#allocation2 + $0x121] sm:$0xff] %vm199_vm0, %v3857_v41  ;;  %677 = vrot.lane.b32.xlu1 %v3557_v57, %s4000_s22  ;;  %v3560_v0 = vpack.c.bf16 %v550_v62, %v550_v62  ;;  %v3563_v1 = vpack.c.bf16 %v553_v63, %v553_v63  ;;  %v552_v2 = vld [vmem:[#allocation2 + $0x51] sm:$0xff]  ;;  %v555_v3 = vld [vmem:[#allocation2 + $0x79] sm:$0xff] }
  0x32   : > { %341 = vst.msk [vmem:[#allocation2 + $0x111] sm:$0xff] %vm199_vm0, %v3854_v44  ;;  %344 = vst.msk [vmem:[#allocation2 + $0x139] sm:$0xff] %vm199_vm0, %v3861_v45  ;;  %681 = vrot.lane.b32.xlu0 %v3559_v58, %s4000_s22  ;;  %v3562_v4 = vpack.c.bf16 %v552_v2, %v552_v2  ;;  %v3565_v5 = vpack.c.bf16 %v555_v3, %v555_v3  ;;  %v554_v6 = vld [vmem:[#allocation2 + $0x69] sm:$0xff]  ;;  %v557_v7 = vld [vmem:[#allocation2 + $0x91] sm:$0xff] }
  0x33   : > { %343 = vst.msk [vmem:[#allocation2 + $0x129] sm:$0xff] %vm199_vm0, %v3858_v46  ;;  %346 = vst.msk [vmem:[#allocation2 + $0x151] sm:$0xff] %vm199_vm0, %v3865_v47  ;;  %v3564_v8 = vpack.c.bf16 %v554_v6, %v554_v6  ;;  %v3567_v9 = vpack.c.bf16 %v557_v7, %v557_v7  ;;  %v556_v10 = vld [vmem:[#allocation2 + $0x81] sm:$0xff]  ;;  %v559_v11 = vld [vmem:[#allocation2 + $0xa9] sm:$0xff] }
  0x34   : > { %345 = vst.msk [vmem:[#allocation2 + $0x141] sm:$0xff] %vm199_vm0, %v3862_v48  ;;  %348 = vst.msk [vmem:[#allocation2 + $0x169] sm:$0xff] %vm199_vm0, %v3869_v49  ;;  %v4174_v12 = vld [vmem:[#allocation2 + $0x99] sm:$0xff]  ;;  %v3566_v14 = vpack.c.bf16 %v556_v10, %v556_v10  ;;  %v3569_v15 = vpack.c.bf16 %v559_v11, %v559_v11  ;;  %v561_v16 = vld [vmem:[#allocation2 + $0xc1] sm:$0xff] }
  0x35   : > { %347 = vst.msk [vmem:[#allocation2 + $0x159] sm:$0xff] %vm199_vm0, %v3866_v50  ;;  %349 = vst.msk [vmem:[#allocation2 + $0x171] sm:$0xff] %vm199_vm0, %v3870_v51  ;;  %679 = vrot.lane.b32.xlu1 %v3558_v60, %s4000_s22  ;;  %v354_v13 = vld [vmem:[#allocation2 + $0x18] sm:$0xff]  ;;  %v356_v18 = vld [vmem:[#allocation2 + $0x30] sm:$0xff]  ;;  %v3568_v27 = vpack.c.bf16 %v4174_v12, %v4174_v12  ;;  %v3571_v28 = vpack.c.bf16 %v561_v16, %v561_v16 }
  0x36   : > { %513 = vst.msk [vmem:[#allocation3] sm:$0xf] %vm512_vm2, %v3523_v52  ;;  %514 = vst.msk [vmem:[#allocation3 + $0x4] sm:$0xf] %vm512_vm2, %v3524_v53  ;;  %685 = vrot.lane.b32.xlu0 %v3561_v61, %s4000_s22  ;;  %v4178_v17 = vpack.c.bf16 %v354_v13, %v354_v13  ;;  %v355_v19 = vld [vmem:[#allocation2 + $0x20] sm:$0xff]  ;;  %v4180_v20 = vpack.c.bf16 %v356_v18, %v356_v18  ;;  %v358_v22 = vld [vmem:[#allocation2 + $0x48] sm:$0xff] }
  0x37   : > { %v4182_v21 = vpack.c.bf16 %v355_v19, %v355_v19  ;;  %v4184_v23 = vld [vmem:[#allocation2 + $0xb1] sm:$0xff]  ;;  %v4188_v24 = vpack.c.bf16 %v358_v22, %v358_v22  ;;  %v360_v26 = vld [vmem:[#allocation2 + $0x60] sm:$0xff]  ;;  %v361_v34 = vld [vmem:[#allocation2 + $0x68] sm:$0xff] }
  0x38   : > { %515 = vst.msk [vmem:[#allocation3 + $0x8] sm:$0xf] %vm512_vm2, %v4178_v17  ;;  %v357_v25 = vld [vmem:[#allocation2 + $0x38] sm:$0xff]  ;;  %517 = vst.msk [vmem:[#allocation3 + $0x10] sm:$0xf] %vm512_vm2, %v4180_v20  ;;  %v4200_v31 = vpack.c.bf16 %v360_v26, %v360_v26  ;;  %v359_v32 = vld [vmem:[#allocation2 + $0x50] sm:$0xff]  ;;  %v4210_v37 = vpack.c.bf16 %v361_v34, %v361_v34  ;;  %v3570_v53 = vpack.c.bf16 %v4184_v23, %v4184_v23 }
  0x39   : > { %683 = vrot.lane.b32.xlu1 %v3560_v0, %s4000_s22  ;;  %v4192_v29 = vld [vmem:[#allocation2 + $0xd9] sm:$0xff]  ;;  %516 = vst.msk [vmem:[#allocation3 + $0xc] sm:$0xf] %vm512_vm2, %v4182_v21  ;;  %v4198_v30 = vpack.c.bf16 %v357_v25, %v357_v25  ;;  %519 = vst.msk [vmem:[#allocation3 + $0x18] sm:$0xf] %vm512_vm2, %v4188_v24  ;;  %v4206_v35 = vpack.c.bf16 %v359_v32, %v359_v32  ;;  %v364_v38 = vld [vmem:[#allocation2 + $0x90] sm:$0xff] }
  0x3a   : > { %689 = vrot.lane.b32.xlu0 %v3563_v1, %s4000_s22  ;;  %v362_v33 = vld [vmem:[#allocation2 + $0x78] sm:$0xff]  ;;  %v363_v39 = vld [vmem:[#allocation2 + $0x80] sm:$0xff]  ;;  %v366_v40 = vld [vmem:[#allocation2 + $0xa8] sm:$0xff]  ;;  %521 = vst.msk [vmem:[#allocation3 + $0x20] sm:$0xf] %vm512_vm2, %v4200_v31  ;;  %v4216_v41 = vpack.c.bf16 %v364_v38, %v364_v38  ;;  %v3573_v59 = vpack.c.bf16 %v4192_v29, %v4192_v29 }
  0x3b   : > { %v4208_v36 = vpack.c.bf16 %v362_v33, %v362_v33  ;;  %518 = vst.msk [vmem:[#allocation3 + $0x14] sm:$0xf] %vm512_vm2, %v4198_v30  ;;  %v4218_v42 = vpack.c.bf16 %v363_v39, %v363_v39  ;;  %v4220_v43 = vpack.c.bf16 %v366_v40, %v366_v40  ;;  %v365_v44 = vld [vmem:[#allocation2 + $0x98] sm:$0xff]  ;;  %v368_v45 = vld [vmem:[#allocation2 + $0xc0] sm:$0xff]  ;;  %v367_v46 = vld [vmem:[#allocation2 + $0xb0] sm:$0xff] }
  0x3c   : > { %520 = vst.msk [vmem:[#allocation3 + $0x1c] sm:$0xf] %vm512_vm2, %v4206_v35  ;;  %522 = vst.msk [vmem:[#allocation3 + $0x24] sm:$0xf] %vm512_vm2, %v4210_v37  ;;  %v4228_v47 = vpack.c.bf16 %v365_v44, %v365_v44  ;;  %v4230_v48 = vpack.c.bf16 %v368_v45, %v368_v45  ;;  %v4232_v49 = vpack.c.bf16 %v367_v46, %v367_v46  ;;  %v370_v50 = vld [vmem:[#allocation2 + $0xd8] sm:$0xff]  ;;  %v369_v51 = vld [vmem:[#allocation2 + $0xc8] sm:$0xff] }
  0x3d   : > { %687 = vrot.lane.b32.xlu1 %v3562_v4, %s4000_s22  ;;  %523 = vst.msk [vmem:[#allocation3 + $0x28] sm:$0xf] %vm512_vm2, %v4208_v36  ;;  %v372_v52 = vld [vmem:[#allocation2 + $0xf0] sm:$0xff]  ;;  %525 = vst.msk [vmem:[#allocation3 + $0x30] sm:$0xf] %vm512_vm2, %v4216_v41  ;;  %v4242_v54 = vpack.c.bf16 %v370_v50, %v370_v50  ;;  %v4244_v55 = vpack.c.bf16 %v369_v51, %v369_v51  ;;  %v371_v57 = vld [vmem:[#allocation2 + $0xe0] sm:$0xff] }
  0x3e   : > { %693 = vrot.lane.b32.xlu0 %v3565_v5, %s4000_s22  ;;  %524 = vst.msk [vmem:[#allocation3 + $0x2c] sm:$0xf] %vm512_vm2, %v4218_v42  ;;  %527 = vst.msk [vmem:[#allocation3 + $0x38] sm:$0xf] %vm512_vm2, %v4220_v43  ;;  %v4246_v56 = vpack.c.bf16 %v372_v52, %v372_v52  ;;  %v373_v58 = vld [vmem:[#allocation2 + $0xf8] sm:$0xff]  ;;  %v4258_v60 = vpack.c.bf16 %v371_v57, %v371_v57  ;;  %v374_v61 = vld [vmem:[#allocation2 + $0x108] sm:$0xff] }
  0x3f   : > { %526 = vst.msk [vmem:[#allocation3 + $0x34] sm:$0xf] %vm512_vm2, %v4228_v47  ;;  %529 = vst.msk [vmem:[#allocation3 + $0x40] sm:$0xf] %vm512_vm2, %v4230_v48  ;;  %v4260_v62 = vpack.c.bf16 %v373_v58, %v373_v58  ;;  %v562_v63 = vld [vmem:[#allocation2 + $0xc9] sm:$0xff]  ;;  %v565_v0 = vld [vmem:[#allocation2 + $0xf1] sm:$0xff]  ;;  %v4268_v1 = vpack.c.bf16 %v374_v61, %v374_v61 }
  0x40   : > { %528 = vst.msk [vmem:[#allocation3 + $0x3c] sm:$0xf] %vm512_vm2, %v4232_v49  ;;  %531 = vst.msk [vmem:[#allocation3 + $0x48] sm:$0xf] %vm512_vm2, %v4242_v54  ;;  %v375_v2 = vld [vmem:[#allocation2 + $0x110] sm:$0xff]  ;;  %v3572_v3 = vpack.c.bf16 %v562_v63, %v562_v63  ;;  %v3575_v4 = vpack.c.bf16 %v565_v0, %v565_v0  ;;  %v376_v5 = vld [vmem:[#allocation2 + $0x120] sm:$0xff] }
  0x41   : > { %691 = vrot.lane.b32.xlu1 %v3564_v8, %s4000_s22  ;;  %530 = vst.msk [vmem:[#allocation3 + $0x44] sm:$0xf] %vm512_vm2, %v4244_v55  ;;  %533 = vst.msk [vmem:[#allocation3 + $0x50] sm:$0xf] %vm512_vm2, %v4246_v56  ;;  %v4278_v6 = vpack.c.bf16 %v375_v2, %v375_v2  ;;  %v564_v7 = vld [vmem:[#allocation2 + $0xe1] sm:$0xff]  ;;  %v567_v8 = vld [vmem:[#allocation2 + $0x109] sm:$0xff] }
  0x42   : > { %697 = vrot.lane.b32.xlu0 %v3567_v9, %s4000_s22  ;;  %532 = vst.msk [vmem:[#allocation3 + $0x4c] sm:$0xf] %vm512_vm2, %v4258_v60  ;;  %534 = vst.msk [vmem:[#allocation3 + $0x54] sm:$0xf] %vm512_vm2, %v4260_v62  ;;  %v4280_v9 = vpack.c.bf16 %v376_v5, %v376_v5  ;;  %v377_v10 = vld [vmem:[#allocation2 + $0x128] sm:$0xff]  ;;  %v3574_v11 = vpack.c.bf16 %v564_v7, %v564_v7  ;;  %v3577_v12 = vpack.c.bf16 %v567_v8, %v567_v8  ;;  %v378_v13 = vld [vmem:[#allocation2 + $0x138] sm:$0xff] }
  0x43   : > { %535 = vst.msk [vmem:[#allocation3 + $0x58] sm:$0xf] %vm512_vm2, %v4268_v1  ;;  %536 = vst.msk [vmem:[#allocation3 + $0x5c] sm:$0xf] %vm512_vm2, %v4278_v6  ;;  %v569_v16 = vld [vmem:[#allocation2 + $0x121] sm:$0xff]  ;;  %v4290_v18 = vpack.c.bf16 %v378_v13, %v378_v13  ;;  %v380_v25 = vld [vmem:[#allocation2 + $0x150] sm:$0xff] }
  0x44   : > { %537 = vst.msk [vmem:[#allocation3 + $0x60] sm:$0xf] %vm512_vm2, %v4280_v9  ;;  %v379_v19 = vld [vmem:[#allocation2 + $0x140] sm:$0xff]  ;;  %v3579_v23 = vpack.c.bf16 %v569_v16, %v569_v16  ;;  %v4300_v29 = vpack.c.bf16 %v380_v25, %v380_v25  ;;  %v381_v32 = vld [vmem:[#allocation2 + $0x158] sm:$0xff]  ;;  %v382_v38 = vld [vmem:[#allocation2 + $0x168] sm:$0xff] }
  0x45   : > { %695 = vrot.lane.b32.xlu1 %v3566_v14, %s4000_s22  ;;  %v4288_v14 = vpack.c.bf16 %v377_v10, %v377_v10  ;;  %539 = vst.msk [vmem:[#allocation3 + $0x68] sm:$0xf] %vm512_vm2, %v4290_v18  ;;  %v4298_v26 = vpack.c.bf16 %v379_v19, %v379_v19  ;;  %v4308_v39 = vpack.c.bf16 %v381_v32, %v381_v32  ;;  %v570_v40 = vld [vmem:[#allocation2 + $0x129] sm:$0xff]  ;;  %v573_v44 = vld [vmem:[#allocation2 + $0x151] sm:$0xff]  ;;  %v572_v58 = vld [vmem:[#allocation2 + $0x141] sm:$0xff] }
  0x46   : > { %701 = vrot.lane.b32.xlu0 %v3569_v15, %s4000_s22  ;;  %v566_v15 = vld [vmem:[#allocation2 + $0xf9] sm:$0xff]  ;;  %541 = vst.msk [vmem:[#allocation3 + $0x70] sm:$0xf] %vm512_vm2, %v4300_v29  ;;  %v4310_v45 = vpack.c.bf16 %v382_v38, %v382_v38  ;;  %v383_v46 = vld [vmem:[#allocation2 + $0x170] sm:$0xff]  ;;  %v3580_v51 = vpack.c.bf16 %v570_v40, %v570_v40  ;;  %v3583_v52 = vpack.c.bf16 %v573_v44, %v573_v44  ;;  %v805_v19 = vld [vmem:[#allocation2 + $0x22] sm:$0xff] }
  0x47   : > { %538 = vst.msk [vmem:[#allocation3 + $0x64] sm:$0xf] %vm512_vm2, %v4288_v14  ;;  %v3576_v22 = vpack.c.bf16 %v566_v15, %v566_v15  ;;  %540 = vst.msk [vmem:[#allocation3 + $0x6c] sm:$0xf] %vm512_vm2, %v4298_v26  ;;  %v3889_v50 = vld [vmem:[%s4111_s21 + $0x78] sm:$0xff]   ;;  %v3582_v61 = vpack.c.bf16 %v572_v58, %v572_v58  ;;  %v816_v58 = vld [vmem:[#allocation2 + $0xaa] sm:$0xff] }
  0x48   : > { %542 = vst.msk [vmem:[#allocation3 + $0x74] sm:$0xf] %vm512_vm2, %v4308_v39  ;;  %543 = vst.msk [vmem:[#allocation3 + $0x78] sm:$0xf] %vm512_vm2, %v4310_v45  ;;  %v3873_v57 = vunpack.c.l.bf16 %v3889_v50  ;;  %v3874_v0 = vunpack.c.h.bf16 %v3889_v50  ;;  %v574_v2 = vld [vmem:[#allocation2 + $0x159] sm:$0xff]  ;;  %v576_v7 = vld [vmem:[#allocation2 + $0x171] sm:$0xff] }
  0x49   : > { %699 = vrot.lane.b32.xlu1 %v3568_v27, %s4000_s22  ;;  %v568_v27 = vld [vmem:[#allocation2 + $0x111] sm:$0xff]  ;;  %v804_v8 = vld [vmem:[#allocation2 + $0x1a] sm:$0xff]  ;;  %v3586_v10 = vpack.c.bf16 %v576_v7, %v576_v7 }
  0x4a   : > { %705 = vrot.lane.b32.xlu0 %v3571_v28, %s4000_s22  ;;  %v571_v28 = vld [vmem:[#allocation2 + $0x139] sm:$0xff]  ;;  %v3578_v33 = vpack.c.bf16 %v568_v27, %v568_v27  ;;  %350 = vst.msk [vmem:[#allocation2 + $0x181] sm:$0xff] %vm199_vm0, %v3873_v57  ;;  %351 = vst.msk [vmem:[#allocation2 + $0x189] sm:$0xff] %vm199_vm0, %v3874_v0  ;;  %v813_v57 = vld [vmem:[#allocation2 + $0x82] sm:$0xff] }
  0x4b   : > { %v3581_v34 = vpack.c.bf16 %v571_v28, %v571_v28  ;;  %v806_v13 = vld [vmem:[#allocation2 + $0x32] sm:$0xff]  ;;  %v807_v27 = vld [vmem:[#allocation2 + $0x3a] sm:$0xff]  ;;  %v810_v28 = vld [vmem:[#allocation2 + $0x62] sm:$0xff] }
  0x4c   : > { %v3591_v16 = vpack.c.bf16 %v806_v13, %v806_v13  ;;  %v3592_v32 = vpack.c.bf16 %v807_v27, %v807_v27  ;;  %v812_v38 = vld [vmem:[#allocation2 + $0x7a] sm:$0xff]  ;;  %v814_v50 = vld [vmem:[#allocation2 + $0x92] sm:$0xff]  ;;  %v818_v0 = vld [vmem:[#allocation2 + $0xc2] sm:$0xff] }
  0x4d   : > { %703 = vrot.lane.b32.xlu1 %v3570_v53, %s4000_s22  ;;  %v4319_v53 = vpack.c.bf16 %v383_v46, %v383_v46  ;;  %v3597_v44 = vpack.c.bf16 %v812_v38, %v812_v38  ;;  %v811_v46 = vld [vmem:[#allocation2 + $0x6a] sm:$0xff]  ;;  %v826_v27 = vld [vmem:[#allocation2 + $0x122] sm:$0xff] }
  0x4e   : > { %709 = vrot.lane.b32.xlu0 %v3573_v59, %s4000_s22  ;;  %v575_v59 = vld [vmem:[#allocation2 + $0x169] sm:$0xff] }
  0x4f   : > { %544 = vst.msk [vmem:[#allocation3 + $0x7c] sm:$0xf] %vm512_vm2, %v4319_v53  ;;  %v3585_v63 = vpack.c.bf16 %v575_v59, %v575_v59  ;;  %v3598_v59 = vpack.c.bf16 %v813_v57, %v813_v57  ;;  %v829_v57 = vld [vmem:[#allocation2 + $0x142] sm:$0xff] }
  0x51   : > { %707 = vrot.lane.b32.xlu1 %v3572_v3, %s4000_s22  ;;  %v802_v3 = vld [vmem:[#allocation2 + $0x2] sm:$0xff] }
  0x52   : > { %713 = vrot.lane.b32.xlu0 %v3575_v4, %s4000_s22  ;;  %v3584_v4 = vpack.c.bf16 %v574_v2, %v574_v2  ;;  %v3587_v5 = vpack.c.bf16 %v802_v3, %v802_v3  ;;  %v3603_v3 = vpack.c.bf16 %v818_v0, %v818_v0  ;;  %v831_v0 = vld [vmem:[#allocation2 + $0x15a] sm:$0xff] }
  0x55   : > { %711 = vrot.lane.b32.xlu1 %v3574_v11, %s4000_s22  ;;  %v3589_v11 = vpack.c.bf16 %v804_v8, %v804_v8 }
  0x56   : > { %717 = vrot.lane.b32.xlu0 %v3577_v12, %s4000_s22  ;;  %v803_v12 = vld [vmem:[#allocation2 + $0xa] sm:$0xff] }
  0x57   : > { %v3588_v15 = vpack.c.bf16 %v803_v12, %v803_v12 }
  0x59   : > { %715 = vrot.lane.b32.xlu1 %v3576_v22, %s4000_s22  ;;  %v808_v22 = vld [vmem:[#allocation2 + $0x4a] sm:$0xff] }
  0x5a   : > { %721 = vrot.lane.b32.xlu0 %v3579_v23, %s4000_s22  ;;  %v4335_v23 = vpack.c.bf16 %v805_v19, %v805_v19  ;;  %v3593_v25 = vpack.c.bf16 %v808_v22, %v808_v22 }
  0x5d   : > { %719 = vrot.lane.b32.xlu1 %v3578_v33, %s4000_s22  ;;  %v3595_v33 = vpack.c.bf16 %v810_v28, %v810_v28 }
  0x5e   : > { %725 = vrot.lane.b32.xlu0 %v3581_v34, %s4000_s22  ;;  %v809_v34 = vld [vmem:[#allocation2 + $0x52] sm:$0xff] }
  0x5f   : > { %v3594_v40 = vpack.c.bf16 %v809_v34, %v809_v34  ;;  %v828_v34 = vld [vmem:[#allocation2 + $0x13a] sm:$0xff] }
  0x61   : > { %723 = vrot.lane.b32.xlu1 %v3580_v51, %s4000_s22  ;;  %v3596_v51 = vpack.c.bf16 %v811_v46, %v811_v46  ;;  %v830_v46 = vld [vmem:[#allocation2 + $0x152] sm:$0xff] }
  0x62   : > { %729 = vrot.lane.b32.xlu0 %v3583_v52, %s4000_s22  ;;  %v3599_v52 = vpack.c.bf16 %v814_v50, %v814_v50 }
  0x65   : > { %727 = vrot.lane.b32.xlu1 %v3582_v61, %s4000_s22  ;;  %v3601_v61 = vpack.c.bf16 %v816_v58, %v816_v58  ;;  %v832_v58 = vld [vmem:[#allocation2 + $0x16a] sm:$0xff] }
  0x66   : > { %733 = vrot.lane.b32.xlu0 %v3585_v63, %s4000_s22  ;;  %v815_v63 = vld [vmem:[#allocation2 + $0x9a] sm:$0xff] }
  0x67   : > { %v3600_v2 = vpack.c.bf16 %v815_v63, %v815_v63  ;;  %v3617_v63 = vpack.c.bf16 %v832_v58, %v832_v58 }
  0x69   : > { %731 = vrot.lane.b32.xlu1 %v3584_v4, %s4000_s22  ;;  %v817_v4 = vld [vmem:[#allocation2 + $0xb2] sm:$0xff] }
  0x6a   : > { %930 = vrot.lane.b32.xlu0 %v3587_v5, %s4001_s23  ;;  %v820_v5 = vld [vmem:[#allocation2 + $0xda] sm:$0xff]  ;;  %v3602_v7 = vpack.c.bf16 %v817_v4, %v817_v4  ;;  %v3616_v4 = vpack.c.bf16 %v831_v0, %v831_v0 }
  0x6b   : > { %v4350_v8 = vpack.c.bf16 %v820_v5, %v820_v5  ;;  %v833_v5 = vld [vmem:[#allocation2 + $0x172] sm:$0xff] }
  0x6d   : > { %735 = vrot.lane.b32.xlu1 %v3586_v10, %s4000_s22  ;;  %v819_v10 = vld [vmem:[#allocation2 + $0xca] sm:$0xff] }
  0x6e   : > { %934 = vrot.lane.b32.xlu0 %v3589_v11, %s4001_s23  ;;  %v822_v11 = vld [vmem:[#allocation2 + $0xf2] sm:$0xff]  ;;  %v3604_v12 = vpack.c.bf16 %v819_v10, %v819_v10 }
  0x6f   : > { %v4355_v13 = vpack.c.bf16 %v822_v11, %v822_v11  ;;  %v3618_v11 = vpack.c.bf16 %v833_v5, %v833_v5 }
  0x71   : > { %932 = vrot.lane.b32.xlu1 %v3588_v15, %s4001_s23  ;;  %v821_v15 = vld [vmem:[#allocation2 + $0xe2] sm:$0xff] }
  0x72   : > { %938 = vrot.lane.b32.xlu0 %v3591_v16, %s4001_s23  ;;  %v824_v16 = vld [vmem:[#allocation2 + $0x10a] sm:$0xff]  ;;  %v4360_v19 = vpack.c.bf16 %v821_v15, %v821_v15 }
  0x73   : > { %v3609_v22 = vpack.c.bf16 %v824_v16, %v824_v16 }
  0x75   : > { %936 = vrot.lane.b32.xlu1 %v4335_v23, %s4001_s23 }
  0x76   : > { %942 = vrot.lane.b32.xlu0 %v3593_v25, %s4001_s23  ;;  %v823_v25 = vld [vmem:[#allocation2 + $0xfa] sm:$0xff] }
  0x77   : > { %v4365_v28 = vpack.c.bf16 %v823_v25, %v823_v25 }
  0x79   : > { %940 = vrot.lane.b32.xlu1 %v3592_v32, %s4001_s23  ;;  %v3611_v32 = vpack.c.bf16 %v826_v27, %v826_v27 }
  0x7a   : > { %946 = vrot.lane.b32.xlu0 %v3595_v33, %s4001_s23  ;;  %v825_v33 = vld [vmem:[#allocation2 + $0x112] sm:$0xff] }
  0x7b   : > { %v3610_v38 = vpack.c.bf16 %v825_v33, %v825_v33 }
  0x7d   : > { %944 = vrot.lane.b32.xlu1 %v3594_v40, %s4001_s23  ;;  %v3613_v40 = vpack.c.bf16 %v828_v34, %v828_v34 }
  0x7e   : > { %950 = vrot.lane.b32.xlu0 %v3597_v44, %s4001_s23  ;;  %v827_v44 = vld [vmem:[#allocation2 + $0x12a] sm:$0xff] }
  0x81   : > { %948 = vrot.lane.b32.xlu1 %v3596_v51, %s4001_s23  ;;  %v3612_v51 = vpack.c.bf16 %v827_v44, %v827_v44 }
  0x82   : > { %954 = vrot.lane.b32.xlu0 %v3599_v52, %s4001_s23  ;;  %v3615_v52 = vpack.c.bf16 %v830_v46, %v830_v46  ;;  %v1089_v46 = vld [vmem:[#allocation2 + $0x180] sm:$0xff] }
  0x85   : > { %952 = vrot.lane.b32.xlu1 %v3598_v59, %s4001_s23 }
  0x86   : > { %958 = vrot.lane.b32.xlu0 %v3601_v61, %s4001_s23  ;;  %v3614_v61 = vpack.c.bf16 %v829_v57, %v829_v57  ;;  %v1316_v57 = vld [vmem:[#allocation2 + $0x19] sm:$0xff] }
  0x88   : > { %v674_v50 = vpop.permute.xlu0 %673 }
  0x89   : > { %956 = vrot.lane.b32.xlu1 %v3600_v2, %s4001_s23  ;;  %770 = vst.msk [vmem:[#allocation3] sm:$0xf] %vm769_vm3, %v674_v50 }
  0x8a   : > { %962 = vrot.lane.b32.xlu0 %v3603_v3, %s4001_s23 }
  0x8d   : > { %960 = vrot.lane.b32.xlu1 %v3602_v7, %s4001_s23 }
  0x8e   : > { %966 = vrot.lane.b32.xlu0 %v4350_v8, %s4001_s23 }
  0x91   : > { %964 = vrot.lane.b32.xlu1 %v3604_v12, %s4001_s23 }
  0x92   : > { %970 = vrot.lane.b32.xlu0 %v4355_v13, %s4001_s23 }
  0x95   : > { %968 = vrot.lane.b32.xlu1 %v4360_v19, %s4001_s23 }
  0x96   : > { %974 = vrot.lane.b32.xlu0 %v3609_v22, %s4001_s23 }
  0x99   : > { %972 = vrot.lane.b32.xlu1 %v4365_v28, %s4001_s23 }
  0x9a   : > { %978 = vrot.lane.b32.xlu0 %v3611_v32, %s4001_s23  ;;  %v676_v59 = vpop.permute.xlu0 %675 }
  0x9b   : > { %771 = vst.msk [vmem:[#allocation3 + $0x4] sm:$0xf] %vm769_vm3, %v676_v59 }
  0x9d   : > { %976 = vrot.lane.b32.xlu1 %v3610_v38, %s4001_s23 }
  0x9e   : > { %982 = vrot.lane.b32.xlu0 %v3613_v40, %s4001_s23 }
  0xa1   : > { %980 = vrot.lane.b32.xlu1 %v3612_v51, %s4001_s23 }
  0xa2   : > { %986 = vrot.lane.b32.xlu0 %v3615_v52, %s4001_s23  ;;  %v3649_v52 = vpack.c.bf16 %v1089_v46, %v1089_v46 }
  0xa3   : > { %v678_v2 = vpop.permute.xlu1 %677 }
  0xa4   : > { %v682_v3 = vpop.permute.xlu0 %681  ;;  %772 = vst.msk [vmem:[#allocation3 + $0x8] sm:$0xf] %vm769_vm3, %v678_v2 }
  0xa5   : > { %774 = vst.msk [vmem:[#allocation3 + $0x10] sm:$0xf] %vm769_vm3, %v682_v3  ;;  %984 = vrot.lane.b32.xlu1 %v3614_v61, %s4001_s23  ;;  %v1090_v61 = vld [vmem:[#allocation2 + $0x188] sm:$0xff] }
  0xa6   : > { %990 = vrot.lane.b32.xlu0 %v3617_v63, %s4001_s23  ;;  %v1318_v63 = vld [vmem:[#allocation2 + $0x31] sm:$0xff] }
  0xa7   : > { %v680_v7 = vpop.permute.xlu1 %679  ;;  %v4478_v3 = vpack.c.bf16 %v1318_v63, %v1318_v63  ;;  %v1331_v63 = vld [vmem:[#allocation2 + $0xc9] sm:$0xff] }
  0xa8   : > { %v686_v10 = vpop.permute.xlu0 %685  ;;  %773 = vst.msk [vmem:[#allocation3 + $0xc] sm:$0xf] %vm769_vm3, %v680_v7 }
  0xa9   : > { %776 = vst.msk [vmem:[#allocation3 + $0x18] sm:$0xf] %vm769_vm3, %v686_v10  ;;  %988 = vrot.lane.b32.xlu1 %v3616_v4, %s4001_s23  ;;  %v1320_v4 = vld [vmem:[#allocation2 + $0x49] sm:$0xff] }
  0xaa   : > { %1187 = vrot.lane.b32.xlu0 %v4178_v17, %s4002_s24  ;;  %v4485_v10 = vpack.c.bf16 %v1320_v4, %v1320_v4 }
  0xab   : > { %v684_v12 = vpop.permute.xlu1 %683 }
  0xac   : > { %v690_v15 = vpop.permute.xlu0 %689  ;;  %775 = vst.msk [vmem:[#allocation3 + $0x14] sm:$0xf] %vm769_vm3, %v684_v12  ;;  %v1322_v12 = vld [vmem:[#allocation2 + $0x61] sm:$0xff] }
  0xad   : > { %778 = vst.msk [vmem:[#allocation3 + $0x20] sm:$0xf] %vm769_vm3, %v690_v15  ;;  %992 = vrot.lane.b32.xlu1 %v3618_v11, %s4001_s23  ;;  %v1319_v11 = vld [vmem:[#allocation2 + $0x39] sm:$0xff] }
  0xae   : > { %1191 = vrot.lane.b32.xlu0 %v4180_v20, %s4002_s24 }
  0xaf   : > { %v688_v16 = vpop.permute.xlu1 %687 }
  0xb0   : > { %v694_v22 = vpop.permute.xlu0 %693  ;;  %777 = vst.msk [vmem:[#allocation3 + $0x1c] sm:$0xf] %vm769_vm3, %v688_v16 }
  0xb1   : > { %780 = vst.msk [vmem:[#allocation3 + $0x28] sm:$0xf] %vm769_vm3, %v694_v22  ;;  %1189 = vrot.lane.b32.xlu1 %v4182_v21, %s4002_s24  ;;  %v4492_v22 = vpack.c.bf16 %v1319_v11, %v1319_v11 }
  0xb2   : > { %1195 = vrot.lane.b32.xlu0 %v4188_v24, %s4002_s24 }
  0xb3   : > { %v692_v17 = vpop.permute.xlu1 %691 }
  0xb4   : > { %v698_v25 = vpop.permute.xlu0 %697  ;;  %779 = vst.msk [vmem:[#allocation3 + $0x24] sm:$0xf] %vm769_vm3, %v692_v17  ;;  %v4494_v17 = vpack.c.bf16 %v1322_v12, %v1322_v12 }
  0xb5   : > { %782 = vst.msk [vmem:[#allocation3 + $0x30] sm:$0xf] %vm769_vm3, %v698_v25  ;;  %1193 = vrot.lane.b32.xlu1 %v4198_v30, %s4002_s24  ;;  %v1321_v25 = vld [vmem:[#allocation2 + $0x51] sm:$0xff] }
  0xb6   : > { %1199 = vrot.lane.b32.xlu0 %v4200_v31, %s4002_s24 }
  0xb7   : > { %v696_v27 = vpop.permute.xlu1 %695 }
  0xb8   : > { %v702_v32 = vpop.permute.xlu0 %701  ;;  %781 = vst.msk [vmem:[#allocation3 + $0x2c] sm:$0xf] %vm769_vm3, %v696_v27  ;;  %v1324_v27 = vld [vmem:[#allocation2 + $0x79] sm:$0xff] }
  0xb9   : > { %784 = vst.msk [vmem:[#allocation3 + $0x38] sm:$0xf] %vm769_vm3, %v702_v32  ;;  %1197 = vrot.lane.b32.xlu1 %v4206_v35, %s4002_s24 }
  0xba   : > { %1203 = vrot.lane.b32.xlu0 %v4208_v36, %s4002_s24 }
  0xbb   : > { %v700_v21 = vpop.permute.xlu1 %699 }
  0xbc   : > { %v706_v33 = vpop.permute.xlu0 %705  ;;  %783 = vst.msk [vmem:[#allocation3 + $0x34] sm:$0xf] %vm769_vm3, %v700_v21 }
  0xbd   : > { %786 = vst.msk [vmem:[#allocation3 + $0x40] sm:$0xf] %vm769_vm3, %v706_v33  ;;  %1201 = vrot.lane.b32.xlu1 %v4210_v37, %s4002_s24  ;;  %v4502_v33 = vpack.c.bf16 %v1321_v25, %v1321_v25  ;;  %v1338_v25 = vld [vmem:[#allocation2 + $0x121] sm:$0xff] }
  0xbe   : > { %1207 = vrot.lane.b32.xlu0 %v4216_v41, %s4002_s24 }
  0xbf   : > { %v704_v31 = vpop.permute.xlu1 %703 }
  0xc0   : > { %v710_v34 = vpop.permute.xlu0 %709  ;;  %785 = vst.msk [vmem:[#allocation3 + $0x3c] sm:$0xf] %vm769_vm3, %v704_v31  ;;  %v4504_v31 = vpack.c.bf16 %v1324_v27, %v1324_v27 }
  0xc1   : > { %788 = vst.msk [vmem:[#allocation3 + $0x48] sm:$0xf] %vm769_vm3, %v710_v34  ;;  %1205 = vrot.lane.b32.xlu1 %v4218_v42, %s4002_s24  ;;  %v1323_v34 = vld [vmem:[#allocation2 + $0x69] sm:$0xff] }
  0xc2   : > { %1211 = vrot.lane.b32.xlu0 %v4220_v43, %s4002_s24 }
  0xc3   : > { %v708_v36 = vpop.permute.xlu1 %707 }
  0xc4   : > { %v714_v38 = vpop.permute.xlu0 %713  ;;  %787 = vst.msk [vmem:[#allocation3 + $0x44] sm:$0xf] %vm769_vm3, %v708_v36  ;;  %v1326_v36 = vld [vmem:[#allocation2 + $0x91] sm:$0xff] }
  0xc5   : > { %790 = vst.msk [vmem:[#allocation3 + $0x50] sm:$0xf] %vm769_vm3, %v714_v38  ;;  %1209 = vrot.lane.b32.xlu1 %v4228_v47, %s4002_s24 }
  0xc6   : > { %1215 = vrot.lane.b32.xlu0 %v4230_v48, %s4002_s24 }
  0xc7   : > { %v712_v37 = vpop.permute.xlu1 %711 }
  0xc8   : > { %v718_v41 = vpop.permute.xlu0 %717  ;;  %789 = vst.msk [vmem:[#allocation3 + $0x4c] sm:$0xf] %vm769_vm3, %v712_v37 }
  0xc9   : > { %792 = vst.msk [vmem:[#allocation3 + $0x58] sm:$0xf] %vm769_vm3, %v718_v41  ;;  %1213 = vrot.lane.b32.xlu1 %v4232_v49, %s4002_s24  ;;  %v4512_v41 = vpack.c.bf16 %v1323_v34, %v1323_v34  ;;  %v4556_v34 = vpack.c.bf16 %v1338_v25, %v1338_v25 }
  0xca   : > { %1219 = vrot.lane.b32.xlu0 %v4242_v54, %s4002_s24 }
  0xcb   : > { %v716_v42 = vpop.permute.xlu1 %715 }
  0xcc   : > { %v722_v43 = vpop.permute.xlu0 %721  ;;  %791 = vst.msk [vmem:[#allocation3 + $0x54] sm:$0xf] %vm769_vm3, %v716_v42  ;;  %v4514_v42 = vpack.c.bf16 %v1326_v36, %v1326_v36  ;;  %v1337_v36 = vld [vmem:[#allocation2 + $0x111] sm:$0xff] }
  0xcd   : > { %794 = vst.msk [vmem:[#allocation3 + $0x60] sm:$0xf] %vm769_vm3, %v722_v43  ;;  %1217 = vrot.lane.b32.xlu1 %v4244_v55, %s4002_s24  ;;  %v1325_v43 = vld [vmem:[#allocation2 + $0x81] sm:$0xff] }
  0xce   : > { %1223 = vrot.lane.b32.xlu0 %v4246_v56, %s4002_s24 }
  0xcf   : > { %v720_v47 = vpop.permute.xlu1 %719 }
  0xd0   : > { %v726_v48 = vpop.permute.xlu0 %725  ;;  %793 = vst.msk [vmem:[#allocation3 + $0x5c] sm:$0xf] %vm769_vm3, %v720_v47  ;;  %v1328_v47 = vld [vmem:[#allocation2 + $0xa9] sm:$0xff] }
  0xd1   : > { %796 = vst.msk [vmem:[#allocation3 + $0x68] sm:$0xf] %vm769_vm3, %v726_v48  ;;  %1221 = vrot.lane.b32.xlu1 %v4258_v60, %s4002_s24 }
  0xd2   : > { %1227 = vrot.lane.b32.xlu0 %v4268_v1, %s4002_s24 }
  0xd3   : > { %v724_v49 = vpop.permute.xlu1 %723 }
  0xd4   : > { %v730_v54 = vpop.permute.xlu0 %729  ;;  %795 = vst.msk [vmem:[#allocation3 + $0x64] sm:$0xf] %vm769_vm3, %v724_v49 }
  0xd5   : > { %798 = vst.msk [vmem:[#allocation3 + $0x70] sm:$0xf] %vm769_vm3, %v730_v54  ;;  %1225 = vrot.lane.b32.xlu1 %v4260_v62, %s4002_s24  ;;  %v4522_v54 = vpack.c.bf16 %v1325_v43, %v1325_v43 }
  0xd6   : > { %1231 = vrot.lane.b32.xlu0 %v4280_v9, %s4002_s24 }
  0xd7   : > { %v728_v55 = vpop.permute.xlu1 %727 }
  0xd8   : > { %v734_v40 = vpop.permute.xlu0 %733  ;;  %797 = vst.msk [vmem:[#allocation3 + $0x6c] sm:$0xf] %vm769_vm3, %v728_v55  ;;  %v3663_v55 = vpack.c.bf16 %v1328_v47, %v1328_v47  ;;  %v4564_v47 = vpack.c.bf16 %v1337_v36, %v1337_v36  ;;  %v3973_v36 = vld [vmem:[%s5124_s1 + $0x8] sm:$0xff]  }
  0xd9   : > { %800 = vst.msk [vmem:[#allocation3 + $0x78] sm:$0xf] %vm769_vm3, %v734_v40  ;;  %1229 = vrot.lane.b32.xlu1 %v4278_v6, %s4002_s24  ;;  %v1327_v40 = vld [vmem:[#allocation2 + $0x99] sm:$0xff] }
  0xda   : > { %1235 = vrot.lane.b32.xlu0 %v4290_v18, %s4002_s24 }
  0xdb   : > { %v732_v60 = vpop.permute.xlu1 %731 }
  0xdc   : > { %v931_v44 = vpop.permute.xlu0 %930  ;;  %799 = vst.msk [vmem:[#allocation3 + $0x74] sm:$0xf] %vm769_vm3, %v732_v60  ;;  %v1330_v60 = vld [vmem:[#allocation2 + $0xc1] sm:$0xff] }
  0xdd   : > { %1027 = vst.msk [vmem:[#allocation3] sm:$0xf] %vm1026_vm4, %v931_v44  ;;  %1233 = vrot.lane.b32.xlu1 %v4288_v14, %s4002_s24 }
  0xde   : > { %1239 = vrot.lane.b32.xlu0 %v4300_v29, %s4002_s24  ;;  %v3651_v29 = vpack.c.bf16 %v1316_v57, %v1316_v57  ;;  %v1332_v57 = vld [vmem:[#allocation2 + $0xd9] sm:$0xff] }
  0xdf   : > { %v736_v50 = vpop.permute.xlu1 %735 }
  0xe0   : > { %v935_v51 = vpop.permute.xlu0 %934  ;;  %801 = vst.msk [vmem:[#allocation3 + $0x7c] sm:$0xf] %vm769_vm3, %v736_v50  ;;  %v4529_v50 = vpack.c.bf16 %v1327_v40, %v1327_v40 }
  0xe1   : > { %1029 = vst.msk [vmem:[#allocation3 + $0x8] sm:$0xf] %vm1026_vm4, %v935_v51  ;;  %1237 = vrot.lane.b32.xlu1 %v4298_v26, %s4002_s24  ;;  %v3665_v51 = vpack.c.bf16 %v1330_v60, %v1330_v60 }
  0xe2   : > { %1243 = vrot.lane.b32.xlu0 %v4310_v45, %s4002_s24  ;;  %v3650_v45 = vpack.c.bf16 %v1090_v61, %v1090_v61  ;;  %v3667_v61 = vpack.c.bf16 %v1332_v57, %v1332_v57 }
  0xe3   : > { %v933_v58 = vpop.permute.xlu1 %932 }
  0xe4   : > { %v939_v59 = vpop.permute.xlu0 %938  ;;  %1028 = vst.msk [vmem:[#allocation3 + $0x4] sm:$0xf] %vm1026_vm4, %v933_v58 }
  0xe5   : > { %1031 = vst.msk [vmem:[#allocation3 + $0x10] sm:$0xf] %vm1026_vm4, %v939_v59  ;;  %1241 = vrot.lane.b32.xlu1 %v4308_v39, %s4002_s24  ;;  %v1317_v39 = vld [vmem:[#allocation2 + $0x21] sm:$0xff] }
  0xe6   : > { %1247 = vrot.lane.b32.xlu0 %v3649_v52, %s4002_s24  ;;  %v1329_v52 = vld [vmem:[#allocation2 + $0xb1] sm:$0xff] }
  0xe7   : > { %v937_v0 = vpop.permute.xlu1 %936 }
  0xe8   : > { %v943_v2 = vpop.permute.xlu0 %942  ;;  %1030 = vst.msk [vmem:[#allocation3 + $0xc] sm:$0xf] %vm1026_vm4, %v937_v0  ;;  %v1334_v0 = vld [vmem:[#allocation2 + $0xf1] sm:$0xff] }
  0xe9   : > { %1033 = vst.msk [vmem:[#allocation3 + $0x18] sm:$0xf] %vm1026_vm4, %v943_v2  ;;  %1245 = vrot.lane.b32.xlu1 %v4319_v53, %s4002_s24  ;;  %v3652_v53 = vpack.c.bf16 %v1317_v39, %v1317_v39  ;;  %v3666_v39 = vpack.c.bf16 %v1331_v63, %v1331_v63  ;;  %v4540_v4 = vpack.c.bf16 %v1334_v0, %v1334_v0  ;;  %v1576_v0 = vld [vmem:[#allocation2 + $0x3a] sm:$0xff] }
  0xea   : > { %1444 = vrot.lane.b32.xlu0 %v3651_v29, %s4003_s25  ;;  %v3664_v29 = vpack.c.bf16 %v1329_v52, %v1329_v52 }
  0xeb   : > { %v941_v5 = vpop.permute.xlu1 %940 }
  0xec   : > { %v947_v7 = vpop.permute.xlu0 %946  ;;  %1032 = vst.msk [vmem:[#allocation3 + $0x14] sm:$0xf] %vm1026_vm4, %v941_v5  ;;  %v1333_v5 = vld [vmem:[#allocation2 + $0xe1] sm:$0xff] }
  0xed   : > { %1035 = vst.msk [vmem:[#allocation3 + $0x20] sm:$0xf] %vm1026_vm4, %v947_v7  ;;  %1249 = vrot.lane.b32.xlu1 %v3650_v45, %s4002_s24  ;;  %v1336_v7 = vld [vmem:[#allocation2 + $0x109] sm:$0xff]  ;;  %v3668_v12 = vpack.c.bf16 %v1333_v5, %v1333_v5  ;;  %v1575_v5 = vld [vmem:[#allocation2 + $0x32] sm:$0xff] }
  0xee   : > { %1448 = vrot.lane.b32.xlu0 %v4478_v3, %s4003_s25 }
  0xef   : > { %v945_v15 = vpop.permute.xlu1 %944 }
  0xf0   : > { %v951_v16 = vpop.permute.xlu0 %950  ;;  %1034 = vst.msk [vmem:[#allocation3 + $0x1c] sm:$0xf] %vm1026_vm4, %v945_v15  ;;  %v4547_v15 = vpack.c.bf16 %v1336_v7, %v1336_v7 }
  0xf1   : > { %1037 = vst.msk [vmem:[#allocation3 + $0x28] sm:$0xf] %vm1026_vm4, %v951_v16  ;;  %1446 = vrot.lane.b32.xlu1 %v3652_v53, %s4003_s25  ;;  %v1335_v16 = vld [vmem:[#allocation2 + $0xf9] sm:$0xff] }
  0xf2   : > { %1452 = vrot.lane.b32.xlu0 %v4485_v10, %s4003_s25 }
  0xf3   : > { %v949_v32 = vpop.permute.xlu1 %948 }
  0xf4   : > { %v955_v21 = vpop.permute.xlu0 %954  ;;  %1036 = vst.msk [vmem:[#allocation3 + $0x24] sm:$0xf] %vm1026_vm4, %v949_v32 }
  0xf5   : > { %1039 = vst.msk [vmem:[#allocation3 + $0x30] sm:$0xf] %vm1026_vm4, %v955_v21  ;;  %1450 = vrot.lane.b32.xlu1 %v4492_v22, %s4003_s25  ;;  %v4554_v21 = vpack.c.bf16 %v1335_v16, %v1335_v16 }
  0xf6   : > { %1456 = vrot.lane.b32.xlu0 %v4494_v17, %s4003_s25 }
  0xf7   : > { %v953_v38 = vpop.permute.xlu1 %952 }
  0xf8   : > { %v959_v37 = vpop.permute.xlu0 %958  ;;  %1038 = vst.msk [vmem:[#allocation3 + $0x2c] sm:$0xf] %vm1026_vm4, %v953_v38  ;;  %v1340_v38 = vld [vmem:[#allocation2 + $0x139] sm:$0xff] }
  0xf9   : > { %1041 = vst.msk [vmem:[#allocation3 + $0x38] sm:$0xf] %vm1026_vm4, %v959_v37  ;;  %1454 = vrot.lane.b32.xlu1 %v4502_v33, %s4003_s25 }
  0xfa   : > { %1460 = vrot.lane.b32.xlu0 %v4504_v31, %s4003_s25 }
  0xfb   : > { %v957_v48 = vpop.permute.xlu1 %956 }
  0xfc   : > { %v963_v49 = vpop.permute.xlu0 %962  ;;  %1040 = vst.msk [vmem:[#allocation3 + $0x34] sm:$0xf] %vm1026_vm4, %v957_v48  ;;  %v4566_v48 = vpack.c.bf16 %v1340_v38, %v1340_v38  ;;  %v2361_v38 = vld [vmem:[#allocation2 + $0xf2] sm:$0xff] }
  0xfd   : > { %1043 = vst.msk [vmem:[#allocation3 + $0x40] sm:$0xf] %vm1026_vm4, %v963_v49  ;;  %1458 = vrot.lane.b32.xlu1 %v4512_v41, %s4003_s25  ;;  %v1339_v49 = vld [vmem:[#allocation2 + $0x129] sm:$0xff] }
  0xfe   : > { %1464 = vrot.lane.b32.xlu0 %v4514_v42, %s4003_s25 }
  0xff   : > { %v961_v44 = vpop.permute.xlu1 %960 }
 0x100   : > { %v967_v46 = vpop.permute.xlu0 %966  ;;  %1042 = vst.msk [vmem:[#allocation3 + $0x3c] sm:$0xf] %vm1026_vm4, %v961_v44  ;;  %v4574_v44 = vpack.c.bf16 %v1339_v49, %v1339_v49  ;;  %v3975_v49 = vld [vmem:[%s5124_s1] sm:$0xff]  }
 0x101   : > { %1045 = vst.msk [vmem:[#allocation3 + $0x48] sm:$0xf] %vm1026_vm4, %v967_v46  ;;  %1462 = vrot.lane.b32.xlu1 %v4522_v54, %s4003_s25 }
 0x102   : > { %1468 = vrot.lane.b32.xlu0 %v3663_v55, %s4003_s25  ;;  %v1342_v55 = vld [vmem:[#allocation2 + $0x151] sm:$0xff] }
 0x103   : > { %v965_v58 = vpop.permute.xlu1 %964  ;;  %v4576_v46 = vpack.c.bf16 %v1342_v55, %v1342_v55 }
 0x104   : > { %v971_v59 = vpop.permute.xlu0 %970  ;;  %1044 = vst.msk [vmem:[#allocation3 + $0x44] sm:$0xf] %vm1026_vm4, %v965_v58 }
 0x105   : > { %1047 = vst.msk [vmem:[#allocation3 + $0x50] sm:$0xf] %vm1026_vm4, %v971_v59  ;;  %1466 = vrot.lane.b32.xlu1 %v4529_v50, %s4003_s25  ;;  %v1573_v59 = vld [vmem:[#allocation2 + $0x1a] sm:$0xff] }
 0x106   : > { %1472 = vrot.lane.b32.xlu0 %v3665_v51, %s4003_s25  ;;  %v1341_v51 = vld [vmem:[#allocation2 + $0x141] sm:$0xff]  ;;  %v3683_v63 = vpack.c.bf16 %v1573_v59, %v1573_v59 }
 0x107   : > { %v969_v2 = vpop.permute.xlu1 %968  ;;  %v4584_v58 = vpack.c.bf16 %v1341_v51, %v1341_v51 }
 0x108   : > { %v975_v45 = vpop.permute.xlu0 %974  ;;  %1046 = vst.msk [vmem:[#allocation3 + $0x4c] sm:$0xf] %vm1026_vm4, %v969_v2 }
 0x109   : > { %1049 = vst.msk [vmem:[#allocation3 + $0x58] sm:$0xf] %vm1026_vm4, %v975_v45  ;;  %1470 = vrot.lane.b32.xlu1 %v3664_v29, %s4003_s25 }
 0x10a   : > { %1476 = vrot.lane.b32.xlu0 %v3667_v61, %s4003_s25 }
 0x10b   : > { %v973_v53 = vpop.permute.xlu1 %972 }
 0x10c   : > { %v979_v11 = vpop.permute.xlu0 %978  ;;  %1048 = vst.msk [vmem:[#allocation3 + $0x54] sm:$0xf] %vm1026_vm4, %v973_v53 }
 0x10d   : > { %1051 = vst.msk [vmem:[#allocation3 + $0x60] sm:$0xf] %vm1026_vm4, %v979_v11  ;;  %1474 = vrot.lane.b32.xlu1 %v3666_v39, %s4003_s25  ;;  %v4597_v39 = vpack.c.bf16 %v1576_v0, %v1576_v0 }
 0x10e   : > { %1480 = vrot.lane.b32.xlu0 %v4540_v4, %s4003_s25 }
 0x10f   : > { %v977_v27 = vpop.permute.xlu1 %976 }
 0x110   : > { %v983_v32 = vpop.permute.xlu0 %982  ;;  %1050 = vst.msk [vmem:[#allocation3 + $0x5c] sm:$0xf] %vm1026_vm4, %v977_v27 }
 0x111   : > { %1053 = vst.msk [vmem:[#allocation3 + $0x68] sm:$0xf] %vm1026_vm4, %v983_v32  ;;  %1478 = vrot.lane.b32.xlu1 %v3668_v12, %s4003_s25  ;;  %v2362_v32 = vld [vmem:[#allocation2 + $0xfa] sm:$0xff] }
 0x112   : > { %1484 = vrot.lane.b32.xlu0 %v4547_v15, %s4003_s25 }
 0x113   : > { %v981_v37 = vpop.permute.xlu1 %980 }
 0x114   : > { %v987_v43 = vpop.permute.xlu0 %986  ;;  %1052 = vst.msk [vmem:[#allocation3 + $0x64] sm:$0xf] %vm1026_vm4, %v981_v37  ;;  %v2348_v37 = vld [vmem:[#allocation2 + $0x52] sm:$0xff] }
 0x115   : > { %1055 = vst.msk [vmem:[#allocation3 + $0x70] sm:$0xf] %vm1026_vm4, %v987_v43  ;;  %1482 = vrot.lane.b32.xlu1 %v4554_v21, %s4003_s25  ;;  %v3782_v55 = vpack.c.bf16 %v2348_v37, %v2348_v37 }
 0x116   : > { %1488 = vrot.lane.b32.xlu0 %v4556_v34, %s4003_s25 }
 0x117   : > { %v985_v40 = vpop.permute.xlu1 %984 }
 0x118   : > { %v991_v60 = vpop.permute.xlu0 %990  ;;  %1054 = vst.msk [vmem:[#allocation3 + $0x6c] sm:$0xf] %vm1026_vm4, %v985_v40  ;;  %v2347_v40 = vld [vmem:[#allocation2 + $0x4a] sm:$0xff] }
 0x119   : > { %1057 = vst.msk [vmem:[#allocation3 + $0x78] sm:$0xf] %vm1026_vm4, %v991_v60  ;;  %1486 = vrot.lane.b32.xlu1 %v4564_v47, %s4003_s25  ;;  %v2364_v60 = vld [vmem:[#allocation2 + $0x112] sm:$0xff] }
 0x11a   : > { %1492 = vrot.lane.b32.xlu0 %v4566_v48, %s4003_s25  ;;  %v3798_v59 = vpack.c.bf16 %v2364_v60, %v2364_v60  ;;  %v2367_v60 = vld [vmem:[#allocation2 + $0x13a] sm:$0xff] }
 0x11b   : > { %v989_v52 = vpop.permute.xlu1 %988 }
 0x11c   : > { %v1188_v57 = vpop.permute.xlu0 %1187  ;;  %1056 = vst.msk [vmem:[#allocation3 + $0x74] sm:$0xf] %vm1026_vm4, %v989_v52 }
 0x11d   : > { %1284 = vst.msk [vmem:[#allocation3] sm:$0xf] %vm1283_vm5, %v1188_v57  ;;  %1490 = vrot.lane.b32.xlu1 %v4574_v44, %s4003_s25  ;;  %v3781_v57 = vpack.c.bf16 %v2347_v40, %v2347_v40 }
 0x11e   : > { %1496 = vrot.lane.b32.xlu0 %v4576_v46, %s4003_s25 }
 0x11f   : > { %v993_v29 = vpop.permute.xlu1 %992 }
 0x120   : > { %v1192_v61 = vpop.permute.xlu0 %1191  ;;  %1058 = vst.msk [vmem:[#allocation3 + $0x7c] sm:$0xf] %vm1026_vm4, %v993_v29  ;;  %v2363_v29 = vld [vmem:[#allocation2 + $0x10a] sm:$0xff] }
 0x121   : > { %1286 = vst.msk [vmem:[#allocation3 + $0x8] sm:$0xf] %vm1283_vm5, %v1192_v61  ;;  %1494 = vrot.lane.b32.xlu1 %v4584_v58, %s4003_s25  ;;  %v3797_v0 = vpack.c.bf16 %v2363_v29, %v2363_v29 }
 0x122   : > { %1703 = vrot.lane.b32.xlu0 %v4335_v23, %s4004_s26  ;;  %v4605_v23 = vpack.c.bf16 %v1575_v5, %v1575_v5 }
 0x123   : > { %v1190_v2 = vpop.permute.xlu1 %1189 }
 0x124   : > { %v1196_v45 = vpop.permute.xlu0 %1195  ;;  %1285 = vst.msk [vmem:[#allocation3 + $0x4] sm:$0xf] %vm1283_vm5, %v1190_v2 }
 0x125   : > { %1288 = vst.msk [vmem:[#allocation3 + $0x10] sm:$0xf] %vm1283_vm5, %v1196_v45  ;;  %1701 = vrot.lane.b32.xlu1 %v3683_v63, %s4004_s26 }
 0x126   : > { %1735 = vrot.lane.b32.xlu0 %v4360_v19, %s4004_s26 }
 0x127   : > { %v1194_v7 = vpop.permute.xlu1 %1193 }
 0x128   : > { %v1200_v53 = vpop.permute.xlu0 %1199  ;;  %1287 = vst.msk [vmem:[#allocation3 + $0xc] sm:$0xf] %vm1283_vm5, %v1194_v7 }
 0x129   : > { %1290 = vst.msk [vmem:[#allocation3 + $0x18] sm:$0xf] %vm1283_vm5, %v1200_v53  ;;  %1733 = vrot.lane.b32.xlu1 %v4350_v8, %s4004_s26 }
 0x12a   : > { %1707 = vrot.lane.b32.xlu0 %v4597_v39, %s4004_s26 }
 0x12b   : > { %v1198_v11 = vpop.permute.xlu1 %1197 }
 0x12c   : > { %v1204_v12 = vpop.permute.xlu0 %1203  ;;  %1289 = vst.msk [vmem:[#allocation3 + $0x14] sm:$0xf] %vm1283_vm5, %v1198_v11  ;;  %v1596_v11 = vld [vmem:[#allocation2 + $0x12a] sm:$0xff] }
 0x12d   : > { %1292 = vst.msk [vmem:[#allocation3 + $0x20] sm:$0xf] %vm1283_vm5, %v1204_v12  ;;  %1705 = vrot.lane.b32.xlu1 %v4605_v23, %s4004_s26 }
 0x12e   : > { %1739 = vrot.lane.b32.xlu0 %v4365_v28, %s4004_s26 }
 0x12f   : > { %v1202_v19 = vpop.permute.xlu1 %1201 }
 0x130   : > { %v1208_v16 = vpop.permute.xlu0 %1207  ;;  %1291 = vst.msk [vmem:[#allocation3 + $0x1c] sm:$0xf] %vm1283_vm5, %v1202_v19 }
 0x131   : > { %1294 = vst.msk [vmem:[#allocation3 + $0x28] sm:$0xf] %vm1283_vm5, %v1208_v16  ;;  %1737 = vrot.lane.b32.xlu1 %v4355_v13, %s4004_s26 }
 0x132   : > { %1961 = vrot.lane.b32.xlu0 %v4198_v30, %s4005_s27 }
 0x133   : > { %v1206_v8 = vpop.permute.xlu1 %1205 }
 0x134   : > { %v1212_v25 = vpop.permute.xlu0 %1211  ;;  %1293 = vst.msk [vmem:[#allocation3 + $0x24] sm:$0xf] %vm1283_vm5, %v1206_v8  ;;  %v4706_v8 = vpack.c.bf16 %v1596_v11, %v1596_v11  ;;  %v1584_v11 = vld [vmem:[#allocation2 + $0x9a] sm:$0xff] }
 0x135   : > { %1296 = vst.msk [vmem:[#allocation3 + $0x30] sm:$0xf] %vm1283_vm5, %v1212_v25  ;;  %1959 = vrot.lane.b32.xlu1 %v4180_v20, %s4005_s27  ;;  %v1595_v25 = vld [vmem:[#allocation2 + $0x122] sm:$0xff] }
 0x136   : > { %1993 = vrot.lane.b32.xlu0 %v4260_v62, %s4005_s27 }
 0x137   : > { %v1210_v28 = vpop.permute.xlu1 %1209 }
 0x138   : > { %v1216_v27 = vpop.permute.xlu0 %1215  ;;  %1295 = vst.msk [vmem:[#allocation3 + $0x2c] sm:$0xf] %vm1283_vm5, %v1210_v28  ;;  %v1836_v28 = vld [vmem:[#allocation2 + $0x68] sm:$0xff] }
 0x139   : > { %1298 = vst.msk [vmem:[#allocation3 + $0x38] sm:$0xf] %vm1283_vm5, %v1216_v27  ;;  %1991 = vrot.lane.b32.xlu1 %v4246_v56, %s4005_s27 }
 0x13a   : > { %1965 = vrot.lane.b32.xlu0 %v4206_v35, %s4005_s27 }
 0x13b   : > { %v1214_v30 = vpop.permute.xlu1 %1213 }
 0x13c   : > { %v1220_v13 = vpop.permute.xlu0 %1219  ;;  %1297 = vst.msk [vmem:[#allocation3 + $0x34] sm:$0xf] %vm1283_vm5, %v1214_v30 }
 0x13d   : > { %1300 = vst.msk [vmem:[#allocation3 + $0x40] sm:$0xf] %vm1283_vm5, %v1220_v13  ;;  %1963 = vrot.lane.b32.xlu1 %v4188_v24, %s4005_s27  ;;  %v4714_v13 = vpack.c.bf16 %v1595_v25, %v1595_v25 }
 0x13e   : > { %1997 = vrot.lane.b32.xlu0 %v4278_v6, %s4005_s27 }
 0x13f   : > { %v1218_v20 = vpop.permute.xlu1 %1217 }
 0x140   : > { %v1224_v62 = vpop.permute.xlu0 %1223  ;;  %1299 = vst.msk [vmem:[#allocation3 + $0x3c] sm:$0xf] %vm1283_vm5, %v1218_v20  ;;  %v3720_v20 = vpack.c.bf16 %v1836_v28, %v1836_v28  ;;  %v1600_v28 = vld [vmem:[#allocation2 + $0x15a] sm:$0xff] }
 0x141   : > { %1302 = vst.msk [vmem:[#allocation3 + $0x48] sm:$0xf] %vm1283_vm5, %v1224_v62  ;;  %1995 = vrot.lane.b32.xlu1 %v4268_v1, %s4005_s27  ;;  %v1835_v62 = vld [vmem:[#allocation2 + $0x60] sm:$0xff] }
 0x142   : > { %2218 = vrot.lane.b32.xlu0 %v4492_v22, %s4006_s28 }
 0x143   : > { %v1222_v35 = vpop.permute.xlu1 %1221 }
 0x144   : > { %v1228_v56 = vpop.permute.xlu0 %1227  ;;  %1301 = vst.msk [vmem:[#allocation3 + $0x44] sm:$0xf] %vm1283_vm5, %v1222_v35 }
 0x145   : > { %1304 = vst.msk [vmem:[#allocation3 + $0x50] sm:$0xf] %vm1283_vm5, %v1228_v56  ;;  %2216 = vrot.lane.b32.xlu1 %v4478_v3, %s4006_s28  ;;  %v3972_v3 = vld [vmem:[%s5124_s1 + $0x10] ss:$0 sps:$4 sm:$0x33]  }
 0x146   : > { %2250 = vrot.lane.b32.xlu0 %v4554_v21, %s4006_s28  ;;  %3953 = vmatprep.subr.msk.bf16.mxu0 %vm2783_vm6, %v3972_v3 }
 0x147   : > { %v1226_v24 = vpop.permute.xlu1 %1225  ;;  %3954 = vmatprep.subr.msk.bf16.mxu1 %vm2783_vm6, %v3972_v3 }
 0x148   : > { %v1232_v6 = vpop.permute.xlu0 %1231  ;;  %1303 = vst.msk [vmem:[#allocation3 + $0x4c] sm:$0xf] %vm1283_vm5, %v1226_v24  ;;  %v3719_v24 = vpack.c.bf16 %v1835_v62, %v1835_v62 }
 0x149   : > { %1306 = vst.msk [vmem:[#allocation3 + $0x58] sm:$0xf] %vm1283_vm5, %v1232_v6  ;;  %2248 = vrot.lane.b32.xlu1 %v4540_v4, %s4006_s28  ;;  %v2785_v4 = vsel %vm2783_vm6, %v3972_v3, 0  ;;  %v1838_v6 = vld [vmem:[#allocation2 + $0x80] sm:$0xff] }
 0x14a   : > { %2222 = vrot.lane.b32.xlu0 %v4502_v33, %s4006_s28  ;;  %3910 = vmatpush3.bf16.msra.mxu0 %v2785_v4  ;;  %v3722_v3 = vpack.c.bf16 %v1838_v6, %v1838_v6 }
 0x14b   : > { %v1230_v1 = vpop.permute.xlu1 %1229  ;;  %3950 = vmatpush3.bf16.msra.mxu1 %v2785_v4  ;;  %3911 = vmatprep.subr.bf16.mxu0 %v3973_v36  ;;  %v1837_v4 = vld [vmem:[#allocation2 + $0x78] sm:$0xff] }
 0x14c   : > { %v1236_v22 = vpop.permute.xlu0 %1235  ;;  %1305 = vst.msk [vmem:[#allocation3 + $0x54] sm:$0xf] %vm1283_vm5, %v1230_v1  ;;  %3948 = vmatprep.subr.bf16.mxu1 %v3973_v36 }
 0x14d   : > { %1308 = vst.msk [vmem:[#allocation3 + $0x60] sm:$0xf] %vm1283_vm5, %v1236_v22  ;;  %2220 = vrot.lane.b32.xlu1 %v4485_v10, %s4006_s28  ;;  %v3796_v10 = vpack.c.bf16 %v2362_v32, %v2362_v32 }
 0x14e   : > { %2254 = vrot.lane.b32.xlu0 %v4564_v47, %s4006_s28  ;;  %3912 = vmatpush3.bf16.msra.mxu0 %v3973_v36 }
 0x14f   : > { %v1234_v33 = vpop.permute.xlu1 %1233  ;;  %3951 = vmatpush3.bf16.msra.mxu1 %v3973_v36  ;;  %3913 = vmatprep.subr.bf16.mxu0 %v3975_v49 }
 0x150   : > { %v1240_v21 = vpop.permute.xlu0 %1239  ;;  %1307 = vst.msk [vmem:[#allocation3 + $0x5c] sm:$0xf] %vm1283_vm5, %v1234_v33  ;;  %3949 = vmatprep.subr.bf16.mxu1 %v3975_v49 }
 0x151   : > { %1310 = vst.msk [vmem:[#allocation3 + $0x68] sm:$0xf] %vm1283_vm5, %v1240_v21  ;;  %2252 = vrot.lane.b32.xlu1 %v4547_v15, %s4006_s28  ;;  %v3795_v15 = vpack.c.bf16 %v2361_v38, %v2361_v38  ;;  %v3721_v21 = vpack.c.bf16 %v1837_v4, %v1837_v4  ;;  %v1857_v4 = vld [vmem:[#allocation2 + $0x168] sm:$0xff] }
 0x152   : > { %2475 = vrot.lane.b32.xlu0 %v4597_v39, %s4007_s7  ;;  %3914 = vmatpush3.bf16.msra.mxu0 %v3975_v49  ;;  %v1580_v39 = vld [vmem:[#allocation2 + $0x6a] sm:$0xff] }
 0x153   : > { %v1238_v43 = vpop.permute.xlu1 %1237  ;;  %3952 = vmatpush3.bf16.msra.mxu1 %v3975_v49  ;;  %v4697_v53 = vpack.c.bf16 %v1580_v39, %v1580_v39 }
 0x154   : > { %v1244_v47 = vpop.permute.xlu0 %1243  ;;  %1309 = vst.msk [vmem:[#allocation3 + $0x64] sm:$0xf] %vm1283_vm5, %v1238_v43 }
 0x155   : > { %1312 = vst.msk [vmem:[#allocation3 + $0x70] sm:$0xf] %vm1283_vm5, %v1244_v47  ;;  %2473 = vrot.lane.b32.xlu1 %v4605_v23, %s4007_s7  ;;  %v1579_v23 = vld [vmem:[#allocation2 + $0x62] sm:$0xff] }
 0x156   : > { %2507 = vrot.lane.b32.xlu0 %v3796_v10, %s4007_s7  ;;  %v4704_v16 = vpack.c.bf16 %v1579_v23, %v1579_v23 }
 0x157   : > { %v1242_v51 = vpop.permute.xlu1 %1241 }
 0x158   : > { %v1248_v52 = vpop.permute.xlu0 %1247  ;;  %1311 = vst.msk [vmem:[#allocation3 + $0x6c] sm:$0xf] %vm1283_vm5, %v1242_v51 }
 0x159   : > { %1314 = vst.msk [vmem:[#allocation3 + $0x78] sm:$0xf] %vm1283_vm5, %v1248_v52  ;;  %2505 = vrot.lane.b32.xlu1 %v3795_v15, %s4007_s7 }
 0x15a   : > { %2479 = vrot.lane.b32.xlu0 %v3782_v55, %s4007_s7 }
 0x15b   : > { %v1246_v61 = vpop.permute.xlu1 %1245 }
 0x15c   : > { %v1445_v63 = vpop.permute.xlu0 %1444  ;;  %1313 = vst.msk [vmem:[#allocation3 + $0x74] sm:$0xf] %vm1283_vm5, %v1246_v61 }
 0x15d   : > { %1541 = vst.msk [vmem:[#allocation3] sm:$0xf] %vm1540_vm7, %v1445_v63  ;;  %2477 = vrot.lane.b32.xlu1 %v3781_v57, %s4007_s7 }
 0x15e   : > { %2511 = vrot.lane.b32.xlu0 %v3798_v59, %s4007_s7 }
 0x15f   : > { %v1250_v2 = vpop.permute.xlu1 %1249 }
 0x160   : > { %v1449_v45 = vpop.permute.xlu0 %1448  ;;  %1315 = vst.msk [vmem:[#allocation3 + $0x7c] sm:$0xf] %vm1283_vm5, %v1250_v2 }
 0x161   : > { %1543 = vst.msk [vmem:[#allocation3 + $0x8] sm:$0xf] %vm1540_vm7, %v1449_v45  ;;  %2509 = vrot.lane.b32.xlu1 %v3797_v0, %s4007_s7 }
 0x162   : > { %1711 = vrot.lane.b32.xlu0 %v3782_v55, %s4004_s26 }
 0x163   : > { %v1447_v5 = vpop.permute.xlu1 %1446 }
 0x164   : > { %v1453_v7 = vpop.permute.xlu0 %1452  ;;  %1542 = vst.msk [vmem:[#allocation3 + $0x4] sm:$0xf] %vm1540_vm7, %v1447_v5  ;;  %v1599_v5 = vld [vmem:[#allocation2 + $0x152] sm:$0xff] }
 0x165   : > { %1545 = vst.msk [vmem:[#allocation3 + $0x10] sm:$0xf] %vm1540_vm7, %v1453_v7  ;;  %1709 = vrot.lane.b32.xlu1 %v3781_v57, %s4004_s26  ;;  %v3801_v57 = vpack.c.bf16 %v2367_v60, %v2367_v60  ;;  %v4799_v23 = vpack.c.bf16 %v1599_v5, %v1599_v5 }
 0x166   : > { %1743 = vrot.lane.b32.xlu0 %v3798_v59, %s4004_s26  ;;  %v1343_v59 = vld [vmem:[#allocation2 + $0x159] sm:$0xff] }
 0x167   : > { %v1451_v12 = vpop.permute.xlu1 %1450  ;;  %v4784_v63 = vpack.c.bf16 %v1343_v59, %v1343_v59 }
 0x168   : > { %v1457_v19 = vpop.permute.xlu0 %1456  ;;  %1544 = vst.msk [vmem:[#allocation3 + $0xc] sm:$0xf] %vm1540_vm7, %v1451_v12  ;;  %v1839_v12 = vld [vmem:[#allocation2 + $0x90] sm:$0xff] }
 0x169   : > { %1547 = vst.msk [vmem:[#allocation3 + $0x18] sm:$0xf] %vm1540_vm7, %v1457_v19  ;;  %1741 = vrot.lane.b32.xlu1 %v3797_v0, %s4004_s26  ;;  %v1583_v0 = vld [vmem:[#allocation2 + $0x92] sm:$0xff]  ;;  %v3723_v25 = vpack.c.bf16 %v1839_v12, %v1839_v12 }
 0x16a   : > { %1715 = vrot.lane.b32.xlu0 %v4697_v53, %s4004_s26  ;;  %v4792_v39 = vpack.c.bf16 %v1583_v0, %v1583_v0 }
 0x16b   : > { %v1455_v27 = vpop.permute.xlu1 %1454 }
 0x16c   : > { %v1461_v30 = vpop.permute.xlu0 %1460  ;;  %1546 = vst.msk [vmem:[#allocation3 + $0x14] sm:$0xf] %vm1540_vm7, %v1455_v27  ;;  %v1855_v27 = vld [vmem:[#allocation2 + $0x150] sm:$0xff] }
 0x16d   : > { %1549 = vst.msk [vmem:[#allocation3 + $0x20] sm:$0xf] %vm1540_vm7, %v1461_v30  ;;  %1713 = vrot.lane.b32.xlu1 %v4704_v16, %s4004_s26  ;;  %v3739_v62 = vpack.c.bf16 %v1855_v27, %v1855_v27 }
 0x16e   : > { %1747 = vrot.lane.b32.xlu0 %v4706_v8, %s4004_s26 }
 0x16f   : > { %v1459_v35 = vpop.permute.xlu1 %1458 }
 0x170   : > { %v1465_v56 = vpop.permute.xlu0 %1464  ;;  %1548 = vst.msk [vmem:[#allocation3 + $0x1c] sm:$0xf] %vm1540_vm7, %v1459_v35  ;;  %v1840_v35 = vld [vmem:[#allocation2 + $0x98] sm:$0xff] }
 0x171   : > { %1551 = vst.msk [vmem:[#allocation3 + $0x28] sm:$0xf] %vm1540_vm7, %v1465_v56  ;;  %1745 = vrot.lane.b32.xlu1 %v4714_v13, %s4004_s26  ;;  %v1841_v56 = vld [vmem:[#allocation2 + $0xa8] sm:$0xff] }
 0x172   : > { %1969 = vrot.lane.b32.xlu0 %v3720_v20, %s4005_s27  ;;  %v4812_v20 = vpack.c.bf16 %v1600_v28, %v1600_v28 }
 0x173   : > { %v1463_v1 = vpop.permute.xlu1 %1462 }
 0x174   : > { %v1469_v22 = vpop.permute.xlu0 %1468  ;;  %1550 = vst.msk [vmem:[#allocation3 + $0x24] sm:$0xf] %vm1540_vm7, %v1463_v1  ;;  %v3724_v1 = vpack.c.bf16 %v1840_v35, %v1840_v35 }
 0x175   : > { %1553 = vst.msk [vmem:[#allocation3 + $0x30] sm:$0xf] %vm1540_vm7, %v1469_v22  ;;  %1967 = vrot.lane.b32.xlu1 %v3719_v24, %s4005_s27  ;;  %v3725_v22 = vpack.c.bf16 %v1841_v56, %v1841_v56 }
 0x176   : > { %2001 = vrot.lane.b32.xlu0 %v4288_v14, %s4005_s27 }
 0x177   : > { %v1467_v32 = vpop.permute.xlu1 %1466 }
 0x178   : > { %v1473_v33 = vpop.permute.xlu0 %1472  ;;  %1552 = vst.msk [vmem:[#allocation3 + $0x2c] sm:$0xf] %vm1540_vm7, %v1467_v32 }
 0x179   : > { %1555 = vst.msk [vmem:[#allocation3 + $0x38] sm:$0xf] %vm1540_vm7, %v1473_v33  ;;  %1999 = vrot.lane.b32.xlu1 %v4280_v9, %s4005_s27 }
 0x17a   : > { %1973 = vrot.lane.b32.xlu0 %v3722_v3, %s4005_s27  ;;  %v1856_v3 = vld [vmem:[#allocation2 + $0x158] sm:$0xff] }
 0x17b   : > { %v1471_v36 = vpop.permute.xlu1 %1470 }
 0x17c   : > { %v1477_v10 = vpop.permute.xlu0 %1476  ;;  %1554 = vst.msk [vmem:[#allocation3 + $0x34] sm:$0xf] %vm1540_vm7, %v1471_v36  ;;  %v3741_v36 = vpack.c.bf16 %v1857_v4, %v1857_v4  ;;  %v1588_v4 = vld [vmem:[#allocation2 + $0xca] sm:$0xff] }
 0x17d   : > { %1557 = vst.msk [vmem:[#allocation3 + $0x40] sm:$0xf] %vm1540_vm7, %v1477_v10  ;;  %1971 = vrot.lane.b32.xlu1 %v3721_v21, %s4005_s27  ;;  %v3740_v21 = vpack.c.bf16 %v1856_v3, %v1856_v3  ;;  %v1842_v10 = vld [vmem:[#allocation2 + $0xb0] sm:$0xff]  ;;  %v1603_v3 = vld [vmem:[#allocation2 + $0x182] sm:$0xff] }
 0x17e   : > { %2005 = vrot.lane.b32.xlu0 %v4298_v26, %s4005_s27 }
 0x17f   : > { %v1475_v14 = vpop.permute.xlu1 %1474 }
 0x180   : > { %v1481_v38 = vpop.permute.xlu0 %1480  ;;  %1556 = vst.msk [vmem:[#allocation3 + $0x3c] sm:$0xf] %vm1540_vm7, %v1475_v14 }
 0x181   : > { %1559 = vst.msk [vmem:[#allocation3 + $0x48] sm:$0xf] %vm1540_vm7, %v1481_v38  ;;  %2003 = vrot.lane.b32.xlu1 %v4290_v18, %s4005_s27 }
 0x182   : > { %2226 = vrot.lane.b32.xlu0 %v4512_v41, %s4006_s28 }
 0x183   : > { %v1479_v9 = vpop.permute.xlu1 %1478 }
 0x184   : > { %v1485_v37 = vpop.permute.xlu0 %1484  ;;  %1558 = vst.msk [vmem:[#allocation3 + $0x44] sm:$0xf] %vm1540_vm7, %v1479_v9  ;;  %v3726_v9 = vpack.c.bf16 %v1842_v10, %v1842_v10  ;;  %v4906_v10 = vpack.c.bf16 %v1588_v4, %v1588_v4  ;;  %v2375_v4 = vld [vmem:[#allocation2 + $0x19a] sm:$0xff] }
 0x185   : > { %1561 = vst.msk [vmem:[#allocation3 + $0x50] sm:$0xf] %vm1540_vm7, %v1485_v37  ;;  %2224 = vrot.lane.b32.xlu1 %v4494_v17, %s4006_s28  ;;  %v1858_v37 = vld [vmem:[#allocation2 + $0x170] sm:$0xff] }
 0x186   : > { %2258 = vrot.lane.b32.xlu0 %v4574_v44, %s4006_s28 }
 0x187   : > { %v1483_v26 = vpop.permute.xlu1 %1482 }
 0x188   : > { %v1489_v43 = vpop.permute.xlu0 %1488  ;;  %1560 = vst.msk [vmem:[#allocation3 + $0x4c] sm:$0xf] %vm1540_vm7, %v1483_v26 }
 0x189   : > { %1563 = vst.msk [vmem:[#allocation3 + $0x58] sm:$0xf] %vm1540_vm7, %v1489_v43  ;;  %2256 = vrot.lane.b32.xlu1 %v4556_v34, %s4006_s28 }
 0x18a   : > { %2230 = vrot.lane.b32.xlu0 %v4522_v54, %s4006_s28  ;;  %v2352_v54 = vld [vmem:[#allocation2 + $0x82] sm:$0xff] }
 0x18b   : > { %v1487_v18 = vpop.permute.xlu1 %1486 }
 0x18c   : > { %v1493_v41 = vpop.permute.xlu0 %1492  ;;  %1562 = vst.msk [vmem:[#allocation3 + $0x54] sm:$0xf] %vm1540_vm7, %v1487_v18  ;;  %v3742_v18 = vpack.c.bf16 %v1858_v37, %v1858_v37 }
 0x18d   : > { %1565 = vst.msk [vmem:[#allocation3 + $0x60] sm:$0xf] %vm1540_vm7, %v1493_v41  ;;  %2228 = vrot.lane.b32.xlu1 %v4504_v31, %s4006_s28  ;;  %v3786_v31 = vpack.c.bf16 %v2352_v54, %v2352_v54  ;;  %v2098_v41 = vld [vmem:[#allocation2 + $0xa9] sm:$0xff] }
 0x18e   : > { %2262 = vrot.lane.b32.xlu0 %v4584_v58, %s4006_s28  ;;  %v2351_v58 = vld [vmem:[#allocation2 + $0x7a] sm:$0xff]  ;;  %v3757_v54 = vpack.c.bf16 %v2098_v41, %v2098_v41 }
 0x18f   : > { %v1491_v17 = vpop.permute.xlu1 %1490  ;;  %v3785_v55 = vpack.c.bf16 %v2351_v58, %v2351_v58  ;;  %v2099_v58 = vld [vmem:[#allocation2 + $0xb1] sm:$0xff] }
 0x190   : > { %v1497_v44 = vpop.permute.xlu0 %1496  ;;  %1564 = vst.msk [vmem:[#allocation3 + $0x5c] sm:$0xf] %vm1540_vm7, %v1491_v17 }
 0x191   : > { %1567 = vst.msk [vmem:[#allocation3 + $0x68] sm:$0xf] %vm1540_vm7, %v1497_v44  ;;  %2260 = vrot.lane.b32.xlu1 %v4566_v48, %s4006_s28  ;;  %v2368_v48 = vld [vmem:[#allocation2 + $0x142] sm:$0xff] }
 0x192   : > { %2483 = vrot.lane.b32.xlu0 %v4697_v53, %s4007_s7  ;;  %v3802_v40 = vpack.c.bf16 %v2368_v48, %v2368_v48 }
 0x193   : > { %v1495_v34 = vpop.permute.xlu1 %1494 }
 0x194   : > { %v1704_v47 = vpop.permute.xlu0 %1703  ;;  %1566 = vst.msk [vmem:[#allocation3 + $0x64] sm:$0xf] %vm1540_vm7, %v1495_v34  ;;  %v2114_v34 = vld [vmem:[#allocation2 + $0x169] sm:$0xff] }
 0x195   : > { %1799 = vst.msk [vmem:[#allocation3 + $0x4] sm:$0xf] %vm1797_vm8, %v1704_v47  ;;  %2481 = vrot.lane.b32.xlu1 %v4704_v16, %s4007_s7 }
 0x196   : > { %2515 = vrot.lane.b32.xlu0 %v4706_v8, %s4007_s7  ;;  %v4804_v8 = vpack.c.bf16 %v1584_v11, %v1584_v11  ;;  %v2372_v11 = vld [vmem:[#allocation2 + $0x172] sm:$0xff] }
 0x197   : > { %v1702_v49 = vpop.permute.xlu1 %1701 }
 0x198   : > { %v1736_v15 = vpop.permute.xlu0 %1735  ;;  %1798 = vst.msk [vmem:[#allocation3] sm:$0xf] %vm1797_vm8, %v1702_v49 }
 0x199   : > { %1815 = vst.msk [vmem:[#allocation3 + $0x44] sm:$0xf] %vm1797_vm8, %v1736_v15  ;;  %2513 = vrot.lane.b32.xlu1 %v4714_v13, %s4007_s7  ;;  %v2115_v15 = vld [vmem:[#allocation2 + $0x171] sm:$0xff] }
 0x19a   : > { %2487 = vrot.lane.b32.xlu0 %v3786_v31, %s4007_s7  ;;  %v3774_v60 = vpack.c.bf16 %v2115_v15, %v2115_v15 }
 0x19b   : > { %v1734_v51 = vpop.permute.xlu1 %1733 }
 0x19c   : > { %v1708_v52 = vpop.permute.xlu0 %1707  ;;  %1814 = vst.msk [vmem:[#allocation3 + $0x40] sm:$0xf] %vm1797_vm8, %v1734_v51  ;;  %v2355_v51 = vld [vmem:[#allocation2 + $0xaa] sm:$0xff] }
 0x19d   : > { %1801 = vst.msk [vmem:[#allocation3 + $0xc] sm:$0xf] %vm1797_vm8, %v1708_v52  ;;  %2485 = vrot.lane.b32.xlu1 %v3785_v55, %s4007_s7 }
 0x19e   : > { %2519 = vrot.lane.b32.xlu0 %v3802_v40, %s4007_s7 }
 0x19f   : > { %v1706_v29 = vpop.permute.xlu1 %1705 }
 0x1a0   : > { %v1740_v61 = vpop.permute.xlu0 %1739  ;;  %1800 = vst.msk [vmem:[#allocation3 + $0x8] sm:$0xf] %vm1797_vm8, %v1706_v29  ;;  %v3789_v29 = vpack.c.bf16 %v2355_v51, %v2355_v51  ;;  %v1862_v51 = vld [vmem:[#allocation2 + $0x1a0] sm:$0xff] }
 0x1a1   : > { %1817 = vst.msk [vmem:[#allocation3 + $0x4c] sm:$0xf] %vm1797_vm8, %v1740_v61  ;;  %2517 = vrot.lane.b32.xlu1 %v3801_v57, %s4007_s7  ;;  %v2371_v61 = vld [vmem:[#allocation2 + $0x16a] sm:$0xff] }
 0x1a2   : > { %1717 = vrot.lane.b32.xlu0 %v3785_v55, %s4004_s26 }
 0x1a3   : > { %v1738_v2 = vpop.permute.xlu1 %1737 }
 0x1a4   : > { %v1962_v45 = vpop.permute.xlu0 %1961  ;;  %1816 = vst.msk [vmem:[#allocation3 + $0x48] sm:$0xf] %vm1797_vm8, %v1738_v2 }
 0x1a5   : > { %2057 = vst.msk [vmem:[#allocation3 + $0x4] sm:$0xf] %vm2055_vm9, %v1962_v45  ;;  %1498 = vrot.lane.b32.xlu1 %v4784_v63, %s4003_s25  ;;  %v2356_v45 = vld [vmem:[#allocation2 + $0xb2] sm:$0xff] }
 0x1a6   : > { %1749 = vrot.lane.b32.xlu0 %v3801_v57, %s4004_s26 }
 0x1a7   : > { %v1960_v7 = vpop.permute.xlu1 %1959 }
 0x1a8   : > { %v1994_v53 = vpop.permute.xlu0 %1993  ;;  %2056 = vst.msk [vmem:[#allocation3] sm:$0xf] %vm2055_vm9, %v1960_v7 }
 0x1a9   : > { %2073 = vst.msk [vmem:[#allocation3 + $0x44] sm:$0xf] %vm2055_vm9, %v1994_v53  ;;  %1719 = vrot.lane.b32.xlu1 %v3786_v31, %s4004_s26 }
 0x1aa   : > { %1721 = vrot.lane.b32.xlu0 %v4792_v39, %s4004_s26 }
 0x1ab   : > { %v1992_v19 = vpop.permute.xlu1 %1991 }
 0x1ac   : > { %v1966_v16 = vpop.permute.xlu0 %1965  ;;  %2072 = vst.msk [vmem:[#allocation3 + $0x40] sm:$0xf] %vm2055_vm9, %v1992_v19 }
 0x1ad   : > { %2059 = vst.msk [vmem:[#allocation3 + $0xc] sm:$0xf] %vm2055_vm9, %v1966_v16  ;;  %1751 = vrot.lane.b32.xlu1 %v3802_v40, %s4004_s26  ;;  %v1346_v16 = vld [vmem:[#allocation2 + $0x181] sm:$0xff] }
 0x1ae   : > { %1753 = vrot.lane.b32.xlu0 %v4799_v23, %s4004_s26 }
 0x1af   : > { %v1964_v30 = vpop.permute.xlu1 %1963 }
 0x1b0   : > { %v1998_v13 = vpop.permute.xlu0 %1997  ;;  %2058 = vst.msk [vmem:[#allocation3 + $0x8] sm:$0xf] %vm2055_vm9, %v1964_v30  ;;  %v1347_v30 = vld [vmem:[#allocation2 + $0x189] sm:$0xff] }
 0x1b1   : > { %2075 = vst.msk [vmem:[#allocation3 + $0x4c] sm:$0xf] %vm2055_vm9, %v1998_v13  ;;  %1723 = vrot.lane.b32.xlu1 %v4804_v8, %s4004_s26 }
 0x1b2   : > { %1975 = vrot.lane.b32.xlu0 %v3723_v25, %s4005_s27  ;;  %v4876_v25 = vpack.c.bf16 %v1346_v16, %v1346_v16 }
 0x1b3   : > { %v1996_v24 = vpop.permute.xlu1 %1995 }
 0x1b4   : > { %v2219_v6 = vpop.permute.xlu0 %2218  ;;  %2074 = vst.msk [vmem:[#allocation3 + $0x48] sm:$0xf] %vm2055_vm9, %v1996_v24  ;;  %v1587_v24 = vld [vmem:[#allocation2 + $0xc2] sm:$0xff] }
 0x1b5   : > { %2314 = vst.msk [vmem:[#allocation3 + $0x4] sm:$0xf] %vm2312_vm10, %v2219_v6  ;;  %1755 = vrot.lane.b32.xlu1 %v4812_v20, %s4004_s26  ;;  %v4894_v6 = vpack.c.bf16 %v1587_v24, %v1587_v24  ;;  %v2359_v24 = vld [vmem:[#allocation2 + $0xda] sm:$0xff] }
 0x1b6   : > { %2007 = vrot.lane.b32.xlu0 %v3739_v62, %s4005_s27  ;;  %v4886_v62 = vpack.c.bf16 %v1347_v30, %v1347_v30 }
 0x1b7   : > { %v2217_v32 = vpop.permute.xlu1 %2216 }
 0x1b8   : > { %v2251_v33 = vpop.permute.xlu0 %2250  ;;  %2313 = vst.msk [vmem:[#allocation3] sm:$0xf] %vm2312_vm10, %v2217_v32  ;;  %v4901_v32 = vpack.c.bf16 %v1603_v3, %v1603_v3 }
 0x1b9   : > { %2330 = vst.msk [vmem:[#allocation3 + $0x44] sm:$0xf] %vm2312_vm10, %v2251_v33  ;;  %1977 = vrot.lane.b32.xlu1 %v3724_v1, %s4005_s27 }
 0x1ba   : > { %1979 = vrot.lane.b32.xlu0 %v3725_v22, %s4005_s27 }
 0x1bb   : > { %v2249_v14 = vpop.permute.xlu1 %2248 }
 0x1bc   : > { %v2223_v38 = vpop.permute.xlu0 %2222  ;;  %2329 = vst.msk [vmem:[#allocation3 + $0x40] sm:$0xf] %vm2312_vm10, %v2249_v14  ;;  %v1604_v14 = vld [vmem:[#allocation2 + $0x18a] sm:$0xff] }
 0x1bd   : > { %2316 = vst.msk [vmem:[#allocation3 + $0xc] sm:$0xf] %vm2312_vm10, %v2223_v38  ;;  %2009 = vrot.lane.b32.xlu1 %v3740_v21, %s4005_s27 }
 0x1be   : > { %2011 = vrot.lane.b32.xlu0 %v3741_v36, %s4005_s27  ;;  %v1843_v36 = vld [vmem:[#allocation2 + $0xc0] sm:$0xff] }
 0x1bf   : > { %v2221_v26 = vpop.permute.xlu1 %2220  ;;  %v3727_v38 = vpack.c.bf16 %v1843_v36, %v1843_v36 }
 0x1c0   : > { %v2255_v43 = vpop.permute.xlu0 %2254  ;;  %2315 = vst.msk [vmem:[#allocation3 + $0x8] sm:$0xf] %vm2312_vm10, %v2221_v26  ;;  %v1859_v26 = vld [vmem:[#allocation2 + $0x180] sm:$0xff] }
 0x1c1   : > { %2332 = vst.msk [vmem:[#allocation3 + $0x4c] sm:$0xf] %vm2312_vm10, %v2255_v43  ;;  %1981 = vrot.lane.b32.xlu1 %v3726_v9, %s4005_s27  ;;  %v4914_v43 = vpack.c.bf16 %v1604_v14, %v1604_v14  ;;  %v3743_v41 = vpack.c.bf16 %v1859_v26, %v1859_v26  ;;  %v2376_v14 = vld [vmem:[#allocation2 + $0x1a2] sm:$0xff] }
 0x1c2   : > { %2232 = vrot.lane.b32.xlu0 %v4514_v42, %s4006_s28  ;;  %v3773_v42 = vpack.c.bf16 %v2114_v34, %v2114_v34 }
 0x1c3   : > { %v2253_v17 = vpop.permute.xlu1 %2252 }
 0x1c4   : > { %v2476_v44 = vpop.permute.xlu0 %2475  ;;  %2331 = vst.msk [vmem:[#allocation3 + $0x48] sm:$0xf] %vm2312_vm10, %v2253_v17 }
 0x1c5   : > { %2571 = vst.msk [vmem:[#allocation3 + $0x4] sm:$0xf] %vm2569_vm11, %v2476_v44  ;;  %2013 = vrot.lane.b32.xlu1 %v3742_v18, %s4005_s27  ;;  %v1844_v18 = vld [vmem:[#allocation2 + $0xc8] sm:$0xff] }
 0x1c6   : > { %2264 = vrot.lane.b32.xlu0 %v4576_v46, %s4006_s28  ;;  %v3758_v46 = vpack.c.bf16 %v2099_v58, %v2099_v58  ;;  %v3728_v34 = vpack.c.bf16 %v1844_v18, %v1844_v18 }
 0x1c7   : > { %v2474_v47 = vpop.permute.xlu1 %2473 }
 0x1c8   : > { %v2508_v31 = vpop.permute.xlu0 %2507  ;;  %2570 = vst.msk [vmem:[#allocation3] sm:$0xf] %vm2569_vm11, %v2474_v47  ;;  %v1860_v47 = vld [vmem:[#allocation2 + $0x188] sm:$0xff] }
 0x1c9   : > { %2587 = vst.msk [vmem:[#allocation3 + $0x44] sm:$0xf] %vm2569_vm11, %v2508_v31  ;;  %2234 = vrot.lane.b32.xlu1 %v4529_v50, %s4006_s28 }
 0x1ca   : > { %2236 = vrot.lane.b32.xlu0 %v3757_v54, %s4006_s28  ;;  %v1845_v54 = vld [vmem:[#allocation2 + $0xd8] sm:$0xff] }
 0x1cb   : > { %v2506_v48 = vpop.permute.xlu1 %2505  ;;  %v3729_v31 = vpack.c.bf16 %v1845_v54, %v1845_v54 }
 0x1cc   : > { %v2480_v49 = vpop.permute.xlu0 %2479  ;;  %2586 = vst.msk [vmem:[#allocation3 + $0x40] sm:$0xf] %vm2569_vm11, %v2506_v48  ;;  %v1861_v48 = vld [vmem:[#allocation2 + $0x198] sm:$0xff] }
 0x1cd   : > { %2573 = vst.msk [vmem:[#allocation3 + $0xc] sm:$0xf] %vm2569_vm11, %v2480_v49  ;;  %2266 = vrot.lane.b32.xlu1 %v4784_v63, %s4006_s28  ;;  %v3744_v49 = vpack.c.bf16 %v1860_v47, %v1860_v47  ;;  %v3745_v15 = vpack.c.bf16 %v1861_v48, %v1861_v48 }
 0x1ce   : > { %2268 = vrot.lane.b32.xlu0 %v3773_v42, %s4006_s28 }
 0x1cf   : > { %v2478_v55 = vpop.permute.xlu1 %2477  ;;  %v3974_v50 = vld [vmem:[#allocation3] sm:$0xff]  }
 0x1d0   : > { %v2512_v40 = vpop.permute.xlu0 %2511  ;;  %2572 = vst.msk [vmem:[#allocation3 + $0x8] sm:$0xf] %vm2569_vm11, %v2478_v55  ;;  %3915 = vmatprep.mubr.msk.bf16.mxu0 %vm2734_vm12, %v3974_v50 }
 0x1d1   : > { %2589 = vst.msk [vmem:[#allocation3 + $0x4c] sm:$0xf] %vm2569_vm11, %v2512_v40  ;;  %2238 = vrot.lane.b32.xlu1 %v3758_v46, %s4006_s28  ;;  %v1846_v46 = vld [vmem:[#allocation2 + $0xe0] sm:$0xff] }
 0x1d2   : > { %2489 = vrot.lane.b32.xlu0 %v4792_v39, %s4007_s7  ;;  %v3805_v39 = vpack.c.bf16 %v2371_v61, %v2371_v61  ;;  %v2100_v40 = vld [vmem:[#allocation2 + $0xc1] sm:$0xff]  ;;  %v2101_v61 = vld [vmem:[#allocation2 + $0xc9] sm:$0xff] }
 0x1d3   : > { %v2510_v52 = vpop.permute.xlu1 %2509  ;;  %v3976_v57 = vld [vmem:[#allocation3 + $0x40] sm:$0xff]  }
 0x1d4   : > { %v1712_v59 = vpop.permute.xlu0 %1711  ;;  %2588 = vst.msk [vmem:[#allocation3 + $0x48] sm:$0xf] %vm2569_vm11, %v2510_v52  ;;  %3931 = vmatprep.mubr.msk.bf16.mxu1 %vm2734_vm12, %v3976_v57  ;;  %v3759_v52 = vpack.c.bf16 %v2100_v40, %v2100_v40 }
 0x1d5   : > { %1803 = vst.msk [vmem:[#allocation3 + $0x14] sm:$0xf] %vm1797_vm8, %v1712_v59  ;;  %2270 = vrot.lane.b32.xlu1 %v3774_v60, %s4006_s28 }
 0x1d6   : > { %2521 = vrot.lane.b32.xlu0 %v4799_v23, %s4007_s7  ;;  %v3790_v23 = vpack.c.bf16 %v2356_v45, %v2356_v45  ;;  %v3760_v45 = vpack.c.bf16 %v2101_v61, %v2101_v61 }
 0x1d7   : > { %v1710_v63 = vpop.permute.xlu1 %1709  ;;  %v3977_v0 = vld [vmem:[#allocation3 + $0x8] sm:$0xff]  }
 0x1d8   : > { %v1744_v2 = vpop.permute.xlu0 %1743  ;;  %1802 = vst.msk [vmem:[#allocation3 + $0x10] sm:$0xf] %vm1797_vm8, %v1710_v63  ;;  %3916 = vmatmul.mubr.msk.bf16.vlgmr.msra.gmra.mxu0 %vm2734_vm12, %v3977_v0 }
 0x1d9   : > { %1819 = vst.msk [vmem:[#allocation3 + $0x54] sm:$0xf] %vm1797_vm8, %v1744_v2  ;;  %2491 = vrot.lane.b32.xlu1 %v4804_v8, %s4007_s7  ;;  %v3806_v8 = vpack.c.bf16 %v2372_v11, %v2372_v11  ;;  %v2102_v2 = vld [vmem:[#allocation2 + $0xd9] sm:$0xff]  ;;  %v2103_v11 = vld [vmem:[#allocation2 + $0xe1] sm:$0xff] }
 0x1da   : > { %2493 = vrot.lane.b32.xlu0 %v3789_v29, %s4007_s7 }
 0x1db   : > { %v1742_v5 = vpop.permute.xlu1 %1741  ;;  %v3978_v7 = vld [vmem:[#allocation3 + $0x48] sm:$0xff]  }
 0x1dc   : > { %v1716_v53 = vpop.permute.xlu0 %1715  ;;  %1818 = vst.msk [vmem:[#allocation3 + $0x50] sm:$0xf] %vm1797_vm8, %v1742_v5  ;;  %3932 = vmatmul.mubr.msk.bf16.vlgmr.msra.gmra.mxu1 %vm2734_vm12, %v3978_v7  ;;  %v2118_v5 = vld [vmem:[#allocation2 + $0x199] sm:$0xff] }
 0x1dd   : > { %1805 = vst.msk [vmem:[#allocation3 + $0x1c] sm:$0xf] %vm1797_vm8, %v1716_v53  ;;  %2523 = vrot.lane.b32.xlu1 %v4812_v20, %s4007_s7 }
 0x1de   : > { %2525 = vrot.lane.b32.xlu0 %v3805_v39, %s4007_s7 }
 0x1df   : > { %v1714_v12 = vpop.permute.xlu1 %1713 }
 0x1e0   : > { %v1748_v19 = vpop.permute.xlu0 %1747  ;;  %1804 = vst.msk [vmem:[#allocation3 + $0x18] sm:$0xf] %vm1797_vm8, %v1714_v12  ;;  %v3777_v12 = vpack.c.bf16 %v2118_v5, %v2118_v5 }
 0x1e1   : > { %1821 = vst.msk [vmem:[#allocation3 + $0x5c] sm:$0xf] %vm1797_vm8, %v1748_v19  ;;  %2495 = vrot.lane.b32.xlu1 %v3790_v23, %s4007_s7 }
 0x1e2   : > { %1500 = vrot.lane.b32.xlu0 %v3773_v42, %s4003_s25 }
 0x1e3   : > { %v1746_v28 = vpop.permute.xlu1 %1745 }
 0x1e4   : > { %v1970_v27 = vpop.permute.xlu0 %1969  ;;  %1820 = vst.msk [vmem:[#allocation3 + $0x58] sm:$0xf] %vm1797_vm8, %v1746_v28  ;;  %v2119_v28 = vld [vmem:[#allocation2 + $0x1a1] sm:$0xff] }
 0x1e5   : > { %2061 = vst.msk [vmem:[#allocation3 + $0x14] sm:$0xf] %vm2055_vm9, %v1970_v27  ;;  %2527 = vrot.lane.b32.xlu1 %v3806_v8, %s4007_s7 }
 0x1e6   : > { %1504 = vrot.lane.b32.xlu0 %v4876_v25, %s4003_s25 }
 0x1e7   : > { %v1968_v13 = vpop.permute.xlu1 %1967 }
 0x1e8   : > { %v2002_v20 = vpop.permute.xlu0 %2001  ;;  %2060 = vst.msk [vmem:[#allocation3 + $0x10] sm:$0xf] %vm2055_vm9, %v1968_v13 }
 0x1e9   : > { %2077 = vst.msk [vmem:[#allocation3 + $0x54] sm:$0xf] %vm2055_vm9, %v2002_v20  ;;  %1502 = vrot.lane.b32.xlu1 %v3774_v60, %s4003_s25  ;;  %v3730_v60 = vpack.c.bf16 %v1846_v46, %v1846_v46  ;;  %v3778_v20 = vpack.c.bf16 %v2119_v28, %v2119_v28 }
 0x1ea   : > { %1725 = vrot.lane.b32.xlu0 %v3789_v29, %s4004_s26  ;;  %v3746_v29 = vpack.c.bf16 %v1862_v51, %v1862_v51 }
 0x1eb   : > { %v2000_v35 = vpop.permute.xlu1 %1999 }
 0x1ec   : > { %v1974_v56 = vpop.permute.xlu0 %1973  ;;  %2076 = vst.msk [vmem:[#allocation3 + $0x50] sm:$0xf] %vm2055_vm9, %v2000_v35 }
 0x1ed   : > { %2063 = vst.msk [vmem:[#allocation3 + $0x1c] sm:$0xf] %vm2055_vm9, %v1974_v56  ;;  %1506 = vrot.lane.b32.xlu1 %v4886_v62, %s4003_s25 }
 0x1ee   : > { %1757 = vrot.lane.b32.xlu0 %v3805_v39, %s4004_s26  ;;  %v3761_v39 = vpack.c.bf16 %v2102_v2, %v2102_v2 }
 0x1ef   : > { %v1972_v1 = vpop.permute.xlu1 %1971 }
 0x1f0   : > { %v2006_v22 = vpop.permute.xlu0 %2005  ;;  %2062 = vst.msk [vmem:[#allocation3 + $0x18] sm:$0xf] %vm2055_vm9, %v1972_v1  ;;  %v3793_v1 = vpack.c.bf16 %v2359_v24, %v2359_v24 }
 0x1f1   : > { %2079 = vst.msk [vmem:[#allocation3 + $0x5c] sm:$0xf] %vm2055_vm9, %v2006_v22  ;;  %1727 = vrot.lane.b32.xlu1 %v3790_v23, %s4004_s26 }
 0x1f2   : > { %1729 = vrot.lane.b32.xlu0 %v4894_v6, %s4004_s26 }
 0x1f3   : > { %v2004_v33 = vpop.permute.xlu1 %2003 }
 0x1f4   : > { %v2227_v21 = vpop.permute.xlu0 %2226  ;;  %2078 = vst.msk [vmem:[#allocation3 + $0x58] sm:$0xf] %vm2055_vm9, %v2004_v33  ;;  %v3809_v33 = vpack.c.bf16 %v2375_v4, %v2375_v4 }
 0x1f5   : > { %2318 = vst.msk [vmem:[#allocation3 + $0x14] sm:$0xf] %vm2312_vm10, %v2227_v21  ;;  %1759 = vrot.lane.b32.xlu1 %v3806_v8, %s4004_s26 }
 0x1f6   : > { %1761 = vrot.lane.b32.xlu0 %v4901_v32, %s4004_s26 }
 0x1f7   : > { %v2225_v9 = vpop.permute.xlu1 %2224 }
 0x1f8   : > { %v2259_v37 = vpop.permute.xlu0 %2258  ;;  %2317 = vst.msk [vmem:[#allocation3 + $0x10] sm:$0xf] %vm2312_vm10, %v2225_v9 }
 0x1f9   : > { %2334 = vst.msk [vmem:[#allocation3 + $0x54] sm:$0xf] %vm2312_vm10, %v2259_v37  ;;  %1731 = vrot.lane.b32.xlu1 %v4906_v10, %s4004_s26 }
 0x1fa   : > { %1983 = vrot.lane.b32.xlu0 %v3727_v38, %s4005_s27 }
 0x1fb   : > { %v2257_v17 = vpop.permute.xlu1 %2256 }
 0x1fc   : > { %v2231_v44 = vpop.permute.xlu0 %2230  ;;  %2333 = vst.msk [vmem:[#allocation3 + $0x50] sm:$0xf] %vm2312_vm10, %v2257_v17 }
 0x1fd   : > { %2320 = vst.msk [vmem:[#allocation3 + $0x1c] sm:$0xf] %vm2312_vm10, %v2231_v44  ;;  %1763 = vrot.lane.b32.xlu1 %v4914_v43, %s4004_s26 }
 0x1fe   : > { %2015 = vrot.lane.b32.xlu0 %v3743_v41, %s4005_s27 }
 0x1ff   : > { %v2229_v42 = vpop.permute.xlu1 %2228 }
 0x200   : > { %v2263_v58 = vpop.permute.xlu0 %2262  ;;  %2319 = vst.msk [vmem:[#allocation3 + $0x18] sm:$0xf] %vm2312_vm10, %v2229_v42 }
 0x201   : > { %2336 = vst.msk [vmem:[#allocation3 + $0x5c] sm:$0xf] %vm2312_vm10, %v2263_v58  ;;  %1985 = vrot.lane.b32.xlu1 %v3728_v34, %s4005_s27 }
 0x202   : > { %1987 = vrot.lane.b32.xlu0 %v3729_v31, %s4005_s27 }
 0x203   : > { %v2261_v55 = vpop.permute.xlu1 %2260 }
 0x204   : > { %v2484_v50 = vpop.permute.xlu0 %2483  ;;  %2335 = vst.msk [vmem:[#allocation3 + $0x58] sm:$0xf] %vm2312_vm10, %v2261_v55 }
 0x205   : > { %2575 = vst.msk [vmem:[#allocation3 + $0x14] sm:$0xf] %vm2569_vm11, %v2484_v50  ;;  %2017 = vrot.lane.b32.xlu1 %v3744_v49, %s4005_s27 }
 0x206   : > { %2019 = vrot.lane.b32.xlu0 %v3745_v15, %s4005_s27 }
 0x207   : > { %v2482_v57 = vpop.permute.xlu1 %2481 }
 0x208   : > { %v2516_v59 = vpop.permute.xlu0 %2515  ;;  %2574 = vst.msk [vmem:[#allocation3 + $0x10] sm:$0xf] %vm2569_vm11, %v2482_v57 }
 0x209   : > { %2591 = vst.msk [vmem:[#allocation3 + $0x54] sm:$0xf] %vm2569_vm11, %v2516_v59  ;;  %1989 = vrot.lane.b32.xlu1 %v3730_v60, %s4005_s27 }
 0x20a   : > { %2240 = vrot.lane.b32.xlu0 %v3759_v52, %s4006_s28 }
 0x20b   : > { %v2514_v63 = vpop.permute.xlu1 %2513 }
 0x20c   : > { %v2488_v0 = vpop.permute.xlu0 %2487  ;;  %2590 = vst.msk [vmem:[#allocation3 + $0x50] sm:$0xf] %vm2569_vm11, %v2514_v63 }
 0x20d   : > { %2577 = vst.msk [vmem:[#allocation3 + $0x1c] sm:$0xf] %vm2569_vm11, %v2488_v0  ;;  %2021 = vrot.lane.b32.xlu1 %v3746_v29, %s4005_s27 }
 0x20e   : > { %2272 = vrot.lane.b32.xlu0 %v4876_v25, %s4006_s28  ;;  %v3762_v25 = vpack.c.bf16 %v2103_v11, %v2103_v11 }
 0x20f   : > { %v2486_v7 = vpop.permute.xlu1 %2485  ;;  %v3979_v53 = vld [vmem:[#allocation3 + $0x10] sm:$0xff]  }
 0x210   : > { %v2520_v23 = vpop.permute.xlu0 %2519  ;;  %2576 = vst.msk [vmem:[#allocation3 + $0x18] sm:$0xf] %vm2569_vm11, %v2486_v7  ;;  %3919 = vmatprep.mubr.msk.bf16.mxu0 %vm2734_vm12, %v3979_v53 }
 0x211   : > { %2593 = vst.msk [vmem:[#allocation3 + $0x5c] sm:$0xf] %vm2569_vm11, %v2520_v23  ;;  %2242 = vrot.lane.b32.xlu1 %v3760_v45, %s4006_s28 }
 0x212   : > { %2244 = vrot.lane.b32.xlu0 %v3761_v39, %s4006_s28 }
 0x213   : > { %v2518_v19 = vpop.permute.xlu1 %2517  ;;  %v3980_v16 = vld [vmem:[#allocation3 + $0x50] sm:$0xff]  }
 0x214   : > { %v1718_v8 = vpop.permute.xlu0 %1717  ;;  %2592 = vst.msk [vmem:[#allocation3 + $0x58] sm:$0xf] %vm2569_vm11, %v2518_v19  ;;  %3935 = vmatprep.mubr.msk.bf16.mxu1 %vm2734_vm12, %v3980_v16 }
 0x215   : > { %1806 = vst.msk [vmem:[#allocation3 + $0x20] sm:$0xf] %vm1797_vm8, %v1718_v8  ;;  %2274 = vrot.lane.b32.xlu1 %v4886_v62, %s4006_s28 }
 0x216   : > { %2276 = vrot.lane.b32.xlu0 %v3777_v12, %s4006_s28 }
 0x217   : > { %v1499_v27 = vpop.permute.xlu1 %1498  ;;  %v3981_v30 = vld [vmem:[#allocation3 + $0x18] sm:$0xff]  }
 0x218   : > { %v1750_v13 = vpop.permute.xlu0 %1749  ;;  %1568 = vst.msk [vmem:[#allocation3 + $0x6c] sm:$0xf] %vm1540_vm7, %v1499_v27  ;;  %3920 = vmatmul.mubr.msk.bf16.gmra.mxu0 %vm2734_vm12, %v3981_v30 }
 0x219   : > { %1822 = vst.msk [vmem:[#allocation3 + $0x60] sm:$0xf] %vm1797_vm8, %v1750_v13  ;;  %2246 = vrot.lane.b32.xlu1 %v3762_v25, %s4006_s28 }
 0x21a   : > { %2497 = vrot.lane.b32.xlu0 %v4894_v6, %s4007_s7  ;;  %v2360_v6 = vld [vmem:[#allocation2 + $0xe2] sm:$0xff] }
 0x21b   : > { %v1720_v62 = vpop.permute.xlu1 %1719  ;;  %v3982_v35 = vld [vmem:[#allocation3 + $0x58] sm:$0xff]  }
 0x21c   : > { %v1722_v56 = vpop.permute.xlu0 %1721  ;;  %1807 = vst.msk [vmem:[#allocation3 + $0x24] sm:$0xf] %vm1797_vm8, %v1720_v62  ;;  %3936 = vmatmul.mubr.msk.bf16.gmra.mxu1 %vm2734_vm12, %v3982_v35 }
 0x21d   : > { %1808 = vst.msk [vmem:[#allocation3 + $0x28] sm:$0xf] %vm1797_vm8, %v1722_v56  ;;  %2278 = vrot.lane.b32.xlu1 %v3778_v20, %s4006_s28 }
 0x21e   : > { %2529 = vrot.lane.b32.xlu0 %v4901_v32, %s4007_s7  ;;  %v3794_v32 = vpack.c.bf16 %v2360_v6, %v2360_v6 }
 0x21f   : > { %v1752_v22 = vpop.permute.xlu1 %1751 }
 0x220   : > { %v1754_v3 = vpop.permute.xlu0 %1753  ;;  %1823 = vst.msk [vmem:[#allocation3 + $0x64] sm:$0xf] %vm1797_vm8, %v1752_v22 }
 0x221   : > { %1824 = vst.msk [vmem:[#allocation3 + $0x68] sm:$0xf] %vm1797_vm8, %v1754_v3  ;;  %2499 = vrot.lane.b32.xlu1 %v4906_v10, %s4007_s7  ;;  %v3810_v10 = vpack.c.bf16 %v2376_v14, %v2376_v14 }
 0x222   : > { %2501 = vrot.lane.b32.xlu0 %v3793_v1, %s4007_s7 }
 0x223   : > { %v1724_v21 = vpop.permute.xlu1 %1723 }
 0x224   : > { %v1976_v36 = vpop.permute.xlu0 %1975  ;;  %1809 = vst.msk [vmem:[#allocation3 + $0x2c] sm:$0xf] %vm1797_vm8, %v1724_v21 }
 0x225   : > { %2064 = vst.msk [vmem:[#allocation3 + $0x20] sm:$0xf] %vm2055_vm9, %v1976_v36  ;;  %2531 = vrot.lane.b32.xlu1 %v4914_v43, %s4007_s7 }
 0x226   : > { %2533 = vrot.lane.b32.xlu0 %v3809_v33, %s4007_s7 }
 0x227   : > { %v1756_v38 = vpop.permute.xlu1 %1755 }
 0x228   : > { %v2008_v9 = vpop.permute.xlu0 %2007  ;;  %1825 = vst.msk [vmem:[#allocation3 + $0x6c] sm:$0xf] %vm1797_vm8, %v1756_v38  ;;  %v5039_v38 = vld [vmem:[%s5125_s2] ss:$0 sm:$0xff] }
 0x229   : > { %2080 = vst.msk [vmem:[#allocation3 + $0x60] sm:$0xf] %vm2055_vm9, %v2008_v9  ;;  %2503 = vrot.lane.b32.xlu1 %v3794_v32, %s4007_s7 }
 0x22b   : > { %v1978_v37 = vpop.permute.xlu1 %1977 }
 0x22c   : > { %v1980_v26 = vpop.permute.xlu0 %1979  ;;  %2065 = vst.msk [vmem:[#allocation3 + $0x24] sm:$0xf] %vm2055_vm9, %v1978_v37 }
 0x22d   : > { %2066 = vst.msk [vmem:[#allocation3 + $0x28] sm:$0xf] %vm2055_vm9, %v1980_v26  ;;  %2535 = vrot.lane.b32.xlu1 %v3810_v10, %s4007_s7 }
 0x22f   : > { %v2010_v43 = vpop.permute.xlu1 %2009 }
 0x230   : > { %v2012_v18 = vpop.permute.xlu0 %2011  ;;  %2081 = vst.msk [vmem:[#allocation3 + $0x64] sm:$0xf] %vm2055_vm9, %v2010_v43  ;;  %v5046_v43 = vld [vmem:[%s5126_s3] ss:$0 sm:$0xff] }
 0x231   : > { %2082 = vst.msk [vmem:[#allocation3 + $0x68] sm:$0xf] %vm2055_vm9, %v2012_v18 }
 0x233   : > { %v1982_v41 = vpop.permute.xlu1 %1981 }
 0x234   : > { %v2233_v17 = vpop.permute.xlu0 %2232  ;;  %2067 = vst.msk [vmem:[#allocation3 + $0x2c] sm:$0xf] %vm2055_vm9, %v1982_v41 }
 0x235   : > { %2321 = vst.msk [vmem:[#allocation3 + $0x20] sm:$0xf] %vm2312_vm10, %v2233_v17 }
 0x237   : > { %v2014_v44 = vpop.permute.xlu1 %2013 }
 0x238   : > { %v2265_v54 = vpop.permute.xlu0 %2264  ;;  %2083 = vst.msk [vmem:[#allocation3 + $0x6c] sm:$0xf] %vm2055_vm9, %v2014_v44 }
 0x239   : > { %2337 = vst.msk [vmem:[#allocation3 + $0x60] sm:$0xf] %vm2312_vm10, %v2265_v54 }
 0x23b   : > { %v2235_v34 = vpop.permute.xlu1 %2234 }
 0x23c   : > { %v2237_v47 = vpop.permute.xlu0 %2236  ;;  %2322 = vst.msk [vmem:[#allocation3 + $0x24] sm:$0xf] %vm2312_vm10, %v2235_v34 }
 0x23d   : > { %2323 = vst.msk [vmem:[#allocation3 + $0x28] sm:$0xf] %vm2312_vm10, %v2237_v47 }
 0x23f   : > { %v2267_v31 = vpop.permute.xlu1 %2266 }
 0x240   : > { %v2269_v42 = vpop.permute.xlu0 %2268  ;;  %2338 = vst.msk [vmem:[#allocation3 + $0x64] sm:$0xf] %vm2312_vm10, %v2267_v31 }
 0x241   : > { %2339 = vst.msk [vmem:[#allocation3 + $0x68] sm:$0xf] %vm2312_vm10, %v2269_v42 }
 0x243   : > { %v2239_v58 = vpop.permute.xlu1 %2238 }
 0x244   : > { %2324 = vst.msk [vmem:[#allocation3 + $0x2c] sm:$0xf] %vm2312_vm10, %v2239_v58  ;;  %v2490_v48 = vpop.permute.xlu0 %2489 }
 0x245   : > { %2578 = vst.msk [vmem:[#allocation3 + $0x20] sm:$0xf] %vm2569_vm11, %v2490_v48 }
 0x247   : > { %v2271_v49 = vpop.permute.xlu1 %2270 }
 0x248   : > { %2340 = vst.msk [vmem:[#allocation3 + $0x6c] sm:$0xf] %vm2312_vm10, %v2271_v49  ;;  %v2522_v46 = vpop.permute.xlu0 %2521 }
 0x249   : > { %2594 = vst.msk [vmem:[#allocation3 + $0x60] sm:$0xf] %vm2569_vm11, %v2522_v46 }
 0x24b   : > { %v2492_v15 = vpop.permute.xlu1 %2491 }
 0x24c   : > { %2579 = vst.msk [vmem:[#allocation3 + $0x24] sm:$0xf] %vm2569_vm11, %v2492_v15  ;;  %v2494_v55 = vpop.permute.xlu0 %2493 }
 0x24d   : > { %2580 = vst.msk [vmem:[#allocation3 + $0x28] sm:$0xf] %vm2569_vm11, %v2494_v55 }
 0x24f   : > { %v2524_v50 = vpop.permute.xlu1 %2523 }
 0x250   : > { %2595 = vst.msk [vmem:[#allocation3 + $0x64] sm:$0xf] %vm2569_vm11, %v2524_v50  ;;  %v2526_v40 = vpop.permute.xlu0 %2525 }
 0x251   : > { %2596 = vst.msk [vmem:[#allocation3 + $0x68] sm:$0xf] %vm2569_vm11, %v2526_v40 }
 0x253   : > { %v2496_v60 = vpop.permute.xlu1 %2495  ;;  %v3983_v51 = vld [vmem:[#allocation3 + $0x20] sm:$0xff]  }
 0x254   : > { %2581 = vst.msk [vmem:[#allocation3 + $0x2c] sm:$0xf] %vm2569_vm11, %v2496_v60  ;;  %v1501_v52 = vpop.permute.xlu0 %1500  ;;  %3923 = vmatprep.mubr.msk.bf16.mxu0 %vm2734_vm12, %v3983_v51 }
 0x255   : > { %1569 = vst.msk [vmem:[#allocation3 + $0x70] sm:$0xf] %vm1540_vm7, %v1501_v52 }
 0x257   : > { %v2528_v57 = vpop.permute.xlu1 %2527  ;;  %v3984_v59 = vld [vmem:[#allocation3 + $0x60] sm:$0xff]  }
 0x258   : > { %2597 = vst.msk [vmem:[#allocation3 + $0x6c] sm:$0xf] %vm2569_vm11, %v2528_v57  ;;  %v1505_v29 = vpop.permute.xlu0 %1504  ;;  %3939 = vmatprep.mubr.msk.bf16.mxu1 %vm2734_vm12, %v3984_v59 }
 0x259   : > { %1571 = vst.msk [vmem:[#allocation3 + $0x78] sm:$0xf] %vm1540_vm7, %v1505_v29 }
 0x25b   : > { %v1503_v61 = vpop.permute.xlu1 %1502  ;;  %v3985_v63 = vld [vmem:[#allocation3 + $0x28] sm:$0xff]  }
 0x25c   : > { %1570 = vst.msk [vmem:[#allocation3 + $0x74] sm:$0xf] %vm1540_vm7, %v1503_v61  ;;  %v1726_v0 = vpop.permute.xlu0 %1725  ;;  %3924 = vmatmul.mubr.msk.bf16.gmra.mxu0 %vm2734_vm12, %v3985_v63 }
 0x25d   : > { %1810 = vst.msk [vmem:[#allocation3 + $0x30] sm:$0xf] %vm1797_vm8, %v1726_v0 }
 0x25f   : > { %v1507_v2 = vpop.permute.xlu1 %1506  ;;  %v3986_v45 = vld [vmem:[#allocation3 + $0x68] sm:$0xff]  }
 0x260   : > { %1572 = vst.msk [vmem:[#allocation3 + $0x7c] sm:$0xf] %vm1540_vm7, %v1507_v2  ;;  %v1758_v39 = vpop.permute.xlu0 %1757  ;;  %3940 = vmatmul.mubr.msk.bf16.gmra.mxu1 %vm2734_vm12, %v3986_v45 }
 0x261   : > { %1826 = vst.msk [vmem:[#allocation3 + $0x70] sm:$0xf] %vm1797_vm8, %v1758_v39 }
 0x263   : > { %v1728_v5 = vpop.permute.xlu1 %1727 }
 0x264   : > { %1811 = vst.msk [vmem:[#allocation3 + $0x34] sm:$0xf] %vm1797_vm8, %v1728_v5  ;;  %v1730_v7 = vpop.permute.xlu0 %1729 }
 0x265   : > { %1812 = vst.msk [vmem:[#allocation3 + $0x38] sm:$0xf] %vm1797_vm8, %v1730_v7 }
 0x267   : > { %v1760_v53 = vpop.permute.xlu1 %1759 }
 0x268   : > { %1827 = vst.msk [vmem:[#allocation3 + $0x74] sm:$0xf] %vm1797_vm8, %v1760_v53  ;;  %v1762_v23 = vpop.permute.xlu0 %1761 }
 0x269   : > { %1828 = vst.msk [vmem:[#allocation3 + $0x78] sm:$0xf] %vm1797_vm8, %v1762_v23 }
 0x26b   : > { %v1732_v11 = vpop.permute.xlu1 %1731 }
 0x26c   : > { %1813 = vst.msk [vmem:[#allocation3 + $0x3c] sm:$0xf] %vm1797_vm8, %v1732_v11  ;;  %v1984_v12 = vpop.permute.xlu0 %1983 }
 0x26d   : > { %2068 = vst.msk [vmem:[#allocation3 + $0x30] sm:$0xf] %vm2055_vm9, %v1984_v12 }
 0x26f   : > { %v1764_v19 = vpop.permute.xlu1 %1763 }
 0x270   : > { %1829 = vst.msk [vmem:[#allocation3 + $0x7c] sm:$0xf] %vm1797_vm8, %v1764_v19  ;;  %v2016_v16 = vpop.permute.xlu0 %2015 }
 0x271   : > { %2084 = vst.msk [vmem:[#allocation3 + $0x70] sm:$0xf] %vm2055_vm9, %v2016_v16 }
 0x273   : > { %v1986_v8 = vpop.permute.xlu1 %1985 }
 0x274   : > { %2069 = vst.msk [vmem:[#allocation3 + $0x34] sm:$0xf] %vm2055_vm9, %v1986_v8  ;;  %v1988_v25 = vpop.permute.xlu0 %1987 }
 0x275   : > { %2070 = vst.msk [vmem:[#allocation3 + $0x38] sm:$0xf] %vm2055_vm9, %v1988_v25 }
 0x277   : > { %v2018_v28 = vpop.permute.xlu1 %2017 }
 0x278   : > { %2085 = vst.msk [vmem:[#allocation3 + $0x74] sm:$0xf] %vm2055_vm9, %v2018_v28  ;;  %v2020_v27 = vpop.permute.xlu0 %2019 }
 0x279   : > { %2086 = vst.msk [vmem:[#allocation3 + $0x78] sm:$0xf] %vm2055_vm9, %v2020_v27 }
 0x27b   : > { %v1990_v30 = vpop.permute.xlu1 %1989 }
 0x27c   : > { %2071 = vst.msk [vmem:[#allocation3 + $0x3c] sm:$0xf] %vm2055_vm9, %v1990_v30  ;;  %v2241_v13 = vpop.permute.xlu0 %2240 }
 0x27d   : > { %2325 = vst.msk [vmem:[#allocation3 + $0x30] sm:$0xf] %vm2312_vm10, %v2241_v13 }
 0x27f   : > { %v2022_v20 = vpop.permute.xlu1 %2021 }
 0x280   : > { %2087 = vst.msk [vmem:[#allocation3 + $0x7c] sm:$0xf] %vm2055_vm9, %v2022_v20  ;;  %v2273_v62 = vpop.permute.xlu0 %2272 }
 0x281   : > { %2341 = vst.msk [vmem:[#allocation3 + $0x70] sm:$0xf] %vm2312_vm10, %v2273_v62 }
 0x283   : > { %v2243_v35 = vpop.permute.xlu1 %2242 }
 0x284   : > { %2326 = vst.msk [vmem:[#allocation3 + $0x34] sm:$0xf] %vm2312_vm10, %v2243_v35  ;;  %v2245_v56 = vpop.permute.xlu0 %2244 }
 0x285   : > { %2327 = vst.msk [vmem:[#allocation3 + $0x38] sm:$0xf] %vm2312_vm10, %v2245_v56 }
 0x287   : > { %v2275_v24 = vpop.permute.xlu1 %2274 }
 0x288   : > { %2342 = vst.msk [vmem:[#allocation3 + $0x74] sm:$0xf] %vm2312_vm10, %v2275_v24  ;;  %v2277_v1 = vpop.permute.xlu0 %2276 }
 0x289   : > { %2343 = vst.msk [vmem:[#allocation3 + $0x78] sm:$0xf] %vm2312_vm10, %v2277_v1 }
 0x28b   : > { %v2247_v22 = vpop.permute.xlu1 %2246 }
 0x28c   : > { %2328 = vst.msk [vmem:[#allocation3 + $0x3c] sm:$0xf] %vm2312_vm10, %v2247_v22  ;;  %v2498_v3 = vpop.permute.xlu0 %2497 }
 0x28d   : > { %2582 = vst.msk [vmem:[#allocation3 + $0x30] sm:$0xf] %vm2569_vm11, %v2498_v3 }
 0x28f   : > { %v2279_v4 = vpop.permute.xlu1 %2278 }
 0x290   : > { %2344 = vst.msk [vmem:[#allocation3 + $0x7c] sm:$0xf] %vm2312_vm10, %v2279_v4  ;;  %v2530_v6 = vpop.permute.xlu0 %2529 }
 0x291   : > { %2598 = vst.msk [vmem:[#allocation3 + $0x70] sm:$0xf] %vm2569_vm11, %v2530_v6 }
 0x293   : > { %v2500_v33 = vpop.permute.xlu1 %2499 }
 0x294   : > { %2583 = vst.msk [vmem:[#allocation3 + $0x34] sm:$0xf] %vm2569_vm11, %v2500_v33  ;;  %v2502_v21 = vpop.permute.xlu0 %2501 }
 0x295   : > { %2584 = vst.msk [vmem:[#allocation3 + $0x38] sm:$0xf] %vm2569_vm11, %v2502_v21 }
 0x297   : > { %v2532_v36 = vpop.permute.xlu1 %2531 }
 0x298   : > { %2599 = vst.msk [vmem:[#allocation3 + $0x74] sm:$0xf] %vm2569_vm11, %v2532_v36  ;;  %v2534_v32 = vpop.permute.xlu0 %2533  ;;  %v3917_v14 = vpop.f32.mrf.mxu0 }
 0x299   : > { %2600 = vst.msk [vmem:[#allocation3 + $0x78] sm:$0xf] %vm2569_vm11, %v2534_v32  ;;  %v2957_v47 = vmul.f32 %v3917_v14, %v5039_v38 }
 0x29a   : > { %v2821_v10 = vpop.f32.mrf.mxu0 }
 0x29b   : > { %v2504_v9 = vpop.permute.xlu1 %2503  ;;  %v3987_v37 = vld [vmem:[#allocation3 + $0x30] sm:$0xff]   ;;  %v2955_v26 = vmul.f32 %v5039_v38, %v2821_v10  ;;  %v2996_v50 = vadd.f32 %v5046_v43, %v2957_v47 }
 0x29c   : > { %2585 = vst.msk [vmem:[#allocation3 + $0x3c] sm:$0xf] %vm2569_vm11, %v2504_v9  ;;  %v3918_v18 = vpop.f32.mrf.mxu0  ;;  %3927 = vmatprep.mubr.msk.bf16.mxu0 %vm2734_vm12, %v3987_v37  ;;  %v3933_v41 = vpop.f32.mrf.mxu1 }
 0x29d   : > { %v2994_v17 = vadd.f32 %v5046_v43, %v2955_v26  ;;  %v2958_v40 = vmul.f32 %v3918_v18, %v5039_v38  ;;  %v2973_v52 = vmul.f32 %v3933_v41, %v5039_v38  ;;  %v3028_v63 = vmax.f32 %v2996_v50, 0.0 }
 0x29e   : > { %v2824_v54 = vpop.f32.mrf.mxu0  ;;  %v2885_v58 = vpop.f32.mrf.mxu1 }
 0x29f   : > { %v2536_v44 = vpop.permute.xlu1 %2535  ;;  %v3988_v34 = vld [vmem:[#allocation3 + $0x70] sm:$0xff]   ;;  %v3026_v31 = vmax.f32 %v2994_v17, 0.0  ;;  %v2956_v42 = vmul.f32 %v5039_v38, %v2824_v54  ;;  %v2971_v48 = vmul.f32 %v5039_v38, %v2885_v58  ;;  %v2997_v0 = vadd.f32 %v5046_v43, %v2958_v40 }
 0x2a0   : > { %2601 = vst.msk [vmem:[#allocation3 + $0x7c] sm:$0xf] %vm2569_vm11, %v2536_v44  ;;  %3943 = vmatprep.mubr.msk.bf16.mxu1 %vm2734_vm12, %v3988_v34  ;;  %v3934_v46 = vpop.f32.mrf.mxu1  ;;  %v3012_v2 = vadd.f32 %v5046_v43, %v2973_v52 }
 0x2a1   : > { %v2995_v49 = vadd.f32 %v5046_v43, %v2956_v42  ;;  %3058 = vxpose.xlu0.b32.start [1/16] (narrow) %v3026_v31, 32  ;;  %v3010_v15 = vadd.f32 %v5046_v43, %v2971_v48  ;;  %v2974_v45 = vmul.f32 %v3934_v46, %v5039_v38  ;;  %v3029_v5 = vmax.f32 %v2997_v0, 0.0 }
 0x2a2   : > { %v2888_v51 = vpop.f32.mrf.mxu1  ;;  %v3044_v7 = vmax.f32 %v3012_v2, 0.0 }
 0x2a3   : > { %v3989_v55 = vld [vmem:[#allocation3 + $0x38] sm:$0xff]   ;;  %v3027_v60 = vmax.f32 %v2995_v49, 0.0  ;;  %v3042_v57 = vmax.f32 %v3010_v15, 0.0  ;;  %v2972_v59 = vmul.f32 %v5039_v38, %v2888_v51  ;;  %v3013_v53 = vadd.f32 %v5046_v43, %v2974_v45 }
 0x2a4   : > { %3928 = vmatmul.mubr.msk.bf16.gmra.mxu0 %vm2734_vm12, %v3989_v55 }
 0x2a5   : > { %3059 = vxpose.xlu0.b32.cont [2/16] (narrow) %v3027_v60, 32  ;;  %v3011_v29 = vadd.f32 %v5046_v43, %v2972_v59  ;;  %3090 = vxpose.xlu1.b32.start [1/16] (narrow) %v3042_v57, 32  ;;  %v3045_v23 = vmax.f32 %v3013_v53, 0.0 }
 0x2a7   : > { %v3990_v61 = vld [vmem:[#allocation3 + $0x78] sm:$0xff]   ;;  %v3043_v39 = vmax.f32 %v3011_v29, 0.0 }
 0x2a8   : > { %3944 = vmatmul.mubr.msk.bf16.gmra.mxu1 %vm2734_vm12, %v3990_v61 }
 0x2a9   : > { %3060 = vxpose.xlu0.b32.cont [3/16] (narrow) %v3028_v63, 32  ;;  %3091 = vxpose.xlu1.b32.cont [2/16] (narrow) %v3043_v39, 32 }
 0x2ad   : > { %3061 = vxpose.xlu0.b32.cont [4/16] (narrow) %v3029_v5, 32  ;;  %3092 = vxpose.xlu1.b32.cont [3/16] (narrow) %v3044_v7, 32 }
 0x2b1   : > { %3093 = vxpose.xlu1.b32.cont [4/16] (narrow) %v3045_v23, 32 }
 0x2d8   : > { %v3921_v11 = vpop.f32.mrf.mxu0 }
 0x2d9   : > { %v2961_v30 = vmul.f32 %v3921_v11, %v5039_v38 }
 0x2da   : > { %v2837_v12 = vpop.f32.mrf.mxu0 }
 0x2db   : > { %v2959_v19 = vmul.f32 %v5039_v38, %v2837_v12  ;;  %v3000_v22 = vadd.f32 %v5046_v43, %v2961_v30 }
 0x2dc   : > { %v3922_v16 = vpop.f32.mrf.mxu0  ;;  %v3937_v8 = vpop.f32.mrf.mxu1 }
 0x2dd   : > { %v2998_v25 = vadd.f32 %v5046_v43, %v2959_v19  ;;  %v2962_v3 = vmul.f32 %v3922_v16, %v5039_v38  ;;  %v2977_v33 = vmul.f32 %v3937_v8, %v5039_v38  ;;  %v3032_v32 = vmax.f32 %v3000_v22, 0.0 }
 0x2de   : > { %v2840_v28 = vpop.f32.mrf.mxu0  ;;  %v2901_v27 = vpop.f32.mrf.mxu1 }
 0x2df   : > { %v3030_v13 = vmax.f32 %v2998_v25, 0.0  ;;  %v2960_v20 = vmul.f32 %v5039_v38, %v2840_v28  ;;  %v2975_v62 = vmul.f32 %v5039_v38, %v2901_v27  ;;  %v3001_v14 = vadd.f32 %v5046_v43, %v2962_v3 }
 0x2e0   : > { %v3938_v35 = vpop.f32.mrf.mxu1  ;;  %v3016_v10 = vadd.f32 %v5046_v43, %v2977_v33 }
 0x2e1   : > { %v2999_v56 = vadd.f32 %v5046_v43, %v2960_v20  ;;  %3062 = vxpose.xlu0.b32.cont [5/16] (narrow) %v3030_v13, 32  ;;  %v3014_v24 = vadd.f32 %v5046_v43, %v2975_v62  ;;  %v2978_v37 = vmul.f32 %v3938_v35, %v5039_v38  ;;  %v3033_v26 = vmax.f32 %v3001_v14, 0.0 }
 0x2e2   : > { %v2904_v1 = vpop.f32.mrf.mxu1  ;;  %v3048_v18 = vmax.f32 %v3016_v10, 0.0 }
 0x2e3   : > { %v3031_v4 = vmax.f32 %v2999_v56, 0.0  ;;  %v2976_v6 = vmul.f32 %v5039_v38, %v2904_v1  ;;  %v3046_v21 = vmax.f32 %v3014_v24, 0.0  ;;  %v3017_v41 = vadd.f32 %v5046_v43, %v2978_v37 }
 0x2e5   : > { %v3015_v36 = vadd.f32 %v5046_v43, %v2976_v6  ;;  %3063 = vxpose.xlu0.b32.cont [6/16] (narrow) %v3031_v4, 32  ;;  %3094 = vxpose.xlu1.b32.cont [5/16] (narrow) %v3046_v21, 32  ;;  %v3049_v17 = vmax.f32 %v3017_v41, 0.0 }
 0x2e7   : > { %v3047_v9 = vmax.f32 %v3015_v36, 0.0 }
 0x2e9   : > { %3064 = vxpose.xlu0.b32.cont [7/16] (narrow) %v3032_v32, 32  ;;  %3095 = vxpose.xlu1.b32.cont [6/16] (narrow) %v3047_v9, 32 }
 0x2ed   : > { %3065 = vxpose.xlu0.b32.cont [8/16] (narrow) %v3033_v26, 32  ;;  %3096 = vxpose.xlu1.b32.cont [7/16] (narrow) %v3048_v18, 32 }
 0x2f1   : > { %3097 = vxpose.xlu1.b32.cont [8/16] (narrow) %v3049_v17, 32 }
 0x31c   : > { %v3925_v44 = vpop.f32.mrf.mxu0 }
 0x31d   : > { %v2965_v49 = vmul.f32 %v3925_v44, %v5039_v38 }
 0x31e   : > { %v2853_v54 = vpop.f32.mrf.mxu0 }
 0x31f   : > { %v2963_v34 = vmul.f32 %v5039_v38, %v2853_v54  ;;  %v3004_v52 = vadd.f32 %v5046_v43, %v2965_v49 }
 0x320   : > { %v3926_v47 = vpop.f32.mrf.mxu0  ;;  %v3941_v31 = vpop.f32.mrf.mxu1 }
 0x321   : > { %v3002_v42 = vadd.f32 %v5046_v43, %v2963_v34  ;;  %v2966_v57 = vmul.f32 %v3926_v47, %v5039_v38  ;;  %v2981_v61 = vmul.f32 %v3941_v31, %v5039_v38  ;;  %v3036_v2 = vmax.f32 %v3004_v52, 0.0 }
 0x322   : > { %v2856_v58 = vpop.f32.mrf.mxu0  ;;  %v2917_v48 = vpop.f32.mrf.mxu1 }
 0x323   : > { %v3034_v46 = vmax.f32 %v3002_v42, 0.0  ;;  %v2964_v15 = vmul.f32 %v5039_v38, %v2856_v58  ;;  %v2979_v55 = vmul.f32 %v5039_v38, %v2917_v48  ;;  %v3005_v45 = vadd.f32 %v5046_v43, %v2966_v57 }
 0x324   : > { %v3942_v50 = vpop.f32.mrf.mxu1  ;;  %v3020_v5 = vadd.f32 %v5046_v43, %v2981_v61 }
 0x325   : > { %v3003_v40 = vadd.f32 %v5046_v43, %v2964_v15  ;;  %3066 = vxpose.xlu0.b32.cont [9/16] (narrow) %v3034_v46, 32  ;;  %v3018_v60 = vadd.f32 %v5046_v43, %v2979_v55  ;;  %v2982_v7 = vmul.f32 %v3942_v50, %v5039_v38  ;;  %v3037_v53 = vmax.f32 %v3005_v45, 0.0 }
 0x326   : > { %v2920_v51 = vpop.f32.mrf.mxu1  ;;  %v3052_v23 = vmax.f32 %v3020_v5, 0.0 }
 0x327   : > { %v3035_v59 = vmax.f32 %v3003_v40, 0.0  ;;  %v2980_v29 = vmul.f32 %v5039_v38, %v2920_v51  ;;  %v3050_v63 = vmax.f32 %v3018_v60, 0.0  ;;  %v3021_v11 = vadd.f32 %v5046_v43, %v2982_v7 }
 0x329   : > { %v3019_v0 = vadd.f32 %v5046_v43, %v2980_v29  ;;  %3067 = vxpose.xlu0.b32.cont [10/16] (narrow) %v3035_v59, 32  ;;  %3098 = vxpose.xlu1.b32.cont [9/16] (narrow) %v3050_v63, 32  ;;  %v3053_v12 = vmax.f32 %v3021_v11, 0.0 }
 0x32b   : > { %v3051_v39 = vmax.f32 %v3019_v0, 0.0 }
 0x32d   : > { %3068 = vxpose.xlu0.b32.cont [11/16] (narrow) %v3036_v2, 32  ;;  %3099 = vxpose.xlu1.b32.cont [10/16] (narrow) %v3051_v39, 32 }
 0x331   : > { %3069 = vxpose.xlu0.b32.cont [12/16] (narrow) %v3037_v53, 32  ;;  %3100 = vxpose.xlu1.b32.cont [11/16] (narrow) %v3052_v23, 32 }
 0x335   : > { %3101 = vxpose.xlu1.b32.cont [12/16] (narrow) %v3053_v12, 32 }
 0x364   : > { %v3929_v19 = vpop.f32.mrf.mxu0 }
 0x365   : > { %v2969_v20 = vmul.f32 %v3929_v19, %v5039_v38 }
 0x366   : > { %v2869_v16 = vpop.f32.mrf.mxu0 }
 0x367   : > { %v2967_v8 = vmul.f32 %v5039_v38, %v2869_v16  ;;  %v3008_v4 = vadd.f32 %v5046_v43, %v2969_v20 }
 0x368   : > { %v3930_v25 = vpop.f32.mrf.mxu0  ;;  %v3945_v28 = vpop.f32.mrf.mxu1 }
 0x369   : > { %v3006_v27 = vadd.f32 %v5046_v43, %v2967_v8  ;;  %v2970_v6 = vmul.f32 %v3930_v25, %v5039_v38  ;;  %v2985_v36 = vmul.f32 %v3945_v28, %v5039_v38  ;;  %v3040_v9 = vmax.f32 %v3008_v4, 0.0 }
 0x36a   : > { %v2872_v30 = vpop.f32.mrf.mxu0  ;;  %v2933_v13 = vpop.f32.mrf.mxu1 }
 0x36b   : > { %v3038_v62 = vmax.f32 %v3006_v27, 0.0  ;;  %v2968_v35 = vmul.f32 %v5039_v38, %v2872_v30  ;;  %v2983_v56 = vmul.f32 %v5039_v38, %v2933_v13  ;;  %v3009_v10 = vadd.f32 %v5046_v43, %v2970_v6 }
 0x36c   : > { %v3946_v24 = vpop.f32.mrf.mxu1  ;;  %v3024_v26 = vadd.f32 %v5046_v43, %v2985_v36 }
 0x36d   : > { %v3007_v1 = vadd.f32 %v5046_v43, %v2968_v35  ;;  %3070 = vxpose.xlu0.b32.cont [13/16] (narrow) %v3038_v62, 32  ;;  %v3022_v22 = vadd.f32 %v5046_v43, %v2983_v56  ;;  %v2986_v18 = vmul.f32 %v3946_v24, %v5039_v38  ;;  %v3041_v41 = vmax.f32 %v3009_v10, 0.0 }
 0x36e   : > { %v2936_v3 = vpop.f32.mrf.mxu1  ;;  %v3056_v17 = vmax.f32 %v3024_v26, 0.0 }
 0x36f   : > { %v3039_v33 = vmax.f32 %v3007_v1, 0.0  ;;  %v2984_v21 = vmul.f32 %v5039_v38, %v2936_v3  ;;  %v3054_v32 = vmax.f32 %v3022_v22, 0.0  ;;  %v3025_v44 = vadd.f32 %v5046_v43, %v2986_v18 }
 0x371   : > { %v3023_v14 = vadd.f32 %v5046_v43, %v2984_v21  ;;  %3071 = vxpose.xlu0.b32.cont [14/16] (narrow) %v3039_v33, 32  ;;  %3102 = vxpose.xlu1.b32.cont [13/16] (narrow) %v3054_v32, 32  ;;  %v3057_v54 = vmax.f32 %v3025_v44, 0.0 }
 0x373   : > { %v3055_v37 = vmax.f32 %v3023_v14, 0.0 }
 0x375   : > { %3072 = vxpose.xlu0.b32.cont [15/16] (narrow) %v3040_v9, 32  ;;  %3103 = vxpose.xlu1.b32.cont [14/16] (narrow) %v3055_v37, 32 }
 0x379   : > { %3073 = vxpose.xlu0.b32.end [16/16] (narrow) %v3041_v41, 32  ;;  %3104 = vxpose.xlu1.b32.cont [15/16] (narrow) %v3056_v17, 32 }
 0x37d   : > { %3105 = vxpose.xlu1.b32.end [16/16] (narrow) %v3057_v54, 32 }
 0x3b9   : > { %v3074_v34 = vpop.trf.xlu0 }
 0x3ba   : > { %3122 = vst [vmem:[%s197_s19] sm:$0xff] %v3074_v34 }
 0x3bd   : > { %v3075_v47 = vpop.trf.xlu0  ;;  %v3106_v31 = vpop.trf.xlu1 }
 0x3be   : > { %3124 = vst [vmem:[%s197_s19 + $0x10] sm:$0xff] %v3075_v47  ;;  %3123 = vst [vmem:[%s197_s19 + $0x8] sm:$0xff] %v3106_v31 }
 0x3c1   : > { %v3076_v38 = vpop.trf.xlu0  ;;  %v3107_v42 = vpop.trf.xlu1 }
 0x3c2   : > { %3126 = vst [vmem:[%s197_s19 + $0x20] sm:$0xff] %v3076_v38  ;;  %3125 = vst [vmem:[%s197_s19 + $0x18] sm:$0xff] %v3107_v42 }
 0x3c5   : > { %v3077_v43 = vpop.trf.xlu0  ;;  %v3108_v58 = vpop.trf.xlu1 }
 0x3c6   : > { %3128 = vst [vmem:[%s197_s19 + $0x30] sm:$0xff] %v3077_v43  ;;  %3127 = vst [vmem:[%s197_s19 + $0x28] sm:$0xff] %v3108_v58 }
 0x3c9   : > { %v3109_v48 = vpop.trf.xlu1 }
 0x3ca   : > { %3129 = vst [vmem:[%s197_s19 + $0x38] sm:$0xff] %v3109_v48 }
 0x3cb PF: > { %s14_s15 = sadd.s32 1, %s3997_s15  }
 0x3cc   : > { %p11_p4 = scmp.ge.s32.totalorder %s14_s15, 4  }
 0x3ce   :  { %13 = sbr.rel (!%p11_p4) target bundleno = 1 (0x1), region = 68 }

</bundles_post_ra>
